<compile_context>
chip_gen: v5e
topology: v5e:2x2
jax: 0.10.0
libtpu: 0.0.40
codegen_flags: <defaults>
</compile_context>

<pallas_src>
import jax
import jax.numpy as jnp
from jax.experimental import pallas as pl
from jax.experimental.pallas import tpu as pltpu

# ----------------------- small, self-consistent hyper-parameters -----------------------
HIDDEN = 32            # hidden_size (shared by ViT encoder and caption decoder)
NUM_HEADS = 4
HEAD_DIM = HIDDEN // NUM_HEADS
NUM_ENC_LAYERS = 2
NUM_DEC_LAYERS = 2
VOCAB = 64             # num_classes / vocabulary_size
VOCAB_PAD = 128        # fc output padded to a full 128-lane slab (lane-dense store)
IMAGE_SIZE = 16
PATCH = 8
MAX_CAPTION_LEN = 8
MLP_DIM = 64           # ViT encoder MLP hidden dim (4*HIDDEN at real scale)
FFN_DIM = 64           # decoder feed-forward dim (PyTorch default 2048; scaled down)
IN_CH = 3
CPP = IN_CH * PATCH * PATCH                     # per-patch im2col row length
TOKENS = (IMAGE_SIZE // PATCH) ** 2 + 1         # patches + cls token


# ------------------------------ parameter slab layout ----------------------------------
def _round8(n):
    return (n + 7) & ~7


def _build_layout():
    """name -> (row_offset, rows, cols) inside one (TOTAL_ROWS, 128) f32 slab."""
    entries = {}
    rows = 0

    def add(name, r, c):
        nonlocal rows
        entries[name] = (rows, r, c)
        rows += _round8(r)          # 8-sublane aligned so every in-kernel view is aligned

    add("patch_w", CPP, HIDDEN)
    add("patch_b", 1, HIDDEN)
    add("cls", 1, HIDDEN)
    add("enc_pos", TOKENS, HIDDEN)
    for i in range(NUM_ENC_LAYERS):
        p = f"enc{i}/"
        add(p + "ln1_g", 1, HIDDEN); add(p + "ln1_b", 1, HIDDEN)
        add(p + "sa_wqkv", HIDDEN, 3 * HIDDEN); add(p + "sa_bqkv", 1, 3 * HIDDEN)
        add(p + "sa_wo", HIDDEN, HIDDEN);       add(p + "sa_bo", 1, HIDDEN)
        add(p + "ln2_g", 1, HIDDEN); add(p + "ln2_b", 1, HIDDEN)
        add(p + "mlp_w1", HIDDEN, MLP_DIM);     add(p + "mlp_b1", 1, MLP_DIM)
        add(p + "mlp_w2", MLP_DIM, HIDDEN);     add(p + "mlp_b2", 1, HIDDEN)
    add("enc_ln_g", 1, HIDDEN); add("enc_ln_b", 1, HIDDEN)
    add("embed", VOCAB, HIDDEN)
    add("dec_pos", MAX_CAPTION_LEN, HIDDEN)
    for i in range(NUM_DEC_LAYERS):
        p = f"dec{i}/"
        add(p + "sa_wqkv", HIDDEN, 3 * HIDDEN); add(p + "sa_bqkv", 1, 3 * HIDDEN)
        add(p + "sa_wo", HIDDEN, HIDDEN);       add(p + "sa_bo", 1, HIDDEN)
        add(p + "ln1_g", 1, HIDDEN); add(p + "ln1_b", 1, HIDDEN)
        add(p + "ca_wq", HIDDEN, HIDDEN);       add(p + "ca_bq", 1, HIDDEN)
        add(p + "ca_wkv", HIDDEN, 2 * HIDDEN);  add(p + "ca_bkv", 1, 2 * HIDDEN)
        add(p + "ca_wo", HIDDEN, HIDDEN);       add(p + "ca_bo", 1, HIDDEN)
        add(p + "ln2_g", 1, HIDDEN); add(p + "ln2_b", 1, HIDDEN)
        add(p + "ffn_w1", HIDDEN, FFN_DIM);     add(p + "ffn_b1", 1, FFN_DIM)
        add(p + "ffn_w2", FFN_DIM, HIDDEN);     add(p + "ffn_b2", 1, HIDDEN)
        add(p + "ln3_g", 1, HIDDEN); add(p + "ln3_b", 1, HIDDEN)
    add("fc_w", HIDDEN, VOCAB_PAD)
    add("fc_b", 1, VOCAB_PAD)
    return entries, _round8(rows)


LAYOUT, TOTAL_ROWS = _build_layout()


# ------------------------- in-kernel building blocks (pure jnp) -------------------------
def _layer_norm(x, g, b):
    """LayerNorm over the last axis, eps=1e-5 (PyTorch default)."""
    mu = jnp.mean(x, axis=-1, keepdims=True)
    var = jnp.mean((x - mu) ** 2, axis=-1, keepdims=True)
    return (x - mu) * jax.lax.rsqrt(var + 1e-5) * g + b


def _softmax(s):
    m = jnp.max(s, axis=-1, keepdims=True)
    e = jnp.exp(s - m)
    # divide moved to the EUP (free slot) via approximate reciprocal (~2^-12 rel. error)
    return e * pl.reciprocal(jnp.sum(e, axis=-1, keepdims=True), approx=True)


def _attend(qsrc, qoff, ksrc, koff, vsrc, voff, wo, bo, bias):
    """All heads' scores stacked on a leading batch axis -> one softmax, one out-proj."""
    HD = HEAD_DIM
    s = jnp.stack(
        [jnp.einsum("qd,kd->qk",
                    qsrc[:, qoff + h * HD:qoff + (h + 1) * HD],
                    ksrc[:, koff + h * HD:koff + (h + 1) * HD],
                    preferred_element_type=jnp.float32)
         for h in range(NUM_HEADS)], axis=0)                 # (H, Sq, Sk)
    if bias is not None:                                     # only the causal mask, f32
        s = s + bias
    p = _softmax(s)                                          # ONE masked softmax for all heads
    ctx = jnp.concatenate(
        [jnp.dot(p[h], vsrc[:, voff + h * HD:voff + (h + 1) * HD],
                 preferred_element_type=jnp.float32)
         for h in range(NUM_HEADS)], axis=1)                 # (Sq, D) head merge along lanes
    return jnp.dot(ctx, wo, preferred_element_type=jnp.float32) + bo


def _self_attn(g, prefix, x, bias):
    """Packed QKV projection (one matmul); 1/sqrt(Dh) pre-folded into the Q columns."""
    D = HIDDEN
    qkv = jnp.dot(x, g(prefix + "wqkv"), preferred_element_type=jnp.float32) + g(prefix + "bqkv")
    return _attend(qkv, 0, qkv, D, qkv, 2 * D, g(prefix + "wo"), g(prefix + "bo"), bias)


def _cross_attn(g, prefix, x_q, memory):
    """Q from the decoder stream, fused KV from encoder memory; scale folded into wq."""
    D = HIDDEN
    q = jnp.dot(x_q, g(prefix + "wq"), preferred_element_type=jnp.float32) + g(prefix + "bq")
    kv = jnp.dot(memory, g(prefix + "wkv"), preferred_element_type=jnp.float32) + g(prefix + "bkv")
    return _attend(q, 0, kv, 0, kv, D, g(prefix + "wo"), g(prefix + "bo"), None)


# --------------------------- the single fused forward kernel ----------------------------
def _fused_forward_kernel(patch_ref, caps_ref, slab_ref, out_ref):
    # zero-cost static views into the single parameter slab
    def g(name):
        off, r, c = LAYOUT[name]
        return slab_ref[off:off + r, 0:c]

    # ------------------------------ ViT encoder (one image) -----------------------------
    x = jnp.dot(patch_ref[...], g("patch_w"), preferred_element_type=jnp.float32) + g("patch_b")
    is_cls = jax.lax.broadcasted_iota(jnp.int32, (x.shape[0], 1), 0) == 0
    x = jnp.where(is_cls, g("cls"), x)                       # row 0 := class token
    x = x + g("enc_pos")
    for i in range(NUM_ENC_LAYERS):
        pre = f"enc{i}/"
        y = _layer_norm(x, g(pre + "ln1_g"), g(pre + "ln1_b"))
        x = x + _self_attn(g, pre + "sa_", y, None)
        y = _layer_norm(x, g(pre + "ln2_g"), g(pre + "ln2_b"))
        y = jnp.dot(y, g(pre + "mlp_w1"), preferred_element_type=jnp.float32) + g(pre + "mlp_b1")
        # TODO(synk): torchvision ViT uses exact erf-GELU; tanh approximation kept for
        # robust Mosaic lowering.
        y = jax.nn.gelu(y, approximate=True)
        y = jnp.dot(y, g(pre + "mlp_w2"), preferred_element_type=jnp.float32) + g(pre + "mlp_b2")
        x = x + y
    memory = _layer_norm(x, g("enc_ln_g"), g("enc_ln_b"))

    # -------------------- caption embedding lookup, entirely in-kernel ------------------
    caps = caps_ref[...]                                     # (S, 1) int32 token ids
    S = caps.shape[0]
    onehot = (caps == jax.lax.broadcasted_iota(jnp.int32, (S, VOCAB), 1)).astype(jnp.float32)
    xd = jnp.dot(onehot, g("embed"), preferred_element_type=jnp.float32)
    xd = xd * (float(HIDDEN) ** 0.5) + g("dec_pos")[:S, :]

    # causal additive mask (tgt_mask = triu(ones, diagonal=1)), built once in-kernel, f32
    row = jax.lax.broadcasted_iota(jnp.int32, (S, S), 0)
    col = jax.lax.broadcasted_iota(jnp.int32, (S, S), 1)
    causal = jnp.where(col > row, jnp.float32(-1e30), jnp.float32(0.0))

    # ------------------------------- caption decoder ------------------------------------
    for i in range(NUM_DEC_LAYERS):
        pre = f"dec{i}/"
        xd = _layer_norm(xd + _self_attn(g, pre + "sa_", xd, causal),
                         g(pre + "ln1_g"), g(pre + "ln1_b"))
        xd = _layer_norm(xd + _cross_attn(g, pre + "ca_", xd, memory),
                         g(pre + "ln2_g"), g(pre + "ln2_b"))
        y = jnp.dot(xd, g(pre + "ffn_w1"), preferred_element_type=jnp.float32) + g(pre + "ffn_b1")
        y = jnp.maximum(y, 0.0)                              # ReLU (nn.TransformerDecoderLayer)
        y = jnp.dot(y, g(pre + "ffn_w2"), preferred_element_type=jnp.float32) + g(pre + "ffn_b2")
        xd = _layer_norm(xd + y, g(pre + "ln3_g"), g(pre + "ln3_b"))

    logits = jnp.dot(xd, g("fc_w"), preferred_element_type=jnp.float32) + g("fc_b")
    out_ref[...] = logits.astype(out_ref.dtype)              # full (8,128) lane-dense tile


# ------------------------------------ model forward -------------------------------------
@jax.jit
def forward(param_slab, images, captions):
    B, C, H, W = images.shape
    gh, gw = H // PATCH, W // PATCH
    n_patches = gh * gw
    S = captions.shape[1]

    # im2col layout for the patch-embedding conv; one zero row per image reserved for the
    # class token (layout-only preprocessing — all compute happens inside the kernel).
    patch_rows = (images.reshape(B, C, gh, PATCH, gw, PATCH)
                        .transpose(0, 2, 4, 1, 3, 5)
                        .reshape(B, n_patches, C * PATCH * PATCH))
    patch_rows = jnp.pad(patch_rows, ((0, 0), (1, 0), (0, 0)))     # (B, T, CPP)
    caps3 = captions.astype(jnp.int32).reshape(B, S, 1)            # ids; one-hot built in-kernel

    logits = pl.pallas_call(
        _fused_forward_kernel,
        out_shape=jax.ShapeDtypeStruct((B * S, VOCAB_PAD), jnp.float32),
        grid=(B,),                                                  # one image per grid step
        in_specs=[
            pl.BlockSpec((pl.Squeezed(), n_patches + 1, C * PATCH * PATCH),
                         lambda b: (b, 0, 0)),
            pl.BlockSpec((pl.Squeezed(), S, 1), lambda b: (b, 0, 0)),
            # single packed parameter slab; constant index map -> fetched once, not per step
            pl.BlockSpec((TOTAL_ROWS, 128), lambda b: (0, 0)),
        ],
        out_specs=pl.BlockSpec((S, VOCAB_PAD), lambda b: (b, 0)),
        compiler_params=pltpu.CompilerParams(dimension_semantics=("parallel",)),
    )(patch_rows, caps3, param_slab)
    return logits[:, :VOCAB].reshape(B, S, VOCAB)


# ------------------------------------ parameter init ------------------------------------
def init_params(key):
    """Random weights with the PyTorch module's structure, keyed by LAYOUT names."""
    kit = iter(jax.random.split(key, len(LAYOUT)))

    def w(r, c, scale=0.02):
        return scale * jax.random.normal(next(kit), (r, c), dtype=jnp.float32)

    vals = {}
    for name, (_, r, c) in LAYOUT.items():
        base = name.split("/")[-1]
        if base.endswith("_g"):                          # LayerNorm gains
            vals[name] = jnp.ones((r, c), jnp.float32)
        elif base == "cls":
            vals[name] = w(r, c)
        elif base == "dec_pos":                          # nn.Parameter(torch.zeros(...))
            vals[name] = jnp.zeros((r, c), jnp.float32)
        elif base == "embed":                            # nn.Embedding ~ N(0, 1)
            vals[name] = jax.random.normal(next(kit), (r, c), dtype=jnp.float32)
        elif base == "fc_w":                             # lane-padded logits projection
            m = jnp.zeros((r, c), jnp.float32)
            vals[name] = m.at[:, :VOCAB].set(w(r, VOCAB))
        elif r == 1:                                     # every remaining (1, c) entry is a bias
            vals[name] = jnp.zeros((r, c), jnp.float32)
        else:                                            # all other weight matrices
            vals[name] = w(r, c)

    # fold the attention scale 1/sqrt(head_dim) into the Q projections (free at init time)
    sc = 1.0 / float(HEAD_DIM) ** 0.5
    for name in list(vals):
        base = name.split("/")[-1]
        if base in ("sa_wqkv", "sa_bqkv"):
            vals[name] = vals[name].at[:, :HIDDEN].multiply(sc)
        elif base in ("ca_wq", "ca_bq"):
            vals[name] = vals[name] * sc
    return vals


def pack_params(vals):
    """Pack all parameters into ONE lane-dense (TOTAL_ROWS, 128) f32 slab (one kernel DMA)."""
    slab = jnp.zeros((TOTAL_ROWS, 128), jnp.float32)
    for name, (off, r, c) in LAYOUT.items():
        slab = slab.at[off:off + r, :c].set(vals[name])
    return slab


# ------------------------------------------ main ----------------------------------------
if __name__ == "__main__":
    key = jax.random.PRNGKey(0)
    k_param, k_img, k_cap = jax.random.split(key, 3)

    param_slab = pack_params(init_params(k_param))          # packed once, outside jit
    images = jax.random.normal(k_img, (2, IN_CH, IMAGE_SIZE, IMAGE_SIZE), jnp.float32)
    captions = jax.random.randint(k_cap, (2, MAX_CAPTION_LEN), 0, VOCAB, dtype=jnp.int32)

    logits = forward(param_slab, images, captions)
    jax.block_until_ready(logits)
    assert logits.shape == (2, MAX_CAPTION_LEN, VOCAB)
    assert bool(jnp.all(jnp.isfinite(logits)))
    print("KERNEL_OK")
</pallas_src>

<mosaic_0001>
module attributes {stable_mosaic.version = 11 : i64} {
  func.func @_fused_forward_kernel(%arg0: i32, %arg1: memref<1x5x192xf32, #tpu.memory_space<vmem>>, %arg2: memref<1x8x1xi32, #tpu.memory_space<vmem>>, %arg3: memref<1512x128xf32, #tpu.memory_space<vmem>>, %arg4: memref<8x128xf32, #tpu.memory_space<vmem>>) attributes {dimension_semantics = [#tpu.dimension_semantics<parallel>], iteration_bounds = array<i64: 2>, scalar_prefetch = 0 : i64, scratch_operands = 0 : i64, tpu.core_type = #tpu.core_type<tc>, window_params = [{transform_indices = @transform_0, window_bounds = array<i64: 1, 5, 192>}, {transform_indices = @transform_1, window_bounds = array<i64: 1, 8, 1>}, {pipeline_mode = #tpu.pipeline_mode<synchronous>, transform_indices = @transform_2, window_bounds = array<i64: 1512, 128>}, {transform_indices = @transform_3, window_bounds = array<i64: 8, 128>}]} {
    %c0 = arith.constant 0 : index
    %c0_0 = arith.constant 0 : index
    %c0_1 = arith.constant 0 : index
    %0 = vector.load %arg1[%c0, %c0_0, %c0_1] : memref<1x5x192xf32, #tpu.memory_space<vmem>>, vector<1x5x192xf32>
    %1 = vector.shape_cast %0 : vector<1x5x192xf32> to vector<5x192xf32>
    %c0_2 = arith.constant 0 : index
    %c0_3 = arith.constant 0 : index
    %2 = vector.load %arg3[%c0_2, %c0_3] : memref<1512x128xf32, #tpu.memory_space<vmem>>, vector<192x32xf32>
    %cst = arith.constant dense<0.000000e+00> : vector<5x32xf32>
    %3 = tpu.matmul %1, %2, %cst {dimension_numbers = #tpu.dot_dimension_numbers<[1], [0], [0], [1], [0, 0, 1, 1], [], []>} : vector<5x192xf32>, vector<192x32xf32>, vector<5x32xf32> -> vector<5x32xf32>
    %c192 = arith.constant 192 : index
    %c0_4 = arith.constant 0 : index
    %4 = vector.load %arg3[%c192, %c0_4] : memref<1512x128xf32, #tpu.memory_space<vmem>>, vector<1x32xf32>
    %5 = vector.broadcast %4 : vector<1x32xf32> to vector<5x32xf32>
    %6 = arith.addf %3, %5 : vector<5x32xf32>
    %7 = tpu.iota {dimensions = array<i32: 0>} : vector<5x1xi32>
    %c0_i32 = arith.constant 0 : i32
    %8 = vector.broadcast %c0_i32 : i32 to vector<5x1xi32>
    %9 = arith.cmpi eq, %7, %8 : vector<5x1xi32>
    %c200 = arith.constant 200 : index
    %c0_5 = arith.constant 0 : index
    %10 = vector.load %arg3[%c200, %c0_5] : memref<1512x128xf32, #tpu.memory_space<vmem>>, vector<1x32xf32>
    %11 = vector.shape_cast %9 : vector<5x1xi1> to vector<5x1xi1>
    %12 = vector.broadcast %11 : vector<5x1xi1> to vector<5x32xi1>
    %13 = vector.shape_cast %10 : vector<1x32xf32> to vector<1x32xf32>
    %14 = vector.broadcast %13 : vector<1x32xf32> to vector<5x32xf32>
    %15 = arith.select %12, %14, %6 : vector<5x32xi1>, vector<5x32xf32>
    %c208 = arith.constant 208 : index
    %c0_6 = arith.constant 0 : index
    %16 = vector.load %arg3[%c208, %c0_6] : memref<1512x128xf32, #tpu.memory_space<vmem>>, vector<5x32xf32>
    %17 = arith.addf %15, %16 : vector<5x32xf32>
    %c216 = arith.constant 216 : index
    %c0_7 = arith.constant 0 : index
    %18 = vector.load %arg3[%c216, %c0_7] : memref<1512x128xf32, #tpu.memory_space<vmem>>, vector<1x32xf32>
    %c224 = arith.constant 224 : index
    %c0_8 = arith.constant 0 : index
    %19 = vector.load %arg3[%c224, %c0_8] : memref<1512x128xf32, #tpu.memory_space<vmem>>, vector<1x32xf32>
    %cst_9 = arith.constant dense<0.000000e+00> : vector<5xf32>
    %20 = vector.multi_reduction <add>, %17, %cst_9 [1] : vector<5x32xf32> to vector<5xf32>
    %21 = vector.shape_cast %20 : vector<5xf32> to vector<5x1xf32>
    %cst_10 = arith.constant 3.200000e+01 : f32
    %22 = vector.broadcast %cst_10 : f32 to vector<5x1xf32>
    %23 = arith.divf %21, %22 : vector<5x1xf32>
    %24 = vector.broadcast %23 : vector<5x1xf32> to vector<5x32xf32>
    %25 = arith.subf %17, %24 : vector<5x32xf32>
    %26 = arith.mulf %25, %25 : vector<5x32xf32>
    %cst_11 = arith.constant dense<0.000000e+00> : vector<5xf32>
    %27 = vector.multi_reduction <add>, %26, %cst_11 [1] : vector<5x32xf32> to vector<5xf32>
    %28 = vector.shape_cast %27 : vector<5xf32> to vector<5x1xf32>
    %cst_12 = arith.constant 3.200000e+01 : f32
    %29 = vector.broadcast %cst_12 : f32 to vector<5x1xf32>
    %30 = arith.divf %28, %29 : vector<5x1xf32>
    %31 = vector.broadcast %23 : vector<5x1xf32> to vector<5x32xf32>
    %32 = arith.subf %17, %31 : vector<5x32xf32>
    %cst_13 = arith.constant 9.99999974E-6 : f32
    %33 = vector.broadcast %cst_13 : f32 to vector<5x1xf32>
    %34 = arith.addf %30, %33 : vector<5x1xf32>
    %35 = math.rsqrt %34 : vector<5x1xf32>
    %36 = vector.broadcast %35 : vector<5x1xf32> to vector<5x32xf32>
    %37 = arith.mulf %32, %36 : vector<5x32xf32>
    %38 = vector.broadcast %18 : vector<1x32xf32> to vector<5x32xf32>
    %39 = arith.mulf %37, %38 : vector<5x32xf32>
    %40 = vector.broadcast %19 : vector<1x32xf32> to vector<5x32xf32>
    %41 = arith.addf %39, %40 : vector<5x32xf32>
    %c232 = arith.constant 232 : index
    %c0_14 = arith.constant 0 : index
    %42 = vector.load %arg3[%c232, %c0_14] : memref<1512x128xf32, #tpu.memory_space<vmem>>, vector<32x96xf32>
    %cst_15 = arith.constant dense<0.000000e+00> : vector<5x96xf32>
    %43 = tpu.matmul %41, %42, %cst_15 {dimension_numbers = #tpu.dot_dimension_numbers<[1], [0], [0], [1], [0, 0, 1, 1], [], []>} : vector<5x32xf32>, vector<32x96xf32>, vector<5x96xf32> -> vector<5x96xf32>
    %c264 = arith.constant 264 : index
    %c0_16 = arith.constant 0 : index
    %44 = vector.load %arg3[%c264, %c0_16] : memref<1512x128xf32, #tpu.memory_space<vmem>>, vector<1x96xf32>
    %45 = vector.broadcast %44 : vector<1x96xf32> to vector<5x96xf32>
    %46 = arith.addf %43, %45 : vector<5x96xf32>
    %c272 = arith.constant 272 : index
    %c0_17 = arith.constant 0 : index
    %47 = vector.load %arg3[%c272, %c0_17] : memref<1512x128xf32, #tpu.memory_space<vmem>>, vector<32x32xf32>
    %c304 = arith.constant 304 : index
    %c0_18 = arith.constant 0 : index
    %48 = vector.load %arg3[%c304, %c0_18] : memref<1512x128xf32, #tpu.memory_space<vmem>>, vector<1x32xf32>
    %49 = vector.extract_strided_slice %46 {offsets = [0, 0], sizes = [5, 8], strides = [1, 1]} : vector<5x96xf32> to vector<5x8xf32>
    %50 = vector.extract_strided_slice %46 {offsets = [0, 32], sizes = [5, 8], strides = [1, 1]} : vector<5x96xf32> to vector<5x8xf32>
    "tpu.trace_start"() <{level = 10 : i32, message = "qd,kd->qk"}> : () -> ()
    %cst_19 = arith.constant dense<0.000000e+00> : vector<5x5xf32>
    %51 = tpu.matmul %49, %50, %cst_19 {dimension_numbers = #tpu.dot_dimension_numbers<[1], [1], [0], [0], [0, 0, 1, 0], [], []>} : vector<5x8xf32>, vector<5x8xf32>, vector<5x5xf32> -> vector<5x5xf32>
    "tpu.trace_stop"() : () -> ()
    %52 = vector.extract_strided_slice %46 {offsets = [0, 8], sizes = [5, 8], strides = [1, 1]} : vector<5x96xf32> to vector<5x8xf32>
    %53 = vector.extract_strided_slice %46 {offsets = [0, 40], sizes = [5, 8], strides = [1, 1]} : vector<5x96xf32> to vector<5x8xf32>
    "tpu.trace_start"() <{level = 10 : i32, message = "qd,kd->qk"}> : () -> ()
    %cst_20 = arith.constant dense<0.000000e+00> : vector<5x5xf32>
    %54 = tpu.matmul %52, %53, %cst_20 {dimension_numbers = #tpu.dot_dimension_numbers<[1], [1], [0], [0], [0, 0, 1, 0], [], []>} : vector<5x8xf32>, vector<5x8xf32>, vector<5x5xf32> -> vector<5x5xf32>
    "tpu.trace_stop"() : () -> ()
    %55 = vector.extract_strided_slice %46 {offsets = [0, 16], sizes = [5, 8], strides = [1, 1]} : vector<5x96xf32> to vector<5x8xf32>
    %56 = vector.extract_strided_slice %46 {offsets = [0, 48], sizes = [5, 8], strides = [1, 1]} : vector<5x96xf32> to vector<5x8xf32>
    "tpu.trace_start"() <{level = 10 : i32, message = "qd,kd->qk"}> : () -> ()
    %cst_21 = arith.constant dense<0.000000e+00> : vector<5x5xf32>
    %57 = tpu.matmul %55, %56, %cst_21 {dimension_numbers = #tpu.dot_dimension_numbers<[1], [1], [0], [0], [0, 0, 1, 0], [], []>} : vector<5x8xf32>, vector<5x8xf32>, vector<5x5xf32> -> vector<5x5xf32>
    "tpu.trace_stop"() : () -> ()
    %58 = vector.extract_strided_slice %46 {offsets = [0, 24], sizes = [5, 8], strides = [1, 1]} : vector<5x96xf32> to vector<5x8xf32>
    %59 = vector.extract_strided_slice %46 {offsets = [0, 56], sizes = [5, 8], strides = [1, 1]} : vector<5x96xf32> to vector<5x8xf32>
    "tpu.trace_start"() <{level = 10 : i32, message = "qd,kd->qk"}> : () -> ()
    %cst_22 = arith.constant dense<0.000000e+00> : vector<5x5xf32>
    %60 = tpu.matmul %58, %59, %cst_22 {dimension_numbers = #tpu.dot_dimension_numbers<[1], [1], [0], [0], [0, 0, 1, 0], [], []>} : vector<5x8xf32>, vector<5x8xf32>, vector<5x5xf32> -> vector<5x5xf32>
    "tpu.trace_stop"() : () -> ()
    %61 = vector.shape_cast %51 : vector<5x5xf32> to vector<1x5x5xf32>
    %62 = vector.shape_cast %54 : vector<5x5xf32> to vector<1x5x5xf32>
    %63 = vector.shape_cast %57 : vector<5x5xf32> to vector<1x5x5xf32>
    %64 = vector.shape_cast %60 : vector<5x5xf32> to vector<1x5x5xf32>
    %65 = tpu.concatenate %61, %62, %63, %64 in 0 : vector<1x5x5xf32>, vector<1x5x5xf32>, vector<1x5x5xf32>, vector<1x5x5xf32> -> vector<4x5x5xf32>
    %cst_23 = arith.constant dense<0xFF800000> : vector<4x5xf32>
    %66 = vector.multi_reduction <maximumf>, %65, %cst_23 [2] : vector<4x5x5xf32> to vector<4x5xf32>
    %67 = vector.shape_cast %66 : vector<4x5xf32> to vector<4x5x1xf32>
    %68 = vector.broadcast %67 : vector<4x5x1xf32> to vector<4x5x5xf32>
    %69 = arith.subf %65, %68 : vector<4x5x5xf32>
    %70 = math.exp %69 : vector<4x5x5xf32>
    %cst_24 = arith.constant dense<0.000000e+00> : vector<4x5xf32>
    %71 = vector.multi_reduction <add>, %70, %cst_24 [2] : vector<4x5x5xf32> to vector<4x5xf32>
    %72 = vector.shape_cast %71 : vector<4x5xf32> to vector<4x5x1xf32>
    %73 = tpu.reciprocal %72 {approx = true} : vector<4x5x1xf32> -> vector<4x5x1xf32>
    %74 = vector.broadcast %73 : vector<4x5x1xf32> to vector<4x5x5xf32>
    %75 = arith.mulf %70, %74 : vector<4x5x5xf32>
    %76 = vector.extract_strided_slice %75 {offsets = [0, 0, 0], sizes = [1, 5, 5], strides = [1, 1, 1]} : vector<4x5x5xf32> to vector<1x5x5xf32>
    %77 = vector.shape_cast %76 : vector<1x5x5xf32> to vector<5x5xf32>
    %78 = vector.extract_strided_slice %46 {offsets = [0, 64], sizes = [5, 8], strides = [1, 1]} : vector<5x96xf32> to vector<5x8xf32>
    %cst_25 = arith.constant dense<0.000000e+00> : vector<5x8xf32>
    %79 = tpu.matmul %77, %78, %cst_25 {dimension_numbers = #tpu.dot_dimension_numbers<[1], [0], [0], [1], [0, 0, 1, 1], [], []>} : vector<5x5xf32>, vector<5x8xf32>, vector<5x8xf32> -> vector<5x8xf32>
    %80 = vector.extract_strided_slice %75 {offsets = [1, 0, 0], sizes = [1, 5, 5], strides = [1, 1, 1]} : vector<4x5x5xf32> to vector<1x5x5xf32>
    %81 = vector.shape_cast %80 : vector<1x5x5xf32> to vector<5x5xf32>
    %82 = vector.extract_strided_slice %46 {offsets = [0, 72], sizes = [5, 8], strides = [1, 1]} : vector<5x96xf32> to vector<5x8xf32>
    %cst_26 = arith.constant dense<0.000000e+00> : vector<5x8xf32>
    %83 = tpu.matmul %81, %82, %cst_26 {dimension_numbers = #tpu.dot_dimension_numbers<[1], [0], [0], [1], [0, 0, 1, 1], [], []>} : vector<5x5xf32>, vector<5x8xf32>, vector<5x8xf32> -> vector<5x8xf32>
    %84 = vector.extract_strided_slice %75 {offsets = [2, 0, 0], sizes = [1, 5, 5], strides = [1, 1, 1]} : vector<4x5x5xf32> to vector<1x5x5xf32>
    %85 = vector.shape_cast %84 : vector<1x5x5xf32> to vector<5x5xf32>
    %86 = vector.extract_strided_slice %46 {offsets = [0, 80], sizes = [5, 8], strides = [1, 1]} : vector<5x96xf32> to vector<5x8xf32>
    %cst_27 = arith.constant dense<0.000000e+00> : vector<5x8xf32>
    %87 = tpu.matmul %85, %86, %cst_27 {dimension_numbers = #tpu.dot_dimension_numbers<[1], [0], [0], [1], [0, 0, 1, 1], [], []>} : vector<5x5xf32>, vector<5x8xf32>, vector<5x8xf32> -> vector<5x8xf32>
    %88 = vector.extract_strided_slice %75 {offsets = [3, 0, 0], sizes = [1, 5, 5], strides = [1, 1, 1]} : vector<4x5x5xf32> to vector<1x5x5xf32>
    %89 = vector.shape_cast %88 : vector<1x5x5xf32> to vector<5x5xf32>
    %90 = vector.extract_strided_slice %46 {offsets = [0, 88], sizes = [5, 8], strides = [1, 1]} : vector<5x96xf32> to vector<5x8xf32>
    %cst_28 = arith.constant dense<0.000000e+00> : vector<5x8xf32>
    %91 = tpu.matmul %89, %90, %cst_28 {dimension_numbers = #tpu.dot_dimension_numbers<[1], [0], [0], [1], [0, 0, 1, 1], [], []>} : vector<5x5xf32>, vector<5x8xf32>, vector<5x8xf32> -> vector<5x8xf32>
    %92 = tpu.concatenate %79, %83, %87, %91 in 1 : vector<5x8xf32>, vector<5x8xf32>, vector<5x8xf32>, vector<5x8xf32> -> vector<5x32xf32>
    %cst_29 = arith.constant dense<0.000000e+00> : vector<5x32xf32>
    %93 = tpu.matmul %92, %47, %cst_29 {dimension_numbers = #tpu.dot_dimension_numbers<[1], [0], [0], [1], [0, 0, 1, 1], [], []>} : vector<5x32xf32>, vector<32x32xf32>, vector<5x32xf32> -> vector<5x32xf32>
    %94 = vector.broadcast %48 : vector<1x32xf32> to vector<5x32xf32>
    %95 = arith.addf %93, %94 : vector<5x32xf32>
    %96 = arith.addf %17, %95 : vector<5x32xf32>
    %c312 = arith.constant 312 : index
    %c0_30 = arith.constant 0 : index
    %97 = vector.load %arg3[%c312, %c0_30] : memref<1512x128xf32, #tpu.memory_space<vmem>>, vector<1x32xf32>
    %c320 = arith.constant 320 : index
    %c0_31 = arith.constant 0 : index
    %98 = vector.load %arg3[%c320, %c0_31] : memref<1512x128xf32, #tpu.memory_space<vmem>>, vector<1x32xf32>
    %cst_32 = arith.constant dense<0.000000e+00> : vector<5xf32>
    %99 = vector.multi_reduction <add>, %96, %cst_32 [1] : vector<5x32xf32> to vector<5xf32>
    %100 = vector.shape_cast %99 : vector<5xf32> to vector<5x1xf32>
    %cst_33 = arith.constant 3.200000e+01 : f32
    %101 = vector.broadcast %cst_33 : f32 to vector<5x1xf32>
    %102 = arith.divf %100, %101 : vector<5x1xf32>
    %103 = vector.broadcast %102 : vector<5x1xf32> to vector<5x32xf32>
    %104 = arith.subf %96, %103 : vector<5x32xf32>
    %105 = arith.mulf %104, %104 : vector<5x32xf32>
    %cst_34 = arith.constant dense<0.000000e+00> : vector<5xf32>
    %106 = vector.multi_reduction <add>, %105, %cst_34 [1] : vector<5x32xf32> to vector<5xf32>
    %107 = vector.shape_cast %106 : vector<5xf32> to vector<5x1xf32>
    %cst_35 = arith.constant 3.200000e+01 : f32
    %108 = vector.broadcast %cst_35 : f32 to vector<5x1xf32>
    %109 = arith.divf %107, %108 : vector<5x1xf32>
    %110 = vector.broadcast %102 : vector<5x1xf32> to vector<5x32xf32>
    %111 = arith.subf %96, %110 : vector<5x32xf32>
    %cst_36 = arith.constant 9.99999974E-6 : f32
    %112 = vector.broadcast %cst_36 : f32 to vector<5x1xf32>
    %113 = arith.addf %109, %112 : vector<5x1xf32>
    %114 = math.rsqrt %113 : vector<5x1xf32>
    %115 = vector.broadcast %114 : vector<5x1xf32> to vector<5x32xf32>
    %116 = arith.mulf %111, %115 : vector<5x32xf32>
    %117 = vector.broadcast %97 : vector<1x32xf32> to vector<5x32xf32>
    %118 = arith.mulf %116, %117 : vector<5x32xf32>
    %119 = vector.broadcast %98 : vector<1x32xf32> to vector<5x32xf32>
    %120 = arith.addf %118, %119 : vector<5x32xf32>
    %c328 = arith.constant 328 : index
    %c0_37 = arith.constant 0 : index
    %121 = vector.load %arg3[%c328, %c0_37] : memref<1512x128xf32, #tpu.memory_space<vmem>>, vector<32x64xf32>
    %cst_38 = arith.constant dense<0.000000e+00> : vector<5x64xf32>
    %122 = tpu.matmul %120, %121, %cst_38 {dimension_numbers = #tpu.dot_dimension_numbers<[1], [0], [0], [1], [0, 0, 1, 1], [], []>} : vector<5x32xf32>, vector<32x64xf32>, vector<5x64xf32> -> vector<5x64xf32>
    %c360 = arith.constant 360 : index
    %c0_39 = arith.constant 0 : index
    %123 = vector.load %arg3[%c360, %c0_39] : memref<1512x128xf32, #tpu.memory_space<vmem>>, vector<1x64xf32>
    %124 = vector.broadcast %123 : vector<1x64xf32> to vector<5x64xf32>
    %125 = arith.addf %122, %124 : vector<5x64xf32>
    %126 = arith.mulf %125, %125 : vector<5x64xf32>
    %127 = arith.mulf %125, %126 : vector<5x64xf32>
    %cst_40 = arith.constant 4.471500e-02 : f32
    %128 = vector.broadcast %cst_40 : f32 to vector<5x64xf32>
    %129 = arith.mulf %128, %127 : vector<5x64xf32>
    %130 = arith.addf %125, %129 : vector<5x64xf32>
    %cst_41 = arith.constant 0.797884583 : f32
    %131 = vector.broadcast %cst_41 : f32 to vector<5x64xf32>
    %132 = arith.mulf %131, %130 : vector<5x64xf32>
    %133 = math.tanh %132 : vector<5x64xf32>
    %cst_42 = arith.constant 1.000000e+00 : f32
    %134 = vector.broadcast %cst_42 : f32 to vector<5x64xf32>
    %135 = arith.addf %134, %133 : vector<5x64xf32>
    %cst_43 = arith.constant 5.000000e-01 : f32
    %136 = vector.broadcast %cst_43 : f32 to vector<5x64xf32>
    %137 = arith.mulf %136, %135 : vector<5x64xf32>
    %138 = arith.mulf %125, %137 : vector<5x64xf32>
    %c368 = arith.constant 368 : index
    %c0_44 = arith.constant 0 : index
    %139 = vector.load %arg3[%c368, %c0_44] : memref<1512x128xf32, #tpu.memory_space<vmem>>, vector<64x32xf32>
    %cst_45 = arith.constant dense<0.000000e+00> : vector<5x32xf32>
    %140 = tpu.matmul %138, %139, %cst_45 {dimension_numbers = #tpu.dot_dimension_numbers<[1], [0], [0], [1], [0, 0, 1, 1], [], []>} : vector<5x64xf32>, vector<64x32xf32>, vector<5x32xf32> -> vector<5x32xf32>
    %c432 = arith.constant 432 : index
    %c0_46 = arith.constant 0 : index
    %141 = vector.load %arg3[%c432, %c0_46] : memref<1512x128xf32, #tpu.memory_space<vmem>>, vector<1x32xf32>
    %142 = vector.broadcast %141 : vector<1x32xf32> to vector<5x32xf32>
    %143 = arith.addf %140, %142 : vector<5x32xf32>
    %144 = arith.addf %96, %143 : vector<5x32xf32>
    %c440 = arith.constant 440 : index
    %c0_47 = arith.constant 0 : index
    %145 = vector.load %arg3[%c440, %c0_47] : memref<1512x128xf32, #tpu.memory_space<vmem>>, vector<1x32xf32>
    %c448 = arith.constant 448 : index
    %c0_48 = arith.constant 0 : index
    %146 = vector.load %arg3[%c448, %c0_48] : memref<1512x128xf32, #tpu.memory_space<vmem>>, vector<1x32xf32>
    %cst_49 = arith.constant dense<0.000000e+00> : vector<5xf32>
    %147 = vector.multi_reduction <add>, %144, %cst_49 [1] : vector<5x32xf32> to vector<5xf32>
    %148 = vector.shape_cast %147 : vector<5xf32> to vector<5x1xf32>
    %cst_50 = arith.constant 3.200000e+01 : f32
    %149 = vector.broadcast %cst_50 : f32 to vector<5x1xf32>
    %150 = arith.divf %148, %149 : vector<5x1xf32>
    %151 = vector.broadcast %150 : vector<5x1xf32> to vector<5x32xf32>
    %152 = arith.subf %144, %151 : vector<5x32xf32>
    %153 = arith.mulf %152, %152 : vector<5x32xf32>
    %cst_51 = arith.constant dense<0.000000e+00> : vector<5xf32>
    %154 = vector.multi_reduction <add>, %153, %cst_51 [1] : vector<5x32xf32> to vector<5xf32>
    %155 = vector.shape_cast %154 : vector<5xf32> to vector<5x1xf32>
    %cst_52 = arith.constant 3.200000e+01 : f32
    %156 = vector.broadcast %cst_52 : f32 to vector<5x1xf32>
    %157 = arith.divf %155, %156 : vector<5x1xf32>
    %158 = vector.broadcast %150 : vector<5x1xf32> to vector<5x32xf32>
    %159 = arith.subf %144, %158 : vector<5x32xf32>
    %cst_53 = arith.constant 9.99999974E-6 : f32
    %160 = vector.broadcast %cst_53 : f32 to vector<5x1xf32>
    %161 = arith.addf %157, %160 : vector<5x1xf32>
    %162 = math.rsqrt %161 : vector<5x1xf32>
    %163 = vector.broadcast %162 : vector<5x1xf32> to vector<5x32xf32>
    %164 = arith.mulf %159, %163 : vector<5x32xf32>
    %165 = vector.broadcast %145 : vector<1x32xf32> to vector<5x32xf32>
    %166 = arith.mulf %164, %165 : vector<5x32xf32>
    %167 = vector.broadcast %146 : vector<1x32xf32> to vector<5x32xf32>
    %168 = arith.addf %166, %167 : vector<5x32xf32>
    %c456 = arith.constant 456 : index
    %c0_54 = arith.constant 0 : index
    %169 = vector.load %arg3[%c456, %c0_54] : memref<1512x128xf32, #tpu.memory_space<vmem>>, vector<32x96xf32>
    %cst_55 = arith.constant dense<0.000000e+00> : vector<5x96xf32>
    %170 = tpu.matmul %168, %169, %cst_55 {dimension_numbers = #tpu.dot_dimension_numbers<[1], [0], [0], [1], [0, 0, 1, 1], [], []>} : vector<5x32xf32>, vector<32x96xf32>, vector<5x96xf32> -> vector<5x96xf32>
    %c488 = arith.constant 488 : index
    %c0_56 = arith.constant 0 : index
    %171 = vector.load %arg3[%c488, %c0_56] : memref<1512x128xf32, #tpu.memory_space<vmem>>, vector<1x96xf32>
    %172 = vector.broadcast %171 : vector<1x96xf32> to vector<5x96xf32>
    %173 = arith.addf %170, %172 : vector<5x96xf32>
    %c496 = arith.constant 496 : index
    %c0_57 = arith.constant 0 : index
    %174 = vector.load %arg3[%c496, %c0_57] : memref<1512x128xf32, #tpu.memory_space<vmem>>, vector<32x32xf32>
    %c528 = arith.constant 528 : index
    %c0_58 = arith.constant 0 : index
    %175 = vector.load %arg3[%c528, %c0_58] : memref<1512x128xf32, #tpu.memory_space<vmem>>, vector<1x32xf32>
    %176 = vector.extract_strided_slice %173 {offsets = [0, 0], sizes = [5, 8], strides = [1, 1]} : vector<5x96xf32> to vector<5x8xf32>
    %177 = vector.extract_strided_slice %173 {offsets = [0, 32], sizes = [5, 8], strides = [1, 1]} : vector<5x96xf32> to vector<5x8xf32>
    "tpu.trace_start"() <{level = 10 : i32, message = "qd,kd->qk"}> : () -> ()
    %cst_59 = arith.constant dense<0.000000e+00> : vector<5x5xf32>
    %178 = tpu.matmul %176, %177, %cst_59 {dimension_numbers = #tpu.dot_dimension_numbers<[1], [1], [0], [0], [0, 0, 1, 0], [], []>} : vector<5x8xf32>, vector<5x8xf32>, vector<5x5xf32> -> vector<5x5xf32>
    "tpu.trace_stop"() : () -> ()
    %179 = vector.extract_strided_slice %173 {offsets = [0, 8], sizes = [5, 8], strides = [1, 1]} : vector<5x96xf32> to vector<5x8xf32>
    %180 = vector.extract_strided_slice %173 {offsets = [0, 40], sizes = [5, 8], strides = [1, 1]} : vector<5x96xf32> to vector<5x8xf32>
    "tpu.trace_start"() <{level = 10 : i32, message = "qd,kd->qk"}> : () -> ()
    %cst_60 = arith.constant dense<0.000000e+00> : vector<5x5xf32>
    %181 = tpu.matmul %179, %180, %cst_60 {dimension_numbers = #tpu.dot_dimension_numbers<[1], [1], [0], [0], [0, 0, 1, 0], [], []>} : vector<5x8xf32>, vector<5x8xf32>, vector<5x5xf32> -> vector<5x5xf32>
    "tpu.trace_stop"() : () -> ()
    %182 = vector.extract_strided_slice %173 {offsets = [0, 16], sizes = [5, 8], strides = [1, 1]} : vector<5x96xf32> to vector<5x8xf32>
    %183 = vector.extract_strided_slice %173 {offsets = [0, 48], sizes = [5, 8], strides = [1, 1]} : vector<5x96xf32> to vector<5x8xf32>
    "tpu.trace_start"() <{level = 10 : i32, message = "qd,kd->qk"}> : () -> ()
    %cst_61 = arith.constant dense<0.000000e+00> : vector<5x5xf32>
    %184 = tpu.matmul %182, %183, %cst_61 {dimension_numbers = #tpu.dot_dimension_numbers<[1], [1], [0], [0], [0, 0, 1, 0], [], []>} : vector<5x8xf32>, vector<5x8xf32>, vector<5x5xf32> -> vector<5x5xf32>
    "tpu.trace_stop"() : () -> ()
    %185 = vector.extract_strided_slice %173 {offsets = [0, 24], sizes = [5, 8], strides = [1, 1]} : vector<5x96xf32> to vector<5x8xf32>
    %186 = vector.extract_strided_slice %173 {offsets = [0, 56], sizes = [5, 8], strides = [1, 1]} : vector<5x96xf32> to vector<5x8xf32>
    "tpu.trace_start"() <{level = 10 : i32, message = "qd,kd->qk"}> : () -> ()
    %cst_62 = arith.constant dense<0.000000e+00> : vector<5x5xf32>
    %187 = tpu.matmul %185, %186, %cst_62 {dimension_numbers = #tpu.dot_dimension_numbers<[1], [1], [0], [0], [0, 0, 1, 0], [], []>} : vector<5x8xf32>, vector<5x8xf32>, vector<5x5xf32> -> vector<5x5xf32>
    "tpu.trace_stop"() : () -> ()
    %188 = vector.shape_cast %178 : vector<5x5xf32> to vector<1x5x5xf32>
    %189 = vector.shape_cast %181 : vector<5x5xf32> to vector<1x5x5xf32>
    %190 = vector.shape_cast %184 : vector<5x5xf32> to vector<1x5x5xf32>
    %191 = vector.shape_cast %187 : vector<5x5xf32> to vector<1x5x5xf32>
    %192 = tpu.concatenate %188, %189, %190, %191 in 0 : vector<1x5x5xf32>, vector<1x5x5xf32>, vector<1x5x5xf32>, vector<1x5x5xf32> -> vector<4x5x5xf32>
    %cst_63 = arith.constant dense<0xFF800000> : vector<4x5xf32>
    %193 = vector.multi_reduction <maximumf>, %192, %cst_63 [2] : vector<4x5x5xf32> to vector<4x5xf32>
    %194 = vector.shape_cast %193 : vector<4x5xf32> to vector<4x5x1xf32>
    %195 = vector.broadcast %194 : vector<4x5x1xf32> to vector<4x5x5xf32>
    %196 = arith.subf %192, %195 : vector<4x5x5xf32>
    %197 = math.exp %196 : vector<4x5x5xf32>
    %cst_64 = arith.constant dense<0.000000e+00> : vector<4x5xf32>
    %198 = vector.multi_reduction <add>, %197, %cst_64 [2] : vector<4x5x5xf32> to vector<4x5xf32>
    %199 = vector.shape_cast %198 : vector<4x5xf32> to vector<4x5x1xf32>
    %200 = tpu.reciprocal %199 {approx = true} : vector<4x5x1xf32> -> vector<4x5x1xf32>
    %201 = vector.broadcast %200 : vector<4x5x1xf32> to vector<4x5x5xf32>
    %202 = arith.mulf %197, %201 : vector<4x5x5xf32>
    %203 = vector.extract_strided_slice %202 {offsets = [0, 0, 0], sizes = [1, 5, 5], strides = [1, 1, 1]} : vector<4x5x5xf32> to vector<1x5x5xf32>
    %204 = vector.shape_cast %203 : vector<1x5x5xf32> to vector<5x5xf32>
    %205 = vector.extract_strided_slice %173 {offsets = [0, 64], sizes = [5, 8], strides = [1, 1]} : vector<5x96xf32> to vector<5x8xf32>
    %cst_65 = arith.constant dense<0.000000e+00> : vector<5x8xf32>
    %206 = tpu.matmul %204, %205, %cst_65 {dimension_numbers = #tpu.dot_dimension_numbers<[1], [0], [0], [1], [0, 0, 1, 1], [], []>} : vector<5x5xf32>, vector<5x8xf32>, vector<5x8xf32> -> vector<5x8xf32>
    %207 = vector.extract_strided_slice %202 {offsets = [1, 0, 0], sizes = [1, 5, 5], strides = [1, 1, 1]} : vector<4x5x5xf32> to vector<1x5x5xf32>
    %208 = vector.shape_cast %207 : vector<1x5x5xf32> to vector<5x5xf32>
    %209 = vector.extract_strided_slice %173 {offsets = [0, 72], sizes = [5, 8], strides = [1, 1]} : vector<5x96xf32> to vector<5x8xf32>
    %cst_66 = arith.constant dense<0.000000e+00> : vector<5x8xf32>
    %210 = tpu.matmul %208, %209, %cst_66 {dimension_numbers = #tpu.dot_dimension_numbers<[1], [0], [0], [1], [0, 0, 1, 1], [], []>} : vector<5x5xf32>, vector<5x8xf32>, vector<5x8xf32> -> vector<5x8xf32>
    %211 = vector.extract_strided_slice %202 {offsets = [2, 0, 0], sizes = [1, 5, 5], strides = [1, 1, 1]} : vector<4x5x5xf32> to vector<1x5x5xf32>
    %212 = vector.shape_cast %211 : vector<1x5x5xf32> to vector<5x5xf32>
    %213 = vector.extract_strided_slice %173 {offsets = [0, 80], sizes = [5, 8], strides = [1, 1]} : vector<5x96xf32> to vector<5x8xf32>
    %cst_67 = arith.constant dense<0.000000e+00> : vector<5x8xf32>
    %214 = tpu.matmul %212, %213, %cst_67 {dimension_numbers = #tpu.dot_dimension_numbers<[1], [0], [0], [1], [0, 0, 1, 1], [], []>} : vector<5x5xf32>, vector<5x8xf32>, vector<5x8xf32> -> vector<5x8xf32>
    %215 = vector.extract_strided_slice %202 {offsets = [3, 0, 0], sizes = [1, 5, 5], strides = [1, 1, 1]} : vector<4x5x5xf32> to vector<1x5x5xf32>
    %216 = vector.shape_cast %215 : vector<1x5x5xf32> to vector<5x5xf32>
    %217 = vector.extract_strided_slice %173 {offsets = [0, 88], sizes = [5, 8], strides = [1, 1]} : vector<5x96xf32> to vector<5x8xf32>
    %cst_68 = arith.constant dense<0.000000e+00> : vector<5x8xf32>
    %218 = tpu.matmul %216, %217, %cst_68 {dimension_numbers = #tpu.dot_dimension_numbers<[1], [0], [0], [1], [0, 0, 1, 1], [], []>} : vector<5x5xf32>, vector<5x8xf32>, vector<5x8xf32> -> vector<5x8xf32>
    %219 = tpu.concatenate %206, %210, %214, %218 in 1 : vector<5x8xf32>, vector<5x8xf32>, vector<5x8xf32>, vector<5x8xf32> -> vector<5x32xf32>
    %cst_69 = arith.constant dense<0.000000e+00> : vector<5x32xf32>
    %220 = tpu.matmul %219, %174, %cst_69 {dimension_numbers = #tpu.dot_dimension_numbers<[1], [0], [0], [1], [0, 0, 1, 1], [], []>} : vector<5x32xf32>, vector<32x32xf32>, vector<5x32xf32> -> vector<5x32xf32>
    %221 = vector.broadcast %175 : vector<1x32xf32> to vector<5x32xf32>
    %222 = arith.addf %220, %221 : vector<5x32xf32>
    %223 = arith.addf %144, %222 : vector<5x32xf32>
    %c536 = arith.constant 536 : index
    %c0_70 = arith.constant 0 : index
    %224 = vector.load %arg3[%c536, %c0_70] : memref<1512x128xf32, #tpu.memory_space<vmem>>, vector<1x32xf32>
    %c544 = arith.constant 544 : index
    %c0_71 = arith.constant 0 : index
    %225 = vector.load %arg3[%c544, %c0_71] : memref<1512x128xf32, #tpu.memory_space<vmem>>, vector<1x32xf32>
    %cst_72 = arith.constant dense<0.000000e+00> : vector<5xf32>
    %226 = vector.multi_reduction <add>, %223, %cst_72 [1] : vector<5x32xf32> to vector<5xf32>
    %227 = vector.shape_cast %226 : vector<5xf32> to vector<5x1xf32>
    %cst_73 = arith.constant 3.200000e+01 : f32
    %228 = vector.broadcast %cst_73 : f32 to vector<5x1xf32>
    %229 = arith.divf %227, %228 : vector<5x1xf32>
    %230 = vector.broadcast %229 : vector<5x1xf32> to vector<5x32xf32>
    %231 = arith.subf %223, %230 : vector<5x32xf32>
    %232 = arith.mulf %231, %231 : vector<5x32xf32>
    %cst_74 = arith.constant dense<0.000000e+00> : vector<5xf32>
    %233 = vector.multi_reduction <add>, %232, %cst_74 [1] : vector<5x32xf32> to vector<5xf32>
    %234 = vector.shape_cast %233 : vector<5xf32> to vector<5x1xf32>
    %cst_75 = arith.constant 3.200000e+01 : f32
    %235 = vector.broadcast %cst_75 : f32 to vector<5x1xf32>
    %236 = arith.divf %234, %235 : vector<5x1xf32>
    %237 = vector.broadcast %229 : vector<5x1xf32> to vector<5x32xf32>
    %238 = arith.subf %223, %237 : vector<5x32xf32>
    %cst_76 = arith.constant 9.99999974E-6 : f32
    %239 = vector.broadcast %cst_76 : f32 to vector<5x1xf32>
    %240 = arith.addf %236, %239 : vector<5x1xf32>
    %241 = math.rsqrt %240 : vector<5x1xf32>
    %242 = vector.broadcast %241 : vector<5x1xf32> to vector<5x32xf32>
    %243 = arith.mulf %238, %242 : vector<5x32xf32>
    %244 = vector.broadcast %224 : vector<1x32xf32> to vector<5x32xf32>
    %245 = arith.mulf %243, %244 : vector<5x32xf32>
    %246 = vector.broadcast %225 : vector<1x32xf32> to vector<5x32xf32>
    %247 = arith.addf %245, %246 : vector<5x32xf32>
    %c552 = arith.constant 552 : index
    %c0_77 = arith.constant 0 : index
    %248 = vector.load %arg3[%c552, %c0_77] : memref<1512x128xf32, #tpu.memory_space<vmem>>, vector<32x64xf32>
    %cst_78 = arith.constant dense<0.000000e+00> : vector<5x64xf32>
    %249 = tpu.matmul %247, %248, %cst_78 {dimension_numbers = #tpu.dot_dimension_numbers<[1], [0], [0], [1], [0, 0, 1, 1], [], []>} : vector<5x32xf32>, vector<32x64xf32>, vector<5x64xf32> -> vector<5x64xf32>
    %c584 = arith.constant 584 : index
    %c0_79 = arith.constant 0 : index
    %250 = vector.load %arg3[%c584, %c0_79] : memref<1512x128xf32, #tpu.memory_space<vmem>>, vector<1x64xf32>
    %251 = vector.broadcast %250 : vector<1x64xf32> to vector<5x64xf32>
    %252 = arith.addf %249, %251 : vector<5x64xf32>
    %253 = arith.mulf %252, %252 : vector<5x64xf32>
    %254 = arith.mulf %252, %253 : vector<5x64xf32>
    %cst_80 = arith.constant 4.471500e-02 : f32
    %255 = vector.broadcast %cst_80 : f32 to vector<5x64xf32>
    %256 = arith.mulf %255, %254 : vector<5x64xf32>
    %257 = arith.addf %252, %256 : vector<5x64xf32>
    %cst_81 = arith.constant 0.797884583 : f32
    %258 = vector.broadcast %cst_81 : f32 to vector<5x64xf32>
    %259 = arith.mulf %258, %257 : vector<5x64xf32>
    %260 = math.tanh %259 : vector<5x64xf32>
    %cst_82 = arith.constant 1.000000e+00 : f32
    %261 = vector.broadcast %cst_82 : f32 to vector<5x64xf32>
    %262 = arith.addf %261, %260 : vector<5x64xf32>
    %cst_83 = arith.constant 5.000000e-01 : f32
    %263 = vector.broadcast %cst_83 : f32 to vector<5x64xf32>
    %264 = arith.mulf %263, %262 : vector<5x64xf32>
    %265 = arith.mulf %252, %264 : vector<5x64xf32>
    %c592 = arith.constant 592 : index
    %c0_84 = arith.constant 0 : index
    %266 = vector.load %arg3[%c592, %c0_84] : memref<1512x128xf32, #tpu.memory_space<vmem>>, vector<64x32xf32>
    %cst_85 = arith.constant dense<0.000000e+00> : vector<5x32xf32>
    %267 = tpu.matmul %265, %266, %cst_85 {dimension_numbers = #tpu.dot_dimension_numbers<[1], [0], [0], [1], [0, 0, 1, 1], [], []>} : vector<5x64xf32>, vector<64x32xf32>, vector<5x32xf32> -> vector<5x32xf32>
    %c656 = arith.constant 656 : index
    %c0_86 = arith.constant 0 : index
    %268 = vector.load %arg3[%c656, %c0_86] : memref<1512x128xf32, #tpu.memory_space<vmem>>, vector<1x32xf32>
    %269 = vector.broadcast %268 : vector<1x32xf32> to vector<5x32xf32>
    %270 = arith.addf %267, %269 : vector<5x32xf32>
    %271 = arith.addf %223, %270 : vector<5x32xf32>
    %c664 = arith.constant 664 : index
    %c0_87 = arith.constant 0 : index
    %272 = vector.load %arg3[%c664, %c0_87] : memref<1512x128xf32, #tpu.memory_space<vmem>>, vector<1x32xf32>
    %c672 = arith.constant 672 : index
    %c0_88 = arith.constant 0 : index
    %273 = vector.load %arg3[%c672, %c0_88] : memref<1512x128xf32, #tpu.memory_space<vmem>>, vector<1x32xf32>
    %cst_89 = arith.constant dense<0.000000e+00> : vector<5xf32>
    %274 = vector.multi_reduction <add>, %271, %cst_89 [1] : vector<5x32xf32> to vector<5xf32>
    %275 = vector.shape_cast %274 : vector<5xf32> to vector<5x1xf32>
    %cst_90 = arith.constant 3.200000e+01 : f32
    %276 = vector.broadcast %cst_90 : f32 to vector<5x1xf32>
    %277 = arith.divf %275, %276 : vector<5x1xf32>
    %278 = vector.broadcast %277 : vector<5x1xf32> to vector<5x32xf32>
    %279 = arith.subf %271, %278 : vector<5x32xf32>
    %280 = arith.mulf %279, %279 : vector<5x32xf32>
    %cst_91 = arith.constant dense<0.000000e+00> : vector<5xf32>
    %281 = vector.multi_reduction <add>, %280, %cst_91 [1] : vector<5x32xf32> to vector<5xf32>
    %282 = vector.shape_cast %281 : vector<5xf32> to vector<5x1xf32>
    %cst_92 = arith.constant 3.200000e+01 : f32
    %283 = vector.broadcast %cst_92 : f32 to vector<5x1xf32>
    %284 = arith.divf %282, %283 : vector<5x1xf32>
    %285 = vector.broadcast %277 : vector<5x1xf32> to vector<5x32xf32>
    %286 = arith.subf %271, %285 : vector<5x32xf32>
    %cst_93 = arith.constant 9.99999974E-6 : f32
    %287 = vector.broadcast %cst_93 : f32 to vector<5x1xf32>
    %288 = arith.addf %284, %287 : vector<5x1xf32>
    %289 = math.rsqrt %288 : vector<5x1xf32>
    %290 = vector.broadcast %289 : vector<5x1xf32> to vector<5x32xf32>
    %291 = arith.mulf %286, %290 : vector<5x32xf32>
    %292 = vector.broadcast %272 : vector<1x32xf32> to vector<5x32xf32>
    %293 = arith.mulf %291, %292 : vector<5x32xf32>
    %294 = vector.broadcast %273 : vector<1x32xf32> to vector<5x32xf32>
    %295 = arith.addf %293, %294 : vector<5x32xf32>
    %c0_94 = arith.constant 0 : index
    %c0_95 = arith.constant 0 : index
    %c0_96 = arith.constant 0 : index
    %296 = vector.load %arg2[%c0_94, %c0_95, %c0_96] : memref<1x8x1xi32, #tpu.memory_space<vmem>>, vector<1x8x1xi32>
    %297 = vector.shape_cast %296 : vector<1x8x1xi32> to vector<8x1xi32>
    %298 = tpu.iota {dimensions = array<i32: 1>} : vector<8x64xi32>
    %299 = vector.broadcast %297 : vector<8x1xi32> to vector<8x64xi32>
    %300 = arith.cmpi eq, %299, %298 : vector<8x64xi32>
    %301 = arith.extui %300 : vector<8x64xi1> to vector<8x64xi32>
    %302 = arith.sitofp %301 : vector<8x64xi32> to vector<8x64xf32>
    %c680 = arith.constant 680 : index
    %c0_97 = arith.constant 0 : index
    %303 = vector.load %arg3[%c680, %c0_97] : memref<1512x128xf32, #tpu.memory_space<vmem>>, vector<64x32xf32>
    %cst_98 = arith.constant dense<0.000000e+00> : vector<8x32xf32>
    %304 = tpu.matmul %302, %303, %cst_98 {dimension_numbers = #tpu.dot_dimension_numbers<[1], [0], [0], [1], [0, 0, 1, 1], [], []>} : vector<8x64xf32>, vector<64x32xf32>, vector<8x32xf32> -> vector<8x32xf32>
    %cst_99 = arith.constant 5.65685415 : f32
    %305 = vector.broadcast %cst_99 : f32 to vector<8x32xf32>
    %306 = arith.mulf %304, %305 : vector<8x32xf32>
    %c744 = arith.constant 744 : index
    %c0_100 = arith.constant 0 : index
    %307 = vector.load %arg3[%c744, %c0_100] : memref<1512x128xf32, #tpu.memory_space<vmem>>, vector<8x32xf32>
    %308 = arith.addf %306, %307 : vector<8x32xf32>
    %309 = tpu.iota {dimensions = array<i32: 0>} : vector<8x8xi32>
    %310 = tpu.iota {dimensions = array<i32: 1>} : vector<8x8xi32>
    %311 = arith.cmpi sgt, %310, %309 : vector<8x8xi32>
    %cst_101 = arith.constant -1.000000e+30 : f32
    %cst_102 = arith.constant 0.000000e+00 : f32
    %312 = vector.broadcast %cst_101 : f32 to vector<8x8xf32>
    %313 = vector.broadcast %cst_102 : f32 to vector<8x8xf32>
    %314 = arith.select %311, %312, %313 : vector<8x8xi1>, vector<8x8xf32>
    %c752 = arith.constant 752 : index
    %c0_103 = arith.constant 0 : index
    %315 = vector.load %arg3[%c752, %c0_103] : memref<1512x128xf32, #tpu.memory_space<vmem>>, vector<32x96xf32>
    %cst_104 = arith.constant dense<0.000000e+00> : vector<8x96xf32>
    %316 = tpu.matmul %308, %315, %cst_104 {dimension_numbers = #tpu.dot_dimension_numbers<[1], [0], [0], [1], [0, 0, 1, 1], [], []>} : vector<8x32xf32>, vector<32x96xf32>, vector<8x96xf32> -> vector<8x96xf32>
    %c784 = arith.constant 784 : index
    %c0_105 = arith.constant 0 : index
    %317 = vector.load %arg3[%c784, %c0_105] : memref<1512x128xf32, #tpu.memory_space<vmem>>, vector<1x96xf32>
    %318 = vector.broadcast %317 : vector<1x96xf32> to vector<8x96xf32>
    %319 = arith.addf %316, %318 : vector<8x96xf32>
    %c792 = arith.constant 792 : index
    %c0_106 = arith.constant 0 : index
    %320 = vector.load %arg3[%c792, %c0_106] : memref<1512x128xf32, #tpu.memory_space<vmem>>, vector<32x32xf32>
    %c824 = arith.constant 824 : index
    %c0_107 = arith.constant 0 : index
    %321 = vector.load %arg3[%c824, %c0_107] : memref<1512x128xf32, #tpu.memory_space<vmem>>, vector<1x32xf32>
    %322 = vector.extract_strided_slice %319 {offsets = [0, 0], sizes = [8, 8], strides = [1, 1]} : vector<8x96xf32> to vector<8x8xf32>
    %323 = vector.extract_strided_slice %319 {offsets = [0, 32], sizes = [8, 8], strides = [1, 1]} : vector<8x96xf32> to vector<8x8xf32>
    "tpu.trace_start"() <{level = 10 : i32, message = "qd,kd->qk"}> : () -> ()
    %cst_108 = arith.constant dense<0.000000e+00> : vector<8x8xf32>
    %324 = tpu.matmul %322, %323, %cst_108 {dimension_numbers = #tpu.dot_dimension_numbers<[1], [1], [0], [0], [0, 0, 1, 0], [], []>} : vector<8x8xf32>, vector<8x8xf32>, vector<8x8xf32> -> vector<8x8xf32>
    "tpu.trace_stop"() : () -> ()
    %325 = vector.extract_strided_slice %319 {offsets = [0, 8], sizes = [8, 8], strides = [1, 1]} : vector<8x96xf32> to vector<8x8xf32>
    %326 = vector.extract_strided_slice %319 {offsets = [0, 40], sizes = [8, 8], strides = [1, 1]} : vector<8x96xf32> to vector<8x8xf32>
    "tpu.trace_start"() <{level = 10 : i32, message = "qd,kd->qk"}> : () -> ()
    %cst_109 = arith.constant dense<0.000000e+00> : vector<8x8xf32>
    %327 = tpu.matmul %325, %326, %cst_109 {dimension_numbers = #tpu.dot_dimension_numbers<[1], [1], [0], [0], [0, 0, 1, 0], [], []>} : vector<8x8xf32>, vector<8x8xf32>, vector<8x8xf32> -> vector<8x8xf32>
    "tpu.trace_stop"() : () -> ()
    %328 = vector.extract_strided_slice %319 {offsets = [0, 16], sizes = [8, 8], strides = [1, 1]} : vector<8x96xf32> to vector<8x8xf32>
    %329 = vector.extract_strided_slice %319 {offsets = [0, 48], sizes = [8, 8], strides = [1, 1]} : vector<8x96xf32> to vector<8x8xf32>
    "tpu.trace_start"() <{level = 10 : i32, message = "qd,kd->qk"}> : () -> ()
    %cst_110 = arith.constant dense<0.000000e+00> : vector<8x8xf32>
    %330 = tpu.matmul %328, %329, %cst_110 {dimension_numbers = #tpu.dot_dimension_numbers<[1], [1], [0], [0], [0, 0, 1, 0], [], []>} : vector<8x8xf32>, vector<8x8xf32>, vector<8x8xf32> -> vector<8x8xf32>
    "tpu.trace_stop"() : () -> ()
    %331 = vector.extract_strided_slice %319 {offsets = [0, 24], sizes = [8, 8], strides = [1, 1]} : vector<8x96xf32> to vector<8x8xf32>
    %332 = vector.extract_strided_slice %319 {offsets = [0, 56], sizes = [8, 8], strides = [1, 1]} : vector<8x96xf32> to vector<8x8xf32>
    "tpu.trace_start"() <{level = 10 : i32, message = "qd,kd->qk"}> : () -> ()
    %cst_111 = arith.constant dense<0.000000e+00> : vector<8x8xf32>
    %333 = tpu.matmul %331, %332, %cst_111 {dimension_numbers = #tpu.dot_dimension_numbers<[1], [1], [0], [0], [0, 0, 1, 0], [], []>} : vector<8x8xf32>, vector<8x8xf32>, vector<8x8xf32> -> vector<8x8xf32>
    "tpu.trace_stop"() : () -> ()
    %334 = vector.shape_cast %324 : vector<8x8xf32> to vector<1x8x8xf32>
    %335 = vector.shape_cast %327 : vector<8x8xf32> to vector<1x8x8xf32>
    %336 = vector.shape_cast %330 : vector<8x8xf32> to vector<1x8x8xf32>
    %337 = vector.shape_cast %333 : vector<8x8xf32> to vector<1x8x8xf32>
    %338 = tpu.concatenate %334, %335, %336, %337 in 0 : vector<1x8x8xf32>, vector<1x8x8xf32>, vector<1x8x8xf32>, vector<1x8x8xf32> -> vector<4x8x8xf32>
    %339 = vector.shape_cast %314 : vector<8x8xf32> to vector<1x8x8xf32>
    %340 = vector.broadcast %339 : vector<1x8x8xf32> to vector<4x8x8xf32>
    %341 = arith.addf %338, %340 : vector<4x8x8xf32>
    %cst_112 = arith.constant dense<0xFF800000> : vector<4x8xf32>
    %342 = vector.multi_reduction <maximumf>, %341, %cst_112 [2] : vector<4x8x8xf32> to vector<4x8xf32>
    %343 = vector.shape_cast %342 : vector<4x8xf32> to vector<4x8x1xf32>
    %344 = vector.broadcast %343 : vector<4x8x1xf32> to vector<4x8x8xf32>
    %345 = arith.subf %341, %344 : vector<4x8x8xf32>
    %346 = math.exp %345 : vector<4x8x8xf32>
    %cst_113 = arith.constant dense<0.000000e+00> : vector<4x8xf32>
    %347 = vector.multi_reduction <add>, %346, %cst_113 [2] : vector<4x8x8xf32> to vector<4x8xf32>
    %348 = vector.shape_cast %347 : vector<4x8xf32> to vector<4x8x1xf32>
    %349 = tpu.reciprocal %348 {approx = true} : vector<4x8x1xf32> -> vector<4x8x1xf32>
    %350 = vector.broadcast %349 : vector<4x8x1xf32> to vector<4x8x8xf32>
    %351 = arith.mulf %346, %350 : vector<4x8x8xf32>
    %352 = vector.extract_strided_slice %351 {offsets = [0, 0, 0], sizes = [1, 8, 8], strides = [1, 1, 1]} : vector<4x8x8xf32> to vector<1x8x8xf32>
    %353 = vector.shape_cast %352 : vector<1x8x8xf32> to vector<8x8xf32>
    %354 = vector.extract_strided_slice %319 {offsets = [0, 64], sizes = [8, 8], strides = [1, 1]} : vector<8x96xf32> to vector<8x8xf32>
    %cst_114 = arith.constant dense<0.000000e+00> : vector<8x8xf32>
    %355 = tpu.matmul %353, %354, %cst_114 {dimension_numbers = #tpu.dot_dimension_numbers<[1], [0], [0], [1], [0, 0, 1, 1], [], []>} : vector<8x8xf32>, vector<8x8xf32>, vector<8x8xf32> -> vector<8x8xf32>
    %356 = vector.extract_strided_slice %351 {offsets = [1, 0, 0], sizes = [1, 8, 8], strides = [1, 1, 1]} : vector<4x8x8xf32> to vector<1x8x8xf32>
    %357 = vector.shape_cast %356 : vector<1x8x8xf32> to vector<8x8xf32>
    %358 = vector.extract_strided_slice %319 {offsets = [0, 72], sizes = [8, 8], strides = [1, 1]} : vector<8x96xf32> to vector<8x8xf32>
    %cst_115 = arith.constant dense<0.000000e+00> : vector<8x8xf32>
    %359 = tpu.matmul %357, %358, %cst_115 {dimension_numbers = #tpu.dot_dimension_numbers<[1], [0], [0], [1], [0, 0, 1, 1], [], []>} : vector<8x8xf32>, vector<8x8xf32>, vector<8x8xf32> -> vector<8x8xf32>
    %360 = vector.extract_strided_slice %351 {offsets = [2, 0, 0], sizes = [1, 8, 8], strides = [1, 1, 1]} : vector<4x8x8xf32> to vector<1x8x8xf32>
    %361 = vector.shape_cast %360 : vector<1x8x8xf32> to vector<8x8xf32>
    %362 = vector.extract_strided_slice %319 {offsets = [0, 80], sizes = [8, 8], strides = [1, 1]} : vector<8x96xf32> to vector<8x8xf32>
    %cst_116 = arith.constant dense<0.000000e+00> : vector<8x8xf32>
    %363 = tpu.matmul %361, %362, %cst_116 {dimension_numbers = #tpu.dot_dimension_numbers<[1], [0], [0], [1], [0, 0, 1, 1], [], []>} : vector<8x8xf32>, vector<8x8xf32>, vector<8x8xf32> -> vector<8x8xf32>
    %364 = vector.extract_strided_slice %351 {offsets = [3, 0, 0], sizes = [1, 8, 8], strides = [1, 1, 1]} : vector<4x8x8xf32> to vector<1x8x8xf32>
    %365 = vector.shape_cast %364 : vector<1x8x8xf32> to vector<8x8xf32>
    %366 = vector.extract_strided_slice %319 {offsets = [0, 88], sizes = [8, 8], strides = [1, 1]} : vector<8x96xf32> to vector<8x8xf32>
    %cst_117 = arith.constant dense<0.000000e+00> : vector<8x8xf32>
    %367 = tpu.matmul %365, %366, %cst_117 {dimension_numbers = #tpu.dot_dimension_numbers<[1], [0], [0], [1], [0, 0, 1, 1], [], []>} : vector<8x8xf32>, vector<8x8xf32>, vector<8x8xf32> -> vector<8x8xf32>
    %368 = tpu.concatenate %355, %359, %363, %367 in 1 : vector<8x8xf32>, vector<8x8xf32>, vector<8x8xf32>, vector<8x8xf32> -> vector<8x32xf32>
    %cst_118 = arith.constant dense<0.000000e+00> : vector<8x32xf32>
    %369 = tpu.matmul %368, %320, %cst_118 {dimension_numbers = #tpu.dot_dimension_numbers<[1], [0], [0], [1], [0, 0, 1, 1], [], []>} : vector<8x32xf32>, vector<32x32xf32>, vector<8x32xf32> -> vector<8x32xf32>
    %370 = vector.broadcast %321 : vector<1x32xf32> to vector<8x32xf32>
    %371 = arith.addf %369, %370 : vector<8x32xf32>
    %372 = arith.addf %308, %371 : vector<8x32xf32>
    %c832 = arith.constant 832 : index
    %c0_119 = arith.constant 0 : index
    %373 = vector.load %arg3[%c832, %c0_119] : memref<1512x128xf32, #tpu.memory_space<vmem>>, vector<1x32xf32>
    %c840 = arith.constant 840 : index
    %c0_120 = arith.constant 0 : index
    %374 = vector.load %arg3[%c840, %c0_120] : memref<1512x128xf32, #tpu.memory_space<vmem>>, vector<1x32xf32>
    %cst_121 = arith.constant dense<0.000000e+00> : vector<8xf32>
    %375 = vector.multi_reduction <add>, %372, %cst_121 [1] : vector<8x32xf32> to vector<8xf32>
    %376 = vector.shape_cast %375 : vector<8xf32> to vector<8x1xf32>
    %cst_122 = arith.constant 3.200000e+01 : f32
    %377 = vector.broadcast %cst_122 : f32 to vector<8x1xf32>
    %378 = arith.divf %376, %377 : vector<8x1xf32>
    %379 = vector.broadcast %378 : vector<8x1xf32> to vector<8x32xf32>
    %380 = arith.subf %372, %379 : vector<8x32xf32>
    %381 = arith.mulf %380, %380 : vector<8x32xf32>
    %cst_123 = arith.constant dense<0.000000e+00> : vector<8xf32>
    %382 = vector.multi_reduction <add>, %381, %cst_123 [1] : vector<8x32xf32> to vector<8xf32>
    %383 = vector.shape_cast %382 : vector<8xf32> to vector<8x1xf32>
    %cst_124 = arith.constant 3.200000e+01 : f32
    %384 = vector.broadcast %cst_124 : f32 to vector<8x1xf32>
    %385 = arith.divf %383, %384 : vector<8x1xf32>
    %386 = vector.broadcast %378 : vector<8x1xf32> to vector<8x32xf32>
    %387 = arith.subf %372, %386 : vector<8x32xf32>
    %cst_125 = arith.constant 9.99999974E-6 : f32
    %388 = vector.broadcast %cst_125 : f32 to vector<8x1xf32>
    %389 = arith.addf %385, %388 : vector<8x1xf32>
    %390 = math.rsqrt %389 : vector<8x1xf32>
    %391 = vector.broadcast %390 : vector<8x1xf32> to vector<8x32xf32>
    %392 = arith.mulf %387, %391 : vector<8x32xf32>
    %393 = vector.broadcast %373 : vector<1x32xf32> to vector<8x32xf32>
    %394 = arith.mulf %392, %393 : vector<8x32xf32>
    %395 = vector.broadcast %374 : vector<1x32xf32> to vector<8x32xf32>
    %396 = arith.addf %394, %395 : vector<8x32xf32>
    %c848 = arith.constant 848 : index
    %c0_126 = arith.constant 0 : index
    %397 = vector.load %arg3[%c848, %c0_126] : memref<1512x128xf32, #tpu.memory_space<vmem>>, vector<32x32xf32>
    %cst_127 = arith.constant dense<0.000000e+00> : vector<8x32xf32>
    %398 = tpu.matmul %396, %397, %cst_127 {dimension_numbers = #tpu.dot_dimension_numbers<[1], [0], [0], [1], [0, 0, 1, 1], [], []>} : vector<8x32xf32>, vector<32x32xf32>, vector<8x32xf32> -> vector<8x32xf32>
    %c880 = arith.constant 880 : index
    %c0_128 = arith.constant 0 : index
    %399 = vector.load %arg3[%c880, %c0_128] : memref<1512x128xf32, #tpu.memory_space<vmem>>, vector<1x32xf32>
    %400 = vector.broadcast %399 : vector<1x32xf32> to vector<8x32xf32>
    %401 = arith.addf %398, %400 : vector<8x32xf32>
    %c888 = arith.constant 888 : index
    %c0_129 = arith.constant 0 : index
    %402 = vector.load %arg3[%c888, %c0_129] : memref<1512x128xf32, #tpu.memory_space<vmem>>, vector<32x64xf32>
    %cst_130 = arith.constant dense<0.000000e+00> : vector<5x64xf32>
    %403 = tpu.matmul %295, %402, %cst_130 {dimension_numbers = #tpu.dot_dimension_numbers<[1], [0], [0], [1], [0, 0, 1, 1], [], []>} : vector<5x32xf32>, vector<32x64xf32>, vector<5x64xf32> -> vector<5x64xf32>
    %c920 = arith.constant 920 : index
    %c0_131 = arith.constant 0 : index
    %404 = vector.load %arg3[%c920, %c0_131] : memref<1512x128xf32, #tpu.memory_space<vmem>>, vector<1x64xf32>
    %405 = vector.broadcast %404 : vector<1x64xf32> to vector<5x64xf32>
    %406 = arith.addf %403, %405 : vector<5x64xf32>
    %c928 = arith.constant 928 : index
    %c0_132 = arith.constant 0 : index
    %407 = vector.load %arg3[%c928, %c0_132] : memref<1512x128xf32, #tpu.memory_space<vmem>>, vector<32x32xf32>
    %c960 = arith.constant 960 : index
    %c0_133 = arith.constant 0 : index
    %408 = vector.load %arg3[%c960, %c0_133] : memref<1512x128xf32, #tpu.memory_space<vmem>>, vector<1x32xf32>
    %409 = vector.extract_strided_slice %401 {offsets = [0, 0], sizes = [8, 8], strides = [1, 1]} : vector<8x32xf32> to vector<8x8xf32>
    %410 = vector.extract_strided_slice %406 {offsets = [0, 0], sizes = [5, 8], strides = [1, 1]} : vector<5x64xf32> to vector<5x8xf32>
    "tpu.trace_start"() <{level = 10 : i32, message = "qd,kd->qk"}> : () -> ()
    %cst_134 = arith.constant dense<0.000000e+00> : vector<8x5xf32>
    %411 = tpu.matmul %409, %410, %cst_134 {dimension_numbers = #tpu.dot_dimension_numbers<[1], [1], [0], [0], [0, 0, 1, 0], [], []>} : vector<8x8xf32>, vector<5x8xf32>, vector<8x5xf32> -> vector<8x5xf32>
    "tpu.trace_stop"() : () -> ()
    %412 = vector.extract_strided_slice %401 {offsets = [0, 8], sizes = [8, 8], strides = [1, 1]} : vector<8x32xf32> to vector<8x8xf32>
    %413 = vector.extract_strided_slice %406 {offsets = [0, 8], sizes = [5, 8], strides = [1, 1]} : vector<5x64xf32> to vector<5x8xf32>
    "tpu.trace_start"() <{level = 10 : i32, message = "qd,kd->qk"}> : () -> ()
    %cst_135 = arith.constant dense<0.000000e+00> : vector<8x5xf32>
    %414 = tpu.matmul %412, %413, %cst_135 {dimension_numbers = #tpu.dot_dimension_numbers<[1], [1], [0], [0], [0, 0, 1, 0], [], []>} : vector<8x8xf32>, vector<5x8xf32>, vector<8x5xf32> -> vector<8x5xf32>
    "tpu.trace_stop"() : () -> ()
    %415 = vector.extract_strided_slice %401 {offsets = [0, 16], sizes = [8, 8], strides = [1, 1]} : vector<8x32xf32> to vector<8x8xf32>
    %416 = vector.extract_strided_slice %406 {offsets = [0, 16], sizes = [5, 8], strides = [1, 1]} : vector<5x64xf32> to vector<5x8xf32>
    "tpu.trace_start"() <{level = 10 : i32, message = "qd,kd->qk"}> : () -> ()
    %cst_136 = arith.constant dense<0.000000e+00> : vector<8x5xf32>
    %417 = tpu.matmul %415, %416, %cst_136 {dimension_numbers = #tpu.dot_dimension_numbers<[1], [1], [0], [0], [0, 0, 1, 0], [], []>} : vector<8x8xf32>, vector<5x8xf32>, vector<8x5xf32> -> vector<8x5xf32>
    "tpu.trace_stop"() : () -> ()
    %418 = vector.extract_strided_slice %401 {offsets = [0, 24], sizes = [8, 8], strides = [1, 1]} : vector<8x32xf32> to vector<8x8xf32>
    %419 = vector.extract_strided_slice %406 {offsets = [0, 24], sizes = [5, 8], strides = [1, 1]} : vector<5x64xf32> to vector<5x8xf32>
    "tpu.trace_start"() <{level = 10 : i32, message = "qd,kd->qk"}> : () -> ()
    %cst_137 = arith.constant dense<0.000000e+00> : vector<8x5xf32>
    %420 = tpu.matmul %418, %419, %cst_137 {dimension_numbers = #tpu.dot_dimension_numbers<[1], [1], [0], [0], [0, 0, 1, 0], [], []>} : vector<8x8xf32>, vector<5x8xf32>, vector<8x5xf32> -> vector<8x5xf32>
    "tpu.trace_stop"() : () -> ()
    %421 = vector.shape_cast %411 : vector<8x5xf32> to vector<1x8x5xf32>
    %422 = vector.shape_cast %414 : vector<8x5xf32> to vector<1x8x5xf32>
    %423 = vector.shape_cast %417 : vector<8x5xf32> to vector<1x8x5xf32>
    %424 = vector.shape_cast %420 : vector<8x5xf32> to vector<1x8x5xf32>
    %425 = tpu.concatenate %421, %422, %423, %424 in 0 : vector<1x8x5xf32>, vector<1x8x5xf32>, vector<1x8x5xf32>, vector<1x8x5xf32> -> vector<4x8x5xf32>
    %cst_138 = arith.constant dense<0xFF800000> : vector<4x8xf32>
    %426 = vector.multi_reduction <maximumf>, %425, %cst_138 [2] : vector<4x8x5xf32> to vector<4x8xf32>
    %427 = vector.shape_cast %426 : vector<4x8xf32> to vector<4x8x1xf32>
    %428 = vector.broadcast %427 : vector<4x8x1xf32> to vector<4x8x5xf32>
    %429 = arith.subf %425, %428 : vector<4x8x5xf32>
    %430 = math.exp %429 : vector<4x8x5xf32>
    %cst_139 = arith.constant dense<0.000000e+00> : vector<4x8xf32>
    %431 = vector.multi_reduction <add>, %430, %cst_139 [2] : vector<4x8x5xf32> to vector<4x8xf32>
    %432 = vector.shape_cast %431 : vector<4x8xf32> to vector<4x8x1xf32>
    %433 = tpu.reciprocal %432 {approx = true} : vector<4x8x1xf32> -> vector<4x8x1xf32>
    %434 = vector.broadcast %433 : vector<4x8x1xf32> to vector<4x8x5xf32>
    %435 = arith.mulf %430, %434 : vector<4x8x5xf32>
    %436 = vector.extract_strided_slice %435 {offsets = [0, 0, 0], sizes = [1, 8, 5], strides = [1, 1, 1]} : vector<4x8x5xf32> to vector<1x8x5xf32>
    %437 = vector.shape_cast %436 : vector<1x8x5xf32> to vector<8x5xf32>
    %438 = vector.extract_strided_slice %406 {offsets = [0, 32], sizes = [5, 8], strides = [1, 1]} : vector<5x64xf32> to vector<5x8xf32>
    %cst_140 = arith.constant dense<0.000000e+00> : vector<8x8xf32>
    %439 = tpu.matmul %437, %438, %cst_140 {dimension_numbers = #tpu.dot_dimension_numbers<[1], [0], [0], [1], [0, 0, 1, 1], [], []>} : vector<8x5xf32>, vector<5x8xf32>, vector<8x8xf32> -> vector<8x8xf32>
    %440 = vector.extract_strided_slice %435 {offsets = [1, 0, 0], sizes = [1, 8, 5], strides = [1, 1, 1]} : vector<4x8x5xf32> to vector<1x8x5xf32>
    %441 = vector.shape_cast %440 : vector<1x8x5xf32> to vector<8x5xf32>
    %442 = vector.extract_strided_slice %406 {offsets = [0, 40], sizes = [5, 8], strides = [1, 1]} : vector<5x64xf32> to vector<5x8xf32>
    %cst_141 = arith.constant dense<0.000000e+00> : vector<8x8xf32>
    %443 = tpu.matmul %441, %442, %cst_141 {dimension_numbers = #tpu.dot_dimension_numbers<[1], [0], [0], [1], [0, 0, 1, 1], [], []>} : vector<8x5xf32>, vector<5x8xf32>, vector<8x8xf32> -> vector<8x8xf32>
    %444 = vector.extract_strided_slice %435 {offsets = [2, 0, 0], sizes = [1, 8, 5], strides = [1, 1, 1]} : vector<4x8x5xf32> to vector<1x8x5xf32>
    %445 = vector.shape_cast %444 : vector<1x8x5xf32> to vector<8x5xf32>
    %446 = vector.extract_strided_slice %406 {offsets = [0, 48], sizes = [5, 8], strides = [1, 1]} : vector<5x64xf32> to vector<5x8xf32>
    %cst_142 = arith.constant dense<0.000000e+00> : vector<8x8xf32>
    %447 = tpu.matmul %445, %446, %cst_142 {dimension_numbers = #tpu.dot_dimension_numbers<[1], [0], [0], [1], [0, 0, 1, 1], [], []>} : vector<8x5xf32>, vector<5x8xf32>, vector<8x8xf32> -> vector<8x8xf32>
    %448 = vector.extract_strided_slice %435 {offsets = [3, 0, 0], sizes = [1, 8, 5], strides = [1, 1, 1]} : vector<4x8x5xf32> to vector<1x8x5xf32>
    %449 = vector.shape_cast %448 : vector<1x8x5xf32> to vector<8x5xf32>
    %450 = vector.extract_strided_slice %406 {offsets = [0, 56], sizes = [5, 8], strides = [1, 1]} : vector<5x64xf32> to vector<5x8xf32>
    %cst_143 = arith.constant dense<0.000000e+00> : vector<8x8xf32>
    %451 = tpu.matmul %449, %450, %cst_143 {dimension_numbers = #tpu.dot_dimension_numbers<[1], [0], [0], [1], [0, 0, 1, 1], [], []>} : vector<8x5xf32>, vector<5x8xf32>, vector<8x8xf32> -> vector<8x8xf32>
    %452 = tpu.concatenate %439, %443, %447, %451 in 1 : vector<8x8xf32>, vector<8x8xf32>, vector<8x8xf32>, vector<8x8xf32> -> vector<8x32xf32>
    %cst_144 = arith.constant dense<0.000000e+00> : vector<8x32xf32>
    %453 = tpu.matmul %452, %407, %cst_144 {dimension_numbers = #tpu.dot_dimension_numbers<[1], [0], [0], [1], [0, 0, 1, 1], [], []>} : vector<8x32xf32>, vector<32x32xf32>, vector<8x32xf32> -> vector<8x32xf32>
    %454 = vector.broadcast %408 : vector<1x32xf32> to vector<8x32xf32>
    %455 = arith.addf %453, %454 : vector<8x32xf32>
    %456 = arith.addf %396, %455 : vector<8x32xf32>
    %c968 = arith.constant 968 : index
    %c0_145 = arith.constant 0 : index
    %457 = vector.load %arg3[%c968, %c0_145] : memref<1512x128xf32, #tpu.memory_space<vmem>>, vector<1x32xf32>
    %c976 = arith.constant 976 : index
    %c0_146 = arith.constant 0 : index
    %458 = vector.load %arg3[%c976, %c0_146] : memref<1512x128xf32, #tpu.memory_space<vmem>>, vector<1x32xf32>
    %cst_147 = arith.constant dense<0.000000e+00> : vector<8xf32>
    %459 = vector.multi_reduction <add>, %456, %cst_147 [1] : vector<8x32xf32> to vector<8xf32>
    %460 = vector.shape_cast %459 : vector<8xf32> to vector<8x1xf32>
    %cst_148 = arith.constant 3.200000e+01 : f32
    %461 = vector.broadcast %cst_148 : f32 to vector<8x1xf32>
    %462 = arith.divf %460, %461 : vector<8x1xf32>
    %463 = vector.broadcast %462 : vector<8x1xf32> to vector<8x32xf32>
    %464 = arith.subf %456, %463 : vector<8x32xf32>
    %465 = arith.mulf %464, %464 : vector<8x32xf32>
    %cst_149 = arith.constant dense<0.000000e+00> : vector<8xf32>
    %466 = vector.multi_reduction <add>, %465, %cst_149 [1] : vector<8x32xf32> to vector<8xf32>
    %467 = vector.shape_cast %466 : vector<8xf32> to vector<8x1xf32>
    %cst_150 = arith.constant 3.200000e+01 : f32
    %468 = vector.broadcast %cst_150 : f32 to vector<8x1xf32>
    %469 = arith.divf %467, %468 : vector<8x1xf32>
    %470 = vector.broadcast %462 : vector<8x1xf32> to vector<8x32xf32>
    %471 = arith.subf %456, %470 : vector<8x32xf32>
    %cst_151 = arith.constant 9.99999974E-6 : f32
    %472 = vector.broadcast %cst_151 : f32 to vector<8x1xf32>
    %473 = arith.addf %469, %472 : vector<8x1xf32>
    %474 = math.rsqrt %473 : vector<8x1xf32>
    %475 = vector.broadcast %474 : vector<8x1xf32> to vector<8x32xf32>
    %476 = arith.mulf %471, %475 : vector<8x32xf32>
    %477 = vector.broadcast %457 : vector<1x32xf32> to vector<8x32xf32>
    %478 = arith.mulf %476, %477 : vector<8x32xf32>
    %479 = vector.broadcast %458 : vector<1x32xf32> to vector<8x32xf32>
    %480 = arith.addf %478, %479 : vector<8x32xf32>
    %c984 = arith.constant 984 : index
    %c0_152 = arith.constant 0 : index
    %481 = vector.load %arg3[%c984, %c0_152] : memref<1512x128xf32, #tpu.memory_space<vmem>>, vector<32x64xf32>
    %cst_153 = arith.constant dense<0.000000e+00> : vector<8x64xf32>
    %482 = tpu.matmul %480, %481, %cst_153 {dimension_numbers = #tpu.dot_dimension_numbers<[1], [0], [0], [1], [0, 0, 1, 1], [], []>} : vector<8x32xf32>, vector<32x64xf32>, vector<8x64xf32> -> vector<8x64xf32>
    %c1016 = arith.constant 1016 : index
    %c0_154 = arith.constant 0 : index
    %483 = vector.load %arg3[%c1016, %c0_154] : memref<1512x128xf32, #tpu.memory_space<vmem>>, vector<1x64xf32>
    %484 = vector.broadcast %483 : vector<1x64xf32> to vector<8x64xf32>
    %485 = arith.addf %482, %484 : vector<8x64xf32>
    %cst_155 = arith.constant 0.000000e+00 : f32
    %486 = vector.broadcast %cst_155 : f32 to vector<8x64xf32>
    %487 = arith.maximumf %485, %486 : vector<8x64xf32>
    %c1024 = arith.constant 1024 : index
    %c0_156 = arith.constant 0 : index
    %488 = vector.load %arg3[%c1024, %c0_156] : memref<1512x128xf32, #tpu.memory_space<vmem>>, vector<64x32xf32>
    %cst_157 = arith.constant dense<0.000000e+00> : vector<8x32xf32>
    %489 = tpu.matmul %487, %488, %cst_157 {dimension_numbers = #tpu.dot_dimension_numbers<[1], [0], [0], [1], [0, 0, 1, 1], [], []>} : vector<8x64xf32>, vector<64x32xf32>, vector<8x32xf32> -> vector<8x32xf32>
    %c1088 = arith.constant 1088 : index
    %c0_158 = arith.constant 0 : index
    %490 = vector.load %arg3[%c1088, %c0_158] : memref<1512x128xf32, #tpu.memory_space<vmem>>, vector<1x32xf32>
    %491 = vector.broadcast %490 : vector<1x32xf32> to vector<8x32xf32>
    %492 = arith.addf %489, %491 : vector<8x32xf32>
    %493 = arith.addf %480, %492 : vector<8x32xf32>
    %c1096 = arith.constant 1096 : index
    %c0_159 = arith.constant 0 : index
    %494 = vector.load %arg3[%c1096, %c0_159] : memref<1512x128xf32, #tpu.memory_space<vmem>>, vector<1x32xf32>
    %c1104 = arith.constant 1104 : index
    %c0_160 = arith.constant 0 : index
    %495 = vector.load %arg3[%c1104, %c0_160] : memref<1512x128xf32, #tpu.memory_space<vmem>>, vector<1x32xf32>
    %cst_161 = arith.constant dense<0.000000e+00> : vector<8xf32>
    %496 = vector.multi_reduction <add>, %493, %cst_161 [1] : vector<8x32xf32> to vector<8xf32>
    %497 = vector.shape_cast %496 : vector<8xf32> to vector<8x1xf32>
    %cst_162 = arith.constant 3.200000e+01 : f32
    %498 = vector.broadcast %cst_162 : f32 to vector<8x1xf32>
    %499 = arith.divf %497, %498 : vector<8x1xf32>
    %500 = vector.broadcast %499 : vector<8x1xf32> to vector<8x32xf32>
    %501 = arith.subf %493, %500 : vector<8x32xf32>
    %502 = arith.mulf %501, %501 : vector<8x32xf32>
    %cst_163 = arith.constant dense<0.000000e+00> : vector<8xf32>
    %503 = vector.multi_reduction <add>, %502, %cst_163 [1] : vector<8x32xf32> to vector<8xf32>
    %504 = vector.shape_cast %503 : vector<8xf32> to vector<8x1xf32>
    %cst_164 = arith.constant 3.200000e+01 : f32
    %505 = vector.broadcast %cst_164 : f32 to vector<8x1xf32>
    %506 = arith.divf %504, %505 : vector<8x1xf32>
    %507 = vector.broadcast %499 : vector<8x1xf32> to vector<8x32xf32>
    %508 = arith.subf %493, %507 : vector<8x32xf32>
    %cst_165 = arith.constant 9.99999974E-6 : f32
    %509 = vector.broadcast %cst_165 : f32 to vector<8x1xf32>
    %510 = arith.addf %506, %509 : vector<8x1xf32>
    %511 = math.rsqrt %510 : vector<8x1xf32>
    %512 = vector.broadcast %511 : vector<8x1xf32> to vector<8x32xf32>
    %513 = arith.mulf %508, %512 : vector<8x32xf32>
    %514 = vector.broadcast %494 : vector<1x32xf32> to vector<8x32xf32>
    %515 = arith.mulf %513, %514 : vector<8x32xf32>
    %516 = vector.broadcast %495 : vector<1x32xf32> to vector<8x32xf32>
    %517 = arith.addf %515, %516 : vector<8x32xf32>
    %c1112 = arith.constant 1112 : index
    %c0_166 = arith.constant 0 : index
    %518 = vector.load %arg3[%c1112, %c0_166] : memref<1512x128xf32, #tpu.memory_space<vmem>>, vector<32x96xf32>
    %cst_167 = arith.constant dense<0.000000e+00> : vector<8x96xf32>
    %519 = tpu.matmul %517, %518, %cst_167 {dimension_numbers = #tpu.dot_dimension_numbers<[1], [0], [0], [1], [0, 0, 1, 1], [], []>} : vector<8x32xf32>, vector<32x96xf32>, vector<8x96xf32> -> vector<8x96xf32>
    %c1144 = arith.constant 1144 : index
    %c0_168 = arith.constant 0 : index
    %520 = vector.load %arg3[%c1144, %c0_168] : memref<1512x128xf32, #tpu.memory_space<vmem>>, vector<1x96xf32>
    %521 = vector.broadcast %520 : vector<1x96xf32> to vector<8x96xf32>
    %522 = arith.addf %519, %521 : vector<8x96xf32>
    %c1152 = arith.constant 1152 : index
    %c0_169 = arith.constant 0 : index
    %523 = vector.load %arg3[%c1152, %c0_169] : memref<1512x128xf32, #tpu.memory_space<vmem>>, vector<32x32xf32>
    %c1184 = arith.constant 1184 : index
    %c0_170 = arith.constant 0 : index
    %524 = vector.load %arg3[%c1184, %c0_170] : memref<1512x128xf32, #tpu.memory_space<vmem>>, vector<1x32xf32>
    %525 = vector.extract_strided_slice %522 {offsets = [0, 0], sizes = [8, 8], strides = [1, 1]} : vector<8x96xf32> to vector<8x8xf32>
    %526 = vector.extract_strided_slice %522 {offsets = [0, 32], sizes = [8, 8], strides = [1, 1]} : vector<8x96xf32> to vector<8x8xf32>
    "tpu.trace_start"() <{level = 10 : i32, message = "qd,kd->qk"}> : () -> ()
    %cst_171 = arith.constant dense<0.000000e+00> : vector<8x8xf32>
    %527 = tpu.matmul %525, %526, %cst_171 {dimension_numbers = #tpu.dot_dimension_numbers<[1], [1], [0], [0], [0, 0, 1, 0], [], []>} : vector<8x8xf32>, vector<8x8xf32>, vector<8x8xf32> -> vector<8x8xf32>
    "tpu.trace_stop"() : () -> ()
    %528 = vector.extract_strided_slice %522 {offsets = [0, 8], sizes = [8, 8], strides = [1, 1]} : vector<8x96xf32> to vector<8x8xf32>
    %529 = vector.extract_strided_slice %522 {offsets = [0, 40], sizes = [8, 8], strides = [1, 1]} : vector<8x96xf32> to vector<8x8xf32>
    "tpu.trace_start"() <{level = 10 : i32, message = "qd,kd->qk"}> : () -> ()
    %cst_172 = arith.constant dense<0.000000e+00> : vector<8x8xf32>
    %530 = tpu.matmul %528, %529, %cst_172 {dimension_numbers = #tpu.dot_dimension_numbers<[1], [1], [0], [0], [0, 0, 1, 0], [], []>} : vector<8x8xf32>, vector<8x8xf32>, vector<8x8xf32> -> vector<8x8xf32>
    "tpu.trace_stop"() : () -> ()
    %531 = vector.extract_strided_slice %522 {offsets = [0, 16], sizes = [8, 8], strides = [1, 1]} : vector<8x96xf32> to vector<8x8xf32>
    %532 = vector.extract_strided_slice %522 {offsets = [0, 48], sizes = [8, 8], strides = [1, 1]} : vector<8x96xf32> to vector<8x8xf32>
    "tpu.trace_start"() <{level = 10 : i32, message = "qd,kd->qk"}> : () -> ()
    %cst_173 = arith.constant dense<0.000000e+00> : vector<8x8xf32>
    %533 = tpu.matmul %531, %532, %cst_173 {dimension_numbers = #tpu.dot_dimension_numbers<[1], [1], [0], [0], [0, 0, 1, 0], [], []>} : vector<8x8xf32>, vector<8x8xf32>, vector<8x8xf32> -> vector<8x8xf32>
    "tpu.trace_stop"() : () -> ()
    %534 = vector.extract_strided_slice %522 {offsets = [0, 24], sizes = [8, 8], strides = [1, 1]} : vector<8x96xf32> to vector<8x8xf32>
    %535 = vector.extract_strided_slice %522 {offsets = [0, 56], sizes = [8, 8], strides = [1, 1]} : vector<8x96xf32> to vector<8x8xf32>
    "tpu.trace_start"() <{level = 10 : i32, message = "qd,kd->qk"}> : () -> ()
    %cst_174 = arith.constant dense<0.000000e+00> : vector<8x8xf32>
    %536 = tpu.matmul %534, %535, %cst_174 {dimension_numbers = #tpu.dot_dimension_numbers<[1], [1], [0], [0], [0, 0, 1, 0], [], []>} : vector<8x8xf32>, vector<8x8xf32>, vector<8x8xf32> -> vector<8x8xf32>
    "tpu.trace_stop"() : () -> ()
    %537 = vector.shape_cast %527 : vector<8x8xf32> to vector<1x8x8xf32>
    %538 = vector.shape_cast %530 : vector<8x8xf32> to vector<1x8x8xf32>
    %539 = vector.shape_cast %533 : vector<8x8xf32> to vector<1x8x8xf32>
    %540 = vector.shape_cast %536 : vector<8x8xf32> to vector<1x8x8xf32>
    %541 = tpu.concatenate %537, %538, %539, %540 in 0 : vector<1x8x8xf32>, vector<1x8x8xf32>, vector<1x8x8xf32>, vector<1x8x8xf32> -> vector<4x8x8xf32>
    %542 = vector.shape_cast %314 : vector<8x8xf32> to vector<1x8x8xf32>
    %543 = vector.broadcast %542 : vector<1x8x8xf32> to vector<4x8x8xf32>
    %544 = arith.addf %541, %543 : vector<4x8x8xf32>
    %cst_175 = arith.constant dense<0xFF800000> : vector<4x8xf32>
    %545 = vector.multi_reduction <maximumf>, %544, %cst_175 [2] : vector<4x8x8xf32> to vector<4x8xf32>
    %546 = vector.shape_cast %545 : vector<4x8xf32> to vector<4x8x1xf32>
    %547 = vector.broadcast %546 : vector<4x8x1xf32> to vector<4x8x8xf32>
    %548 = arith.subf %544, %547 : vector<4x8x8xf32>
    %549 = math.exp %548 : vector<4x8x8xf32>
    %cst_176 = arith.constant dense<0.000000e+00> : vector<4x8xf32>
    %550 = vector.multi_reduction <add>, %549, %cst_176 [2] : vector<4x8x8xf32> to vector<4x8xf32>
    %551 = vector.shape_cast %550 : vector<4x8xf32> to vector<4x8x1xf32>
    %552 = tpu.reciprocal %551 {approx = true} : vector<4x8x1xf32> -> vector<4x8x1xf32>
    %553 = vector.broadcast %552 : vector<4x8x1xf32> to vector<4x8x8xf32>
    %554 = arith.mulf %549, %553 : vector<4x8x8xf32>
    %555 = vector.extract_strided_slice %554 {offsets = [0, 0, 0], sizes = [1, 8, 8], strides = [1, 1, 1]} : vector<4x8x8xf32> to vector<1x8x8xf32>
    %556 = vector.shape_cast %555 : vector<1x8x8xf32> to vector<8x8xf32>
    %557 = vector.extract_strided_slice %522 {offsets = [0, 64], sizes = [8, 8], strides = [1, 1]} : vector<8x96xf32> to vector<8x8xf32>
    %cst_177 = arith.constant dense<0.000000e+00> : vector<8x8xf32>
    %558 = tpu.matmul %556, %557, %cst_177 {dimension_numbers = #tpu.dot_dimension_numbers<[1], [0], [0], [1], [0, 0, 1, 1], [], []>} : vector<8x8xf32>, vector<8x8xf32>, vector<8x8xf32> -> vector<8x8xf32>
    %559 = vector.extract_strided_slice %554 {offsets = [1, 0, 0], sizes = [1, 8, 8], strides = [1, 1, 1]} : vector<4x8x8xf32> to vector<1x8x8xf32>
    %560 = vector.shape_cast %559 : vector<1x8x8xf32> to vector<8x8xf32>
    %561 = vector.extract_strided_slice %522 {offsets = [0, 72], sizes = [8, 8], strides = [1, 1]} : vector<8x96xf32> to vector<8x8xf32>
    %cst_178 = arith.constant dense<0.000000e+00> : vector<8x8xf32>
    %562 = tpu.matmul %560, %561, %cst_178 {dimension_numbers = #tpu.dot_dimension_numbers<[1], [0], [0], [1], [0, 0, 1, 1], [], []>} : vector<8x8xf32>, vector<8x8xf32>, vector<8x8xf32> -> vector<8x8xf32>
    %563 = vector.extract_strided_slice %554 {offsets = [2, 0, 0], sizes = [1, 8, 8], strides = [1, 1, 1]} : vector<4x8x8xf32> to vector<1x8x8xf32>
    %564 = vector.shape_cast %563 : vector<1x8x8xf32> to vector<8x8xf32>
    %565 = vector.extract_strided_slice %522 {offsets = [0, 80], sizes = [8, 8], strides = [1, 1]} : vector<8x96xf32> to vector<8x8xf32>
    %cst_179 = arith.constant dense<0.000000e+00> : vector<8x8xf32>
    %566 = tpu.matmul %564, %565, %cst_179 {dimension_numbers = #tpu.dot_dimension_numbers<[1], [0], [0], [1], [0, 0, 1, 1], [], []>} : vector<8x8xf32>, vector<8x8xf32>, vector<8x8xf32> -> vector<8x8xf32>
    %567 = vector.extract_strided_slice %554 {offsets = [3, 0, 0], sizes = [1, 8, 8], strides = [1, 1, 1]} : vector<4x8x8xf32> to vector<1x8x8xf32>
    %568 = vector.shape_cast %567 : vector<1x8x8xf32> to vector<8x8xf32>
    %569 = vector.extract_strided_slice %522 {offsets = [0, 88], sizes = [8, 8], strides = [1, 1]} : vector<8x96xf32> to vector<8x8xf32>
    %cst_180 = arith.constant dense<0.000000e+00> : vector<8x8xf32>
    %570 = tpu.matmul %568, %569, %cst_180 {dimension_numbers = #tpu.dot_dimension_numbers<[1], [0], [0], [1], [0, 0, 1, 1], [], []>} : vector<8x8xf32>, vector<8x8xf32>, vector<8x8xf32> -> vector<8x8xf32>
    %571 = tpu.concatenate %558, %562, %566, %570 in 1 : vector<8x8xf32>, vector<8x8xf32>, vector<8x8xf32>, vector<8x8xf32> -> vector<8x32xf32>
    %cst_181 = arith.constant dense<0.000000e+00> : vector<8x32xf32>
    %572 = tpu.matmul %571, %523, %cst_181 {dimension_numbers = #tpu.dot_dimension_numbers<[1], [0], [0], [1], [0, 0, 1, 1], [], []>} : vector<8x32xf32>, vector<32x32xf32>, vector<8x32xf32> -> vector<8x32xf32>
    %573 = vector.broadcast %524 : vector<1x32xf32> to vector<8x32xf32>
    %574 = arith.addf %572, %573 : vector<8x32xf32>
    %575 = arith.addf %517, %574 : vector<8x32xf32>
    %c1192 = arith.constant 1192 : index
    %c0_182 = arith.constant 0 : index
    %576 = vector.load %arg3[%c1192, %c0_182] : memref<1512x128xf32, #tpu.memory_space<vmem>>, vector<1x32xf32>
    %c1200 = arith.constant 1200 : index
    %c0_183 = arith.constant 0 : index
    %577 = vector.load %arg3[%c1200, %c0_183] : memref<1512x128xf32, #tpu.memory_space<vmem>>, vector<1x32xf32>
    %cst_184 = arith.constant dense<0.000000e+00> : vector<8xf32>
    %578 = vector.multi_reduction <add>, %575, %cst_184 [1] : vector<8x32xf32> to vector<8xf32>
    %579 = vector.shape_cast %578 : vector<8xf32> to vector<8x1xf32>
    %cst_185 = arith.constant 3.200000e+01 : f32
    %580 = vector.broadcast %cst_185 : f32 to vector<8x1xf32>
    %581 = arith.divf %579, %580 : vector<8x1xf32>
    %582 = vector.broadcast %581 : vector<8x1xf32> to vector<8x32xf32>
    %583 = arith.subf %575, %582 : vector<8x32xf32>
    %584 = arith.mulf %583, %583 : vector<8x32xf32>
    %cst_186 = arith.constant dense<0.000000e+00> : vector<8xf32>
    %585 = vector.multi_reduction <add>, %584, %cst_186 [1] : vector<8x32xf32> to vector<8xf32>
    %586 = vector.shape_cast %585 : vector<8xf32> to vector<8x1xf32>
    %cst_187 = arith.constant 3.200000e+01 : f32
    %587 = vector.broadcast %cst_187 : f32 to vector<8x1xf32>
    %588 = arith.divf %586, %587 : vector<8x1xf32>
    %589 = vector.broadcast %581 : vector<8x1xf32> to vector<8x32xf32>
    %590 = arith.subf %575, %589 : vector<8x32xf32>
    %cst_188 = arith.constant 9.99999974E-6 : f32
    %591 = vector.broadcast %cst_188 : f32 to vector<8x1xf32>
    %592 = arith.addf %588, %591 : vector<8x1xf32>
    %593 = math.rsqrt %592 : vector<8x1xf32>
    %594 = vector.broadcast %593 : vector<8x1xf32> to vector<8x32xf32>
    %595 = arith.mulf %590, %594 : vector<8x32xf32>
    %596 = vector.broadcast %576 : vector<1x32xf32> to vector<8x32xf32>
    %597 = arith.mulf %595, %596 : vector<8x32xf32>
    %598 = vector.broadcast %577 : vector<1x32xf32> to vector<8x32xf32>
    %599 = arith.addf %597, %598 : vector<8x32xf32>
    %c1208 = arith.constant 1208 : index
    %c0_189 = arith.constant 0 : index
    %600 = vector.load %arg3[%c1208, %c0_189] : memref<1512x128xf32, #tpu.memory_space<vmem>>, vector<32x32xf32>
    %cst_190 = arith.constant dense<0.000000e+00> : vector<8x32xf32>
    %601 = tpu.matmul %599, %600, %cst_190 {dimension_numbers = #tpu.dot_dimension_numbers<[1], [0], [0], [1], [0, 0, 1, 1], [], []>} : vector<8x32xf32>, vector<32x32xf32>, vector<8x32xf32> -> vector<8x32xf32>
    %c1240 = arith.constant 1240 : index
    %c0_191 = arith.constant 0 : index
    %602 = vector.load %arg3[%c1240, %c0_191] : memref<1512x128xf32, #tpu.memory_space<vmem>>, vector<1x32xf32>
    %603 = vector.broadcast %602 : vector<1x32xf32> to vector<8x32xf32>
    %604 = arith.addf %601, %603 : vector<8x32xf32>
    %c1248 = arith.constant 1248 : index
    %c0_192 = arith.constant 0 : index
    %605 = vector.load %arg3[%c1248, %c0_192] : memref<1512x128xf32, #tpu.memory_space<vmem>>, vector<32x64xf32>
    %cst_193 = arith.constant dense<0.000000e+00> : vector<5x64xf32>
    %606 = tpu.matmul %295, %605, %cst_193 {dimension_numbers = #tpu.dot_dimension_numbers<[1], [0], [0], [1], [0, 0, 1, 1], [], []>} : vector<5x32xf32>, vector<32x64xf32>, vector<5x64xf32> -> vector<5x64xf32>
    %c1280 = arith.constant 1280 : index
    %c0_194 = arith.constant 0 : index
    %607 = vector.load %arg3[%c1280, %c0_194] : memref<1512x128xf32, #tpu.memory_space<vmem>>, vector<1x64xf32>
    %608 = vector.broadcast %607 : vector<1x64xf32> to vector<5x64xf32>
    %609 = arith.addf %606, %608 : vector<5x64xf32>
    %c1288 = arith.constant 1288 : index
    %c0_195 = arith.constant 0 : index
    %610 = vector.load %arg3[%c1288, %c0_195] : memref<1512x128xf32, #tpu.memory_space<vmem>>, vector<32x32xf32>
    %c1320 = arith.constant 1320 : index
    %c0_196 = arith.constant 0 : index
    %611 = vector.load %arg3[%c1320, %c0_196] : memref<1512x128xf32, #tpu.memory_space<vmem>>, vector<1x32xf32>
    %612 = vector.extract_strided_slice %604 {offsets = [0, 0], sizes = [8, 8], strides = [1, 1]} : vector<8x32xf32> to vector<8x8xf32>
    %613 = vector.extract_strided_slice %609 {offsets = [0, 0], sizes = [5, 8], strides = [1, 1]} : vector<5x64xf32> to vector<5x8xf32>
    "tpu.trace_start"() <{level = 10 : i32, message = "qd,kd->qk"}> : () -> ()
    %cst_197 = arith.constant dense<0.000000e+00> : vector<8x5xf32>
    %614 = tpu.matmul %612, %613, %cst_197 {dimension_numbers = #tpu.dot_dimension_numbers<[1], [1], [0], [0], [0, 0, 1, 0], [], []>} : vector<8x8xf32>, vector<5x8xf32>, vector<8x5xf32> -> vector<8x5xf32>
    "tpu.trace_stop"() : () -> ()
    %615 = vector.extract_strided_slice %604 {offsets = [0, 8], sizes = [8, 8], strides = [1, 1]} : vector<8x32xf32> to vector<8x8xf32>
    %616 = vector.extract_strided_slice %609 {offsets = [0, 8], sizes = [5, 8], strides = [1, 1]} : vector<5x64xf32> to vector<5x8xf32>
    "tpu.trace_start"() <{level = 10 : i32, message = "qd,kd->qk"}> : () -> ()
    %cst_198 = arith.constant dense<0.000000e+00> : vector<8x5xf32>
    %617 = tpu.matmul %615, %616, %cst_198 {dimension_numbers = #tpu.dot_dimension_numbers<[1], [1], [0], [0], [0, 0, 1, 0], [], []>} : vector<8x8xf32>, vector<5x8xf32>, vector<8x5xf32> -> vector<8x5xf32>
    "tpu.trace_stop"() : () -> ()
    %618 = vector.extract_strided_slice %604 {offsets = [0, 16], sizes = [8, 8], strides = [1, 1]} : vector<8x32xf32> to vector<8x8xf32>
    %619 = vector.extract_strided_slice %609 {offsets = [0, 16], sizes = [5, 8], strides = [1, 1]} : vector<5x64xf32> to vector<5x8xf32>
    "tpu.trace_start"() <{level = 10 : i32, message = "qd,kd->qk"}> : () -> ()
    %cst_199 = arith.constant dense<0.000000e+00> : vector<8x5xf32>
    %620 = tpu.matmul %618, %619, %cst_199 {dimension_numbers = #tpu.dot_dimension_numbers<[1], [1], [0], [0], [0, 0, 1, 0], [], []>} : vector<8x8xf32>, vector<5x8xf32>, vector<8x5xf32> -> vector<8x5xf32>
    "tpu.trace_stop"() : () -> ()
    %621 = vector.extract_strided_slice %604 {offsets = [0, 24], sizes = [8, 8], strides = [1, 1]} : vector<8x32xf32> to vector<8x8xf32>
    %622 = vector.extract_strided_slice %609 {offsets = [0, 24], sizes = [5, 8], strides = [1, 1]} : vector<5x64xf32> to vector<5x8xf32>
    "tpu.trace_start"() <{level = 10 : i32, message = "qd,kd->qk"}> : () -> ()
    %cst_200 = arith.constant dense<0.000000e+00> : vector<8x5xf32>
    %623 = tpu.matmul %621, %622, %cst_200 {dimension_numbers = #tpu.dot_dimension_numbers<[1], [1], [0], [0], [0, 0, 1, 0], [], []>} : vector<8x8xf32>, vector<5x8xf32>, vector<8x5xf32> -> vector<8x5xf32>
    "tpu.trace_stop"() : () -> ()
    %624 = vector.shape_cast %614 : vector<8x5xf32> to vector<1x8x5xf32>
    %625 = vector.shape_cast %617 : vector<8x5xf32> to vector<1x8x5xf32>
    %626 = vector.shape_cast %620 : vector<8x5xf32> to vector<1x8x5xf32>
    %627 = vector.shape_cast %623 : vector<8x5xf32> to vector<1x8x5xf32>
    %628 = tpu.concatenate %624, %625, %626, %627 in 0 : vector<1x8x5xf32>, vector<1x8x5xf32>, vector<1x8x5xf32>, vector<1x8x5xf32> -> vector<4x8x5xf32>
    %cst_201 = arith.constant dense<0xFF800000> : vector<4x8xf32>
    %629 = vector.multi_reduction <maximumf>, %628, %cst_201 [2] : vector<4x8x5xf32> to vector<4x8xf32>
    %630 = vector.shape_cast %629 : vector<4x8xf32> to vector<4x8x1xf32>
    %631 = vector.broadcast %630 : vector<4x8x1xf32> to vector<4x8x5xf32>
    %632 = arith.subf %628, %631 : vector<4x8x5xf32>
    %633 = math.exp %632 : vector<4x8x5xf32>
    %cst_202 = arith.constant dense<0.000000e+00> : vector<4x8xf32>
    %634 = vector.multi_reduction <add>, %633, %cst_202 [2] : vector<4x8x5xf32> to vector<4x8xf32>
    %635 = vector.shape_cast %634 : vector<4x8xf32> to vector<4x8x1xf32>
    %636 = tpu.reciprocal %635 {approx = true} : vector<4x8x1xf32> -> vector<4x8x1xf32>
    %637 = vector.broadcast %636 : vector<4x8x1xf32> to vector<4x8x5xf32>
    %638 = arith.mulf %633, %637 : vector<4x8x5xf32>
    %639 = vector.extract_strided_slice %638 {offsets = [0, 0, 0], sizes = [1, 8, 5], strides = [1, 1, 1]} : vector<4x8x5xf32> to vector<1x8x5xf32>
    %640 = vector.shape_cast %639 : vector<1x8x5xf32> to vector<8x5xf32>
    %641 = vector.extract_strided_slice %609 {offsets = [0, 32], sizes = [5, 8], strides = [1, 1]} : vector<5x64xf32> to vector<5x8xf32>
    %cst_203 = arith.constant dense<0.000000e+00> : vector<8x8xf32>
    %642 = tpu.matmul %640, %641, %cst_203 {dimension_numbers = #tpu.dot_dimension_numbers<[1], [0], [0], [1], [0, 0, 1, 1], [], []>} : vector<8x5xf32>, vector<5x8xf32>, vector<8x8xf32> -> vector<8x8xf32>
    %643 = vector.extract_strided_slice %638 {offsets = [1, 0, 0], sizes = [1, 8, 5], strides = [1, 1, 1]} : vector<4x8x5xf32> to vector<1x8x5xf32>
    %644 = vector.shape_cast %643 : vector<1x8x5xf32> to vector<8x5xf32>
    %645 = vector.extract_strided_slice %609 {offsets = [0, 40], sizes = [5, 8], strides = [1, 1]} : vector<5x64xf32> to vector<5x8xf32>
    %cst_204 = arith.constant dense<0.000000e+00> : vector<8x8xf32>
    %646 = tpu.matmul %644, %645, %cst_204 {dimension_numbers = #tpu.dot_dimension_numbers<[1], [0], [0], [1], [0, 0, 1, 1], [], []>} : vector<8x5xf32>, vector<5x8xf32>, vector<8x8xf32> -> vector<8x8xf32>
    %647 = vector.extract_strided_slice %638 {offsets = [2, 0, 0], sizes = [1, 8, 5], strides = [1, 1, 1]} : vector<4x8x5xf32> to vector<1x8x5xf32>
    %648 = vector.shape_cast %647 : vector<1x8x5xf32> to vector<8x5xf32>
    %649 = vector.extract_strided_slice %609 {offsets = [0, 48], sizes = [5, 8], strides = [1, 1]} : vector<5x64xf32> to vector<5x8xf32>
    %cst_205 = arith.constant dense<0.000000e+00> : vector<8x8xf32>
    %650 = tpu.matmul %648, %649, %cst_205 {dimension_numbers = #tpu.dot_dimension_numbers<[1], [0], [0], [1], [0, 0, 1, 1], [], []>} : vector<8x5xf32>, vector<5x8xf32>, vector<8x8xf32> -> vector<8x8xf32>
    %651 = vector.extract_strided_slice %638 {offsets = [3, 0, 0], sizes = [1, 8, 5], strides = [1, 1, 1]} : vector<4x8x5xf32> to vector<1x8x5xf32>
    %652 = vector.shape_cast %651 : vector<1x8x5xf32> to vector<8x5xf32>
    %653 = vector.extract_strided_slice %609 {offsets = [0, 56], sizes = [5, 8], strides = [1, 1]} : vector<5x64xf32> to vector<5x8xf32>
    %cst_206 = arith.constant dense<0.000000e+00> : vector<8x8xf32>
    %654 = tpu.matmul %652, %653, %cst_206 {dimension_numbers = #tpu.dot_dimension_numbers<[1], [0], [0], [1], [0, 0, 1, 1], [], []>} : vector<8x5xf32>, vector<5x8xf32>, vector<8x8xf32> -> vector<8x8xf32>
    %655 = tpu.concatenate %642, %646, %650, %654 in 1 : vector<8x8xf32>, vector<8x8xf32>, vector<8x8xf32>, vector<8x8xf32> -> vector<8x32xf32>
    %cst_207 = arith.constant dense<0.000000e+00> : vector<8x32xf32>
    %656 = tpu.matmul %655, %610, %cst_207 {dimension_numbers = #tpu.dot_dimension_numbers<[1], [0], [0], [1], [0, 0, 1, 1], [], []>} : vector<8x32xf32>, vector<32x32xf32>, vector<8x32xf32> -> vector<8x32xf32>
    %657 = vector.broadcast %611 : vector<1x32xf32> to vector<8x32xf32>
    %658 = arith.addf %656, %657 : vector<8x32xf32>
    %659 = arith.addf %599, %658 : vector<8x32xf32>
    %c1328 = arith.constant 1328 : index
    %c0_208 = arith.constant 0 : index
    %660 = vector.load %arg3[%c1328, %c0_208] : memref<1512x128xf32, #tpu.memory_space<vmem>>, vector<1x32xf32>
    %c1336 = arith.constant 1336 : index
    %c0_209 = arith.constant 0 : index
    %661 = vector.load %arg3[%c1336, %c0_209] : memref<1512x128xf32, #tpu.memory_space<vmem>>, vector<1x32xf32>
    %cst_210 = arith.constant dense<0.000000e+00> : vector<8xf32>
    %662 = vector.multi_reduction <add>, %659, %cst_210 [1] : vector<8x32xf32> to vector<8xf32>
    %663 = vector.shape_cast %662 : vector<8xf32> to vector<8x1xf32>
    %cst_211 = arith.constant 3.200000e+01 : f32
    %664 = vector.broadcast %cst_211 : f32 to vector<8x1xf32>
    %665 = arith.divf %663, %664 : vector<8x1xf32>
    %666 = vector.broadcast %665 : vector<8x1xf32> to vector<8x32xf32>
    %667 = arith.subf %659, %666 : vector<8x32xf32>
    %668 = arith.mulf %667, %667 : vector<8x32xf32>
    %cst_212 = arith.constant dense<0.000000e+00> : vector<8xf32>
    %669 = vector.multi_reduction <add>, %668, %cst_212 [1] : vector<8x32xf32> to vector<8xf32>
    %670 = vector.shape_cast %669 : vector<8xf32> to vector<8x1xf32>
    %cst_213 = arith.constant 3.200000e+01 : f32
    %671 = vector.broadcast %cst_213 : f32 to vector<8x1xf32>
    %672 = arith.divf %670, %671 : vector<8x1xf32>
    %673 = vector.broadcast %665 : vector<8x1xf32> to vector<8x32xf32>
    %674 = arith.subf %659, %673 : vector<8x32xf32>
    %cst_214 = arith.constant 9.99999974E-6 : f32
    %675 = vector.broadcast %cst_214 : f32 to vector<8x1xf32>
    %676 = arith.addf %672, %675 : vector<8x1xf32>
    %677 = math.rsqrt %676 : vector<8x1xf32>
    %678 = vector.broadcast %677 : vector<8x1xf32> to vector<8x32xf32>
    %679 = arith.mulf %674, %678 : vector<8x32xf32>
    %680 = vector.broadcast %660 : vector<1x32xf32> to vector<8x32xf32>
    %681 = arith.mulf %679, %680 : vector<8x32xf32>
    %682 = vector.broadcast %661 : vector<1x32xf32> to vector<8x32xf32>
    %683 = arith.addf %681, %682 : vector<8x32xf32>
    %c1344 = arith.constant 1344 : index
    %c0_215 = arith.constant 0 : index
    %684 = vector.load %arg3[%c1344, %c0_215] : memref<1512x128xf32, #tpu.memory_space<vmem>>, vector<32x64xf32>
    %cst_216 = arith.constant dense<0.000000e+00> : vector<8x64xf32>
    %685 = tpu.matmul %683, %684, %cst_216 {dimension_numbers = #tpu.dot_dimension_numbers<[1], [0], [0], [1], [0, 0, 1, 1], [], []>} : vector<8x32xf32>, vector<32x64xf32>, vector<8x64xf32> -> vector<8x64xf32>
    %c1376 = arith.constant 1376 : index
    %c0_217 = arith.constant 0 : index
    %686 = vector.load %arg3[%c1376, %c0_217] : memref<1512x128xf32, #tpu.memory_space<vmem>>, vector<1x64xf32>
    %687 = vector.broadcast %686 : vector<1x64xf32> to vector<8x64xf32>
    %688 = arith.addf %685, %687 : vector<8x64xf32>
    %cst_218 = arith.constant 0.000000e+00 : f32
    %689 = vector.broadcast %cst_218 : f32 to vector<8x64xf32>
    %690 = arith.maximumf %688, %689 : vector<8x64xf32>
    %c1384 = arith.constant 1384 : index
    %c0_219 = arith.constant 0 : index
    %691 = vector.load %arg3[%c1384, %c0_219] : memref<1512x128xf32, #tpu.memory_space<vmem>>, vector<64x32xf32>
    %cst_220 = arith.constant dense<0.000000e+00> : vector<8x32xf32>
    %692 = tpu.matmul %690, %691, %cst_220 {dimension_numbers = #tpu.dot_dimension_numbers<[1], [0], [0], [1], [0, 0, 1, 1], [], []>} : vector<8x64xf32>, vector<64x32xf32>, vector<8x32xf32> -> vector<8x32xf32>
    %c1448 = arith.constant 1448 : index
    %c0_221 = arith.constant 0 : index
    %693 = vector.load %arg3[%c1448, %c0_221] : memref<1512x128xf32, #tpu.memory_space<vmem>>, vector<1x32xf32>
    %694 = vector.broadcast %693 : vector<1x32xf32> to vector<8x32xf32>
    %695 = arith.addf %692, %694 : vector<8x32xf32>
    %696 = arith.addf %683, %695 : vector<8x32xf32>
    %c1456 = arith.constant 1456 : index
    %c0_222 = arith.constant 0 : index
    %697 = vector.load %arg3[%c1456, %c0_222] : memref<1512x128xf32, #tpu.memory_space<vmem>>, vector<1x32xf32>
    %c1464 = arith.constant 1464 : index
    %c0_223 = arith.constant 0 : index
    %698 = vector.load %arg3[%c1464, %c0_223] : memref<1512x128xf32, #tpu.memory_space<vmem>>, vector<1x32xf32>
    %cst_224 = arith.constant dense<0.000000e+00> : vector<8xf32>
    %699 = vector.multi_reduction <add>, %696, %cst_224 [1] : vector<8x32xf32> to vector<8xf32>
    %700 = vector.shape_cast %699 : vector<8xf32> to vector<8x1xf32>
    %cst_225 = arith.constant 3.200000e+01 : f32
    %701 = vector.broadcast %cst_225 : f32 to vector<8x1xf32>
    %702 = arith.divf %700, %701 : vector<8x1xf32>
    %703 = vector.broadcast %702 : vector<8x1xf32> to vector<8x32xf32>
    %704 = arith.subf %696, %703 : vector<8x32xf32>
    %705 = arith.mulf %704, %704 : vector<8x32xf32>
    %cst_226 = arith.constant dense<0.000000e+00> : vector<8xf32>
    %706 = vector.multi_reduction <add>, %705, %cst_226 [1] : vector<8x32xf32> to vector<8xf32>
    %707 = vector.shape_cast %706 : vector<8xf32> to vector<8x1xf32>
    %cst_227 = arith.constant 3.200000e+01 : f32
    %708 = vector.broadcast %cst_227 : f32 to vector<8x1xf32>
    %709 = arith.divf %707, %708 : vector<8x1xf32>
    %710 = vector.broadcast %702 : vector<8x1xf32> to vector<8x32xf32>
    %711 = arith.subf %696, %710 : vector<8x32xf32>
    %cst_228 = arith.constant 9.99999974E-6 : f32
    %712 = vector.broadcast %cst_228 : f32 to vector<8x1xf32>
    %713 = arith.addf %709, %712 : vector<8x1xf32>
    %714 = math.rsqrt %713 : vector<8x1xf32>
    %715 = vector.broadcast %714 : vector<8x1xf32> to vector<8x32xf32>
    %716 = arith.mulf %711, %715 : vector<8x32xf32>
    %717 = vector.broadcast %697 : vector<1x32xf32> to vector<8x32xf32>
    %718 = arith.mulf %716, %717 : vector<8x32xf32>
    %719 = vector.broadcast %698 : vector<1x32xf32> to vector<8x32xf32>
    %720 = arith.addf %718, %719 : vector<8x32xf32>
    %c1472 = arith.constant 1472 : index
    %c0_229 = arith.constant 0 : index
    %721 = vector.load %arg3[%c1472, %c0_229] : memref<1512x128xf32, #tpu.memory_space<vmem>>, vector<32x128xf32>
    %cst_230 = arith.constant dense<0.000000e+00> : vector<8x128xf32>
    %722 = tpu.matmul %720, %721, %cst_230 {dimension_numbers = #tpu.dot_dimension_numbers<[1], [0], [0], [1], [0, 0, 1, 1], [], []>} : vector<8x32xf32>, vector<32x128xf32>, vector<8x128xf32> -> vector<8x128xf32>
    %c1504 = arith.constant 1504 : index
    %c0_231 = arith.constant 0 : index
    %723 = vector.load %arg3[%c1504, %c0_231] : memref<1512x128xf32, #tpu.memory_space<vmem>>, vector<1x128xf32>
    %724 = vector.broadcast %723 : vector<1x128xf32> to vector<8x128xf32>
    %725 = arith.addf %722, %724 : vector<8x128xf32>
    %c0_232 = arith.constant 0 : index
    %c0_233 = arith.constant 0 : index
    %726 = vector.load %arg4[%c0_232, %c0_233] : memref<8x128xf32, #tpu.memory_space<vmem>>, vector<8x128xf32>
    tpu.vector_store %arg4[%c0_232, %c0_233], %725 {strides = array<i32>} : memref<8x128xf32, #tpu.memory_space<vmem>>, vector<8x128xf32>,
    return
  }
  func.func @transform_0(%arg0: i32) -> (i32, i32, i32) {
    %c0_i32 = arith.constant 0 : i32
    %c0_i32_0 = arith.constant 0 : i32
    %c0_i32_1 = arith.constant 0 : i32
    return %arg0, %c0_i32, %c0_i32_0 : i32, i32, i32
  }
  func.func @transform_1(%arg0: i32) -> (i32, i32, i32) {
    %c0_i32 = arith.constant 0 : i32
    %c0_i32_0 = arith.constant 0 : i32
    %c0_i32_1 = arith.constant 0 : i32
    return %arg0, %c0_i32, %c0_i32_0 : i32, i32, i32
  }
  func.func @transform_2(%arg0: i32) -> (i32, i32) {
    %c0_i32 = arith.constant 0 : i32
    %c0_i32_0 = arith.constant 0 : i32
    %c0_i32_1 = arith.constant 0 : i32
    return %c0_i32, %c0_i32_0 : i32, i32
  }
  func.func @transform_3(%arg0: i32) -> (i32, i32) {
    %c0_i32 = arith.constant 0 : i32
    %c0_i32_0 = arith.constant 0 : i32
    return %arg0, %c0_i32 : i32, i32
  }
}

</mosaic_0001>

<bundles_post_ra>
// kernel: forward.1
= control target key start
LH: loop header
LB: loop body
LE: loop exit
PB: predicated region body
PF: predicated region fallthrough
CT: control target
= control target key end

     0   :  { %8 = vsyncpa [#allocation3], 0  ;;  %s3527_s12 = smov 0   ;;  %s3959_s0 = inlined_call_operand.vmem [shape: f32[2,5,192], index: 0, kind: input, shape index: {}]   ;;  %s3960_s1 = inlined_call_operand.vmem [shape: s32[2,8,1], index: 1, kind: input, shape index: {}]   ;;  %s3961_s2 = inlined_call_operand.hbm [shape: f32[1512,128], index: 2, kind: input, shape index: {}]   ;;  %s3962_s3 = inlined_call_operand.vmem [shape: f32[16,128], index: 3, kind: output, shape index: {}]  }
   0x1 LB: > { %s129_s15 = sshll.u32 %s3961_s2, 4  ;;  %s3107_s16 = sadd.s32 4294967295, %s3485_s12   ;;  %s3485_s12 = sphi %s3527_s12, %s14_s12   ;;  %s130_s15 = int_to_ptr.hbm [resolvable:$true] %s129_s15 }
   0x2   : > { %p3109_p0 = scmp.ge.s32.totalorder %s3485_s12, 1  ;;  %p118_p1 = scmp.lt.s32.totalorder %s3485_s12, 3 }
   0x3   : > { %p3243_p2 = scmp.eq.s32.totalorder %s3107_s16, 0  ;;  %s3487_s17 = smov [#allocation2]  }
   0x4   : > { %p119_p3 = pnand %p3109_p0, %p118_p1  ;;  %s131_s18 = sshll.u32 %s3487_s17, 4  ;;  %s132_s18 = int_to_ptr.vmem [resolvable:$true] %s131_s18 }
   0x5   : > { %s3488_s19 = smov 128   ;;  %s3489_s20 = smov 8  }
   0x6   : > { %p3239_p4 = pneg %p119_p3  ;;  %162 = sbr.rel (%p119_p3) target bundleno = 9951 (0x26df), region = 32 }
   0x8   : > { %p3240_p5 = pnand %p3243_p2, %p3239_p4 }
   0xa   : > { %3242 = dma.hbm_to_vmem [thread:$0]  (!%p3240_p5), %s130_s15, 24192, %s132_s18, [#allocation3], %s3488_s19, %s3488_s19, %s3489_s20  }
   0xb   : > { %3480 = dma.done.wait (%p3243_p2), [#allocation3], 24192  }
   0xc   : > { %3482 = vsyncadd (%p3243_p2), [#allocation3], 4294943104  ;;  %v220_v0 = vld [vmem:[#allocation2 + $0x78] sm:$0xff]  ;;  %v219_v1 = vld [vmem:[#allocation2 + $0x70] sm:$0xff]  ;;  %p190_p6 = scmp.lt.s32.totalorder %s3107_s16, 1  ;;  %vm231_vm0 = vcmask 523264   ;;  %v275_v26 = vlaneseq }
   0xd   : > { %235 = vmatpush.msra.mxu0 %v220_v0  ;;  %v218_v2 = vld [vmem:[#allocation2 + $0x68] sm:$0xff]  ;;  %v228_v3 = vld [vmem:[#allocation2 + $0xb8] sm:$0xff]  ;;  %v217_v4 = vld [vmem:[#allocation2 + $0x60] sm:$0xff]  ;;  %vm287_vm2 = vcmask 258048   ;;  %v3490_v38 = vmov 32.0   ;;  %vm327_vm7 = vcmask 261120  }
   0xe   : > { %263 = vmatpush.msra.mxu1 %v228_v3  ;;  %v227_v5 = vld [vmem:[#allocation2 + $0xb0] sm:$0xff]  ;;  %s3964_s16 = smov (!%p190_p6, %s3107_s16), 1  ;;  %v226_v6 = vld [vmem:[#allocation2 + $0xa8] sm:$0xff]  ;;  %v216_v7 = vld [vmem:[#allocation2 + $0x58] sm:$0xff]  ;;  %v3546_v28 = vshrl.u32 %v275_v26, 7  ;;  %3321 = vrcp.f32 %v3490_v38  ;;  %s3491_s25 = smov 96  }
   0xf   : > { %236 = vmatpush.msra.mxu0 %v219_v1  ;;  %v215_v8 = vld [vmem:[#allocation2 + $0x50] sm:$0xff]  ;;  %v225_v9 = vld [vmem:[#allocation2 + $0xa0] sm:$0xff]  ;;  %v214_v10 = vld [vmem:[#allocation2 + $0x48] sm:$0xff]  ;;  %s3234_s21 = sshll.u32 %s3964_s16, 4  ;;  %s3492_s26 = smov 120   ;;  %vm359_vm8 = vcmask 64512  }
  0x10   : > { %264 = vmatpush.msra.mxu1 %v227_v5  ;;  %v224_v11 = vld [vmem:[#allocation2 + $0x98] sm:$0xff]  ;;  %v223_v12 = vld [vmem:[#allocation2 + $0x90] sm:$0xff]  ;;  %v213_v13 = vld [vmem:[#allocation2 + $0x40] sm:$0xff]  ;;  %s194_s24 = scalar_lea.vmem %s3959_s0, %s3234_s21  ;;  %vm277_vm1 = vcmp.eq.s32.totalorder %v3546_v28, 0  ;;  %s3493_s27 = smov 88   ;;  %vm468_vm9 = vcmask 36864  }
  0x11   : > { %237 = vmatpush.msra.mxu0 %v218_v2  ;;  %v222_v14 = vld [vmem:[#allocation2 + $0x88] sm:$0xff]  ;;  %v212_v15 = vld [vmem:[#allocation2 + $0x38] sm:$0xff]  ;;  %v221_v16 = vld [vmem:[#allocation2 + $0x80] sm:$0xff]  ;;  %s3494_s28 = smov 112   ;;  %s3495_s29 = smov 80   ;;  %vm519_vm10 = vcmask 1044480  }
  0x12   : > { %265 = vmatpush.msra.mxu1 %v226_v6  ;;  %v211_v17 = vld [vmem:[#allocation2 + $0x30] sm:$0xff]  ;;  %v204_v18 = vld [vmem:[%s194_s24 + $0x8] sm:$0x1f]  ;;  %v209_v20 = vld [vmem:[#allocation2 + $0x20] sm:$0xff]  ;;  %s3496_s30 = smov 104   ;;  %s3497_s4 = smov 72  }
  0x13   : > { %238 = vmatpush.msra.mxu0 %v217_v4  ;;  %v210_v19 = vld [vmem:[#allocation2 + $0x28] sm:$0xff]  ;;  %v208_v21 = vld [vmem:[#allocation2 + $0x18] sm:$0xff]  ;;  %v207_v22 = vld [vmem:[#allocation2 + $0x10] sm:$0xff]  ;;  %s3498_s5 = smov 64   ;;  %s3499_s6 = smov 40   ;;  %vm515_vm11 = vcmask 39936  }
  0x14   : > { %266 = vmatpush.msra.mxu1 %v225_v9  ;;  %v206_v23 = vld [vmem:[#allocation2 + $0x8] sm:$0xff]  ;;  %v205_v24 = vld [vmem:[#allocation2] sm:$0xff]  ;;  %v283_v34 = vld [vmem:[#allocation2 + $0xd0] sm:$0x1f]  ;;  %v3322_v39 = vpop.eup %3321  ;;  %s3500_s7 = smov 56   ;;  %s3501_s8 = smov 48  }
  0x15   : > { %239 = vmatpush.msra.mxu0 %v216_v7  ;;  %v203_v25 = vld [vmem:[%s194_s24] sm:$0x1f]  ;;  %v3275_v32 = vld [vmem:[#allocation2 + $0xc8] ss:$0 sm:$0xff]  ;;  %v292_v40 = vmul.f32 32.0, %v3322_v39  ;;  %vm296_vm3 = vweird.f32 %v3322_v39  ;;  %v323_v51 = vld [vmem:[#allocation2 + $0xf8] sm:$0xff] }
  0x16   : > { %267 = vmatpush.msra.mxu1 %v224_v11  ;;  %v3274_v27 = vld [vmem:[#allocation2 + $0xc0] ss:$0 sm:$0xff]  ;;  %v322_v52 = vld [vmem:[#allocation2 + $0xf0] sm:$0xff]  ;;  %v321_v53 = vld [vmem:[#allocation2 + $0xe8] sm:$0xff]  ;;  %s3502_s9 = smov 24   ;;  %s3503_s10 = smov 8  }
  0x17   : > { %240 = vmatpush.msra.mxu0 %v215_v8  ;;  %v293_v41 = vsub.f32 1.0, %v292_v40  ;;  %v324_v50 = vld [vmem:[#allocation2 + $0x100] sm:$0xff]  ;;  %v3276_v63 = vld [vmem:[#allocation2 + $0xd8] ss:$0 sm:$0xff]  ;;  %v3278_v5 = vld [vmem:[#allocation2 + $0x108] ss:$0 sm:$0xff] }
  0x18   : > { %268 = vmatpush.msra.mxu1 %v223_v12  ;;  %343 = vmatpush.msra.mxu2 %v324_v50  ;;  %v3277_v2 = vld [vmem:[#allocation2 + $0xe0] ss:$0 sm:$0xff]  ;;  %s3504_s11 = smov 16   ;;  %vm636_vm12 = vcmask 130048   ;;  %vm638_vm13 = vcmask 195584   ;;  %s3116_s13 = sshll.u32 %s3964_s16, 3 }
  0x19   : > { %241 = vmatpush.msra.mxu0 %v214_v10  ;;  %v294_v42 = vmul.f32 %v3322_v39, %v293_v41  ;;  %s198_s17 = scalar_lea.vmem %s3960_s1, %s3116_s13  ;;  %s202_s20 = scalar_lea.vmem %s3962_s3, %s3116_s13 }
  0x1a   : > { %269 = vmatpush.msra.mxu1 %v222_v14  ;;  %344 = vmatpush.msra.mxu2 %v323_v51 }
  0x1b   : > { %242 = vmatpush.msra.mxu0 %v213_v13  ;;  %v295_v43 = vadd.f32 %v3322_v39, %v294_v42 }
  0x1c   : > { %270 = vmatpush.msra.mxu1 %v221_v16  ;;  %345 = vmatpush.msra.mxu2 %v322_v52 }
  0x1d   : > { %243 = vmatpush.msra.mxu0 %v212_v15  ;;  %3118 = vmatmul.msk.f32.vlgmr.msra.gmra.mxu1 %vm231_vm0, %v204_v18  ;;  %v3553_v44 = vsel %vm296_vm3, %v3322_v39, %v295_v43 }
  0x1e   : > { %346 = vmatpush.msra.mxu2 %v321_v53 }
  0x1f   : > { %244 = vmatpush.msra.mxu0 %v211_v17 }
  0x21   : > { %245 = vmatpush.msra.mxu0 %v210_v19 }
  0x23   : > { %246 = vmatpush.msra.mxu0 %v209_v20 }
  0x25   : > { %247 = vmatpush.msra.mxu0 %v208_v21 }
  0x27   : > { %248 = vmatpush.msra.mxu0 %v207_v22 }
  0x29   : > { %249 = vmatpush.msra.mxu0 %v206_v23 }
  0x2b   : > { %250 = vmatpush.msra.mxu0 %v205_v24 }
  0x2c   : > { %251 = vmatmul.f32.vlgmr.msra.gmra.mxu0 %v203_v25 }
  0x9a   : > { %v272_v30 = vpop.f32.mrf.mxu1 }
  0xa9   : > { %v252_v29 = vpop.f32.mrf.mxu0 }
  0xaa   : > { %v253_v31 = vadd.f32 %v3274_v27, %v252_v29 }
  0xac   : > { %v273_v33 = vadd.f32 %v272_v30, %v253_v31 }
  0xae   : > { %v282_v35 = vsel %vm277_vm1, %v3275_v32, %v273_v33 }
  0xaf   : > { %v3549_v36 = vadd.f32 %v283_v34, %v282_v35 }
  0xb1   : > { %v288_v37 = vsel %vm287_vm2, %v3549_v36, 0.0 }
  0xb2   : > { %289 = vadd.xlane.f32.xlu0 %v288_v37 }
 0x125   : > { %v290_v45 = vpop.xlane.xlu0 %289 }
 0x126   : > { %v298_v46 = vmul.f32 %v3553_v44, %v290_v45 }
 0x128   : > { %v299_v47 = vsub.f32 %v3549_v36, %v298_v46 }
 0x12a   : > { %v300_v48 = vmul.f32 %v299_v47, %v299_v47 }
 0x12c   : > { %v301_v49 = vsel %vm287_vm2, %v300_v48, 0.0 }
 0x12d   : > { %302 = vadd.xlane.f32.xlu0 %v301_v49 }
 0x1a0   : > { %v303_v54 = vpop.xlane.xlu0 %302 }
 0x1a1   : > { %v304_v55 = vmul.f32 %v303_v54, %v3553_v44 }
 0x1a3   : > { %v305_v56 = vadd.f32 1e-05, %v304_v55 }
 0x1a5   : > { %3323 = vrsqrt.f32 %v305_v56  ;;  %vm312_vm5 = vweird.f32 %v305_v56 }
 0x1ab   : > { %v3324_v57 = vpop.eup %3323 }
 0x1ac   : > { %v307_v58 = vmul.f32 %v3324_v57, %v305_v56  ;;  %vm313_vm4 = vweird.f32 %v3324_v57 }
 0x1ad   : > { %vm314_vm6 = vmor %vm312_vm5, %vm313_vm4 }
 0x1ae   : > { %v308_v59 = vmul.f32 %v3324_v57, %v307_v58 }
 0x1b0   : > { %v309_v60 = vmul.f32 0.5, %v308_v59 }
 0x1b2   : > { %v310_v61 = vsub.f32 1.5, %v309_v60 }
 0x1b4   : > { %v311_v62 = vmul.f32 %v3324_v57, %v310_v61 }
 0x1b6   : > { %v315_v0 = vsel %vm314_vm6, %v3324_v57, %v311_v62 }
 0x1b7   : > { %v316_v1 = vmul.f32 %v315_v0, %v299_v47 }
 0x1b9   : > { %v318_v3 = vmul.f32 %v3276_v63, %v316_v1 }
 0x1bb   : > { %v320_v4 = vadd.f32 %v3277_v2, %v318_v3  ;;  %v354_v3 = vld [vmem:[#allocation2 + $0x128] sm:$0xff] }
 0x1bd   : > { %3119 = vmatmul.msk.f32.vlgmr.msra.gmra.mxu2 %vm327_vm7, %v320_v4  ;;  %v353_v4 = vld [vmem:[#allocation2 + $0x120] sm:$0xff] }
 0x240   : > { %v348_v6 = vpop.f32.mrf.mxu2 }
 0x241   : > { %v3560_v7 = vadd.f32 %v3278_v5, %v348_v6  ;;  %v352_v5 = vld [vmem:[#allocation2 + $0x118] sm:$0xff]  ;;  %v351_v6 = vld [vmem:[#allocation2 + $0x110] sm:$0xff] }
 0x243   : > { %357 = vrot.lane.b32.xlu0 %v3560_v7, %s3491_s25  ;;  %384 = vrot.lane.b32.xlu2 %v3560_v7, %s3492_s26 }
 0x244   : > { %386 = vrot.lane.b32.xlu1 %v3560_v7, %s3493_s27 }
 0x24b   : > { %412 = vrot.lane.b32.xlu2 %v3560_v7, %s3494_s28 }
 0x24c   : > { %414 = vrot.lane.b32.xlu1 %v3560_v7, %s3495_s29 }
 0x253   : > { %440 = vrot.lane.b32.xlu2 %v3560_v7, %s3496_s30 }
 0x254   : > { %442 = vrot.lane.b32.xlu1 %v3560_v7, %s3497_s4 }
 0x29d   : > { %v385_v8 = vpop.permute.xlu2 %384 }
 0x2a5   : > { %v413_v12 = vpop.permute.xlu2 %412 }
 0x2ad   : > { %v441_v14 = vpop.permute.xlu2 %440 }
 0x2b5   : > { %v358_v9 = vpop.permute.xlu0 %357 }
 0x2b6   : > { %v387_v10 = vpop.permute.xlu1 %386  ;;  %3120 = vmatpush.xpose.msk.msrb.mxu1 %vm359_vm8, %v358_v9 }
 0x2b7   : > { %3122 = vmatpush.xpose.msk.msra.mxu3 %vm359_vm8, %v387_v10 }
 0x2b9   : > { %3121 = vmatmul.msk.f32.vlgmr.msrb.gmra.mxu1 %vm359_vm8, %v3560_v7 }
 0x2ba   : > { %3123 = vmatmul.msk.f32.vlgmr.msra.gmra.mxu3 %vm359_vm8, %v385_v8 }
 0x2be   : > { %v415_v11 = vpop.permute.xlu1 %414 }
 0x2bf   : > { %3124 = vmatpush.xpose.msk.msrb.mxu2 %vm359_vm8, %v415_v11 }
 0x2c2   : > { %3125 = vmatmul.msk.f32.vlgmr.msrb.gmra.mxu2 %vm359_vm8, %v413_v12 }
 0x2c6   : > { %v443_v13 = vpop.permute.xlu1 %442 }
 0x2c7   : > { %3126 = vmatpush.xpose.msk.msrb.mxu3 %vm359_vm8, %v443_v13  ;;  %v3279_v13 = vld [vmem:[#allocation2 + $0x130] ss:$0 sm:$0xff] }
 0x2ca   : > { %3127 = vmatmul.msk.f32.vlgmr.msrb.gmra.mxu3 %vm359_vm8, %v441_v14 }
 0x336   : > { %v381_v15 = vpop.f32.mrf.mxu1 }
 0x337   : > { %v469_v16 = vsel %vm468_vm9, %v381_v15, -inf }
 0x338   : > { %470 = vmax.xlane.f32.xlu1 %v469_v16 }
 0x33d   : > { %v409_v17 = vpop.f32.mrf.mxu3 }
 0x33e   : > { %v472_v18 = vsel %vm468_vm9, %v409_v17, -inf }
 0x33f   : > { %473 = vmax.xlane.f32.xlu2 %v472_v18 }
 0x345   : > { %v437_v19 = vpop.f32.mrf.mxu2 }
 0x346   : > { %v475_v20 = vsel %vm468_vm9, %v437_v19, -inf }
 0x347   : > { %476 = vmax.xlane.f32.xlu0 %v475_v20 }
 0x34d   : > { %v465_v21 = vpop.f32.mrf.mxu3 }
 0x34e   : > { %v478_v22 = vsel %vm468_vm9, %v465_v21, -inf }
 0x34f   : > { %479 = vmax.xlane.f32.xlu2 %v478_v22 }
 0x367   : > { %513 = vrot.lane.b32.xlu2 %v3560_v7, %s3498_s5 }
 0x3ab   : > { %v471_v23 = vpop.xlane.xlu1 %470 }
 0x3ac   : > { %v481_v24 = vsub.f32 %v381_v15, %v471_v23  ;;  %v696_v23 = vld [vmem:[#allocation2 + $0x160] sm:$0xff] }
 0x3ae   : > { %v485_v25 = vmul.f32 1.442695, %v481_v24  ;;  %v695_v24 = vld [vmem:[#allocation2 + $0x158] sm:$0xff] }
 0x3b0   : > { %3325 = vpow2.f32 %v485_v25  ;;  %v694_v25 = vld [vmem:[#allocation2 + $0x150] sm:$0xff] }
 0x3b2   : > { %v474_v27 = vpop.xlane.xlu2 %473 }
 0x3b3   : > { %v482_v29 = vsub.f32 %v409_v17, %v474_v27 }
 0x3b5   : > { %v487_v30 = vmul.f32 1.442695, %v482_v29 }
 0x3b6   : > { %v3326_v31 = vpop.eup %3325 }
 0x3b7   : > { %3327 = vpow2.f32 %v487_v30  ;;  %v493_v32 = vsel %vm468_vm9, %v3326_v31, 0.0 }
 0x3b8   : > { %494 = vadd.xlane.f32.xlu1 %v493_v32 }
 0x3ba   : > { %v477_v33 = vpop.xlane.xlu0 %476 }
 0x3bb   : > { %v483_v34 = vsub.f32 %v437_v19, %v477_v33 }
 0x3bd   : > { %v3328_v35 = vpop.eup %3327  ;;  %v489_v37 = vmul.f32 1.442695, %v483_v34 }
 0x3be   : > { %v496_v38 = vsel %vm468_vm9, %v3328_v35, 0.0 }
 0x3bf   : > { %3329 = vpow2.f32 %v489_v37  ;;  %497 = vadd.xlane.f32.xlu2 %v496_v38  ;;  %v3280_v38 = vld [vmem:[#allocation2 + $0x138] ss:$0 sm:$0xff] }
 0x3c2   : > { %v480_v39 = vpop.xlane.xlu2 %479 }
 0x3c3   : > { %v484_v40 = vsub.f32 %v465_v21, %v480_v39 }
 0x3c5   : > { %v3330_v41 = vpop.eup %3329  ;;  %v491_v42 = vmul.f32 1.442695, %v484_v40 }
 0x3c6   : > { %v499_v43 = vsel %vm468_vm9, %v3330_v41, 0.0 }
 0x3c7   : > { %3331 = vpow2.f32 %v491_v42  ;;  %500 = vadd.xlane.f32.xlu1 %v499_v43 }
 0x3ca   : > { %v514_v45 = vpop.permute.xlu2 %513 }
 0x3cb   : > { %3128 = vmatpush.msk.msra.mxu1 %vm519_vm10, %v514_v45  ;;  %v738_v45 = vld [vmem:[#allocation2 + $0x1a8] sm:$0xff] }
 0x3cc   : > { %752 = vmatpush.msrb.mxu0 %v738_v45 }
 0x3cd   : > { %v3332_v46 = vpop.eup %3331 }
 0x3ce   : > { %v502_v47 = vsel %vm468_vm9, %v3332_v46, 0.0 }
 0x3cf   : > { %503 = vadd.xlane.f32.xlu0 %v502_v47  ;;  %v736_v47 = vld [vmem:[#allocation2 + $0x198] sm:$0xff] }
 0x3d7   : > { %596 = vrot.lane.b32.xlu2 %v3560_v7, %s3499_s6 }
 0x3e0   : > { %542 = vrot.lane.b32.xlu1 %v3560_v7, %s3500_s7 }
 0x3e3   : > { %569 = vrot.lane.b32.xlu0 %v3560_v7, %s3501_s8 }
 0x42b   : > { %v495_v48 = vpop.xlane.xlu1 %494 }
 0x42c   : > { %3333 = vrcp.f32 %v495_v48  ;;  %v735_v48 = vld [vmem:[#allocation2 + $0x190] sm:$0xff] }
 0x432   : > { %v3334_v49 = vpop.eup %3333  ;;  %v498_v50 = vpop.xlane.xlu2 %497 }
 0x433   : > { %v509_v51 = vmul.f32 %v3334_v49, %v3326_v31  ;;  %v734_v49 = vld [vmem:[#allocation2 + $0x188] sm:$0xff] }
 0x435   : > { %3129 = vmatmul.msk.f32.vlgmr.msra.gmra.mxu1 %vm515_vm11, %v509_v51  ;;  %v732_v51 = vld [vmem:[#allocation2 + $0x178] sm:$0xff] }
 0x43a   : > { %v597_v52 = vpop.permute.xlu2 %596  ;;  %v501_v55 = vpop.xlane.xlu1 %500 }
 0x43b   : > { %3134 = vmatpush.msk.msrb.mxu1 %vm519_vm10, %v597_v52  ;;  %v731_v52 = vld [vmem:[#allocation2 + $0x170] sm:$0xff] }
 0x442   : > { %v504_v53 = vpop.xlane.xlu0 %503 }
 0x443   : > { %3335 = vrcp.f32 %v504_v53  ;;  %v3282_v53 = vld [vmem:[#allocation2 + $0x168] ss:$0 sm:$0xff] }
 0x444   : > { %3337 = vrcp.f32 %v498_v50  ;;  %v733_v50 = vld [vmem:[#allocation2 + $0x180] sm:$0xff] }
 0x445   : > { %3339 = vrcp.f32 %v501_v55 }
 0x449   : > { %v3336_v54 = vpop.eup %3335 }
 0x44a   : > { %v512_v56 = vmul.f32 %v3336_v54, %v3332_v46  ;;  %v3338_v57 = vpop.eup %3337  ;;  %v737_v46 = vld [vmem:[#allocation2 + $0x1a0] sm:$0xff] }
 0x44b   : > { %v3340_v58 = vpop.eup %3339  ;;  %v510_v59 = vmul.f32 %v3338_v57, %v3328_v35  ;;  %753 = vmatpush.msrb.mxu0 %v737_v46 }
 0x44c   : > { %3135 = vmatmul.msk.f32.vlgmr.msrb.gmra.mxu1 %vm515_vm11, %v512_v56  ;;  %v511_v61 = vmul.f32 %v3340_v58, %v3330_v41  ;;  %v3281_v41 = vld [vmem:[#allocation2 + $0x140] ss:$0 sm:$0xff] }
 0x44d   : > { %754 = vmatpush.msrb.mxu0 %v736_v47 }
 0x44f   : > { %755 = vmatpush.msrb.mxu0 %v735_v48 }
 0x451   : > { %756 = vmatpush.msrb.mxu0 %v734_v49 }
 0x452   : > { %v543_v60 = vpop.permute.xlu1 %542 }
 0x453   : > { %3130 = vmatpush.msk.msra.mxu2 %vm519_vm10, %v543_v60  ;;  %757 = vmatpush.msrb.mxu0 %v733_v50 }
 0x454   : > { %3131 = vmatmul.msk.f32.vlgmr.msra.gmra.mxu2 %vm515_vm11, %v510_v59 }
 0x455   : > { %v570_v62 = vpop.permute.xlu0 %569  ;;  %656 = vmatpush.msrb.mxu2 %v354_v3  ;;  %758 = vmatpush.msrb.mxu0 %v732_v51 }
 0x456   : > { %3132 = vmatpush.msk.msra.mxu3 %vm519_vm10, %v570_v62 }
 0x457   : > { %3133 = vmatmul.msk.f32.vlgmr.msra.gmra.mxu3 %vm515_vm11, %v511_v61  ;;  %657 = vmatpush.msrb.mxu2 %v353_v4 }
 0x458   : > { %714 = vmatpush.msrb.mxu3 %v696_v23  ;;  %759 = vmatpush.msrb.mxu0 %v731_v52 }
 0x459   : > { %658 = vmatpush.msrb.mxu2 %v352_v5 }
 0x45a   : > { %715 = vmatpush.msrb.mxu3 %v695_v24  ;;  %v3284_v24 = vld [vmem:[#allocation2 + $0x1b8] ss:$0 sm:$0xff] }
 0x45b   : > { %659 = vmatpush.msrb.mxu2 %v351_v6 }
 0x45c   : > { %716 = vmatpush.msrb.mxu3 %v694_v25 }
 0x4b2   : > { %v539_v63 = vpop.f32.mrf.mxu1 }
 0x4c9   : > { %v620_v0 = vpop.f32.mrf.mxu1 }
 0x4ca   : > { %632 = vrot.lane.b32.xlu2 %v620_v0, %s3502_s9 }
 0x4d7   : > { %v566_v1 = vpop.f32.mrf.mxu2 }
 0x4d8   : > { %624 = vrot.lane.b32.xlu0 %v566_v1, %s3503_s10  ;;  %v3283_v1 = vld [vmem:[#allocation2 + $0x1b0] ss:$0 sm:$0xff] }
 0x4da   : > { %v593_v2 = vpop.f32.mrf.mxu3 }
 0x4db   : > { %628 = vrot.lane.b32.xlu1 %v593_v2, %s3504_s11 }
 0x524   : > { %v633_v10 = vpop.permute.xlu2 %632 }
 0x54a   : > { %v625_v7 = vpop.permute.xlu0 %624 }
 0x54b   : > { %v635_v8 = vsel %vm359_vm8, %v539_v63, %v625_v7 }
 0x54d   : > { %v629_v9 = vpop.permute.xlu1 %628 }
 0x54e   : > { %v637_v11 = vsel %vm636_vm12, %v635_v8, %v629_v9 }
 0x54f   : > { %v639_v12 = vsel %vm638_vm13, %v637_v11, %v633_v10  ;;  %v796_v11 = vld [vmem:[#allocation2 + $0x1e0] sm:$0xff] }
 0x550   : > { %3136 = vmatmul.msk.f32.vlgmr.msrb.gmra.mxu2 %vm327_vm7, %v639_v12  ;;  %814 = vmatpush.msra.mxu1 %v796_v11  ;;  %v795_v12 = vld [vmem:[#allocation2 + $0x1d8] sm:$0xff] }
 0x552   : > { %815 = vmatpush.msra.mxu1 %v795_v12 }
 0x5d3   : > { %v661_v14 = vpop.f32.mrf.mxu2 }
 0x5d4   : > { %v662_v15 = vadd.f32 %v3279_v13, %v661_v14  ;;  %v794_v13 = vld [vmem:[#allocation2 + $0x1d0] sm:$0xff]  ;;  %v793_v14 = vld [vmem:[#allocation2 + $0x1c8] sm:$0xff] }
 0x5d5   : > { %816 = vmatpush.msra.mxu1 %v794_v13 }
 0x5d6   : > { %v3617_v16 = vadd.f32 %v662_v15, %v3549_v36  ;;  %v693_v36 = vld [vmem:[#allocation2 + $0x148] sm:$0xff] }
 0x5d7   : > { %717 = vmatpush.msrb.mxu3 %v693_v36  ;;  %817 = vmatpush.msra.mxu1 %v793_v14 }
 0x5d8   : > { %v667_v17 = vsel %vm287_vm2, %v3617_v16, 0.0 }
 0x5d9   : > { %668 = vadd.xlane.f32.xlu0 %v667_v17 }
 0x64c   : > { %v669_v18 = vpop.xlane.xlu0 %668 }
 0x64d   : > { %v670_v19 = vmul.f32 %v669_v18, %v3553_v44 }
 0x64f   : > { %v671_v20 = vsub.f32 %v3617_v16, %v670_v19 }
 0x651   : > { %v672_v21 = vmul.f32 %v671_v20, %v671_v20 }
 0x653   : > { %v673_v22 = vsel %vm287_vm2, %v672_v21, 0.0 }
 0x654   : > { %674 = vadd.xlane.f32.xlu1 %v673_v22 }
 0x6c7   : > { %v675_v27 = vpop.xlane.xlu1 %674 }
 0x6c8   : > { %v676_v29 = vmul.f32 %v675_v27, %v3553_v44  ;;  %v3285_v27 = vld [vmem:[#allocation2 + $0x1c0] ss:$0 sm:$0xff] }
 0x6ca   : > { %v677_v30 = vadd.f32 1e-05, %v676_v29 }
 0x6cc   : > { %3341 = vrsqrt.f32 %v677_v30  ;;  %vm684_vm15 = vweird.f32 %v677_v30 }
 0x6d2   : > { %v3342_v31 = vpop.eup %3341 }
 0x6d3   : > { %v679_v32 = vmul.f32 %v3342_v31, %v677_v30  ;;  %vm685_vm14 = vweird.f32 %v3342_v31 }
 0x6d4   : > { %vm686_vm1 = vmor %vm684_vm15, %vm685_vm14 }
 0x6d5   : > { %v680_v33 = vmul.f32 %v3342_v31, %v679_v32 }
 0x6d7   : > { %v681_v34 = vmul.f32 0.5, %v680_v33 }
 0x6d9   : > { %v682_v35 = vsub.f32 1.5, %v681_v34 }
 0x6db   : > { %v683_v37 = vmul.f32 %v3342_v31, %v682_v35 }
 0x6dd   : > { %v687_v39 = vsel %vm686_vm1, %v3342_v31, %v683_v37  ;;  %v3286_v31 = vld [vmem:[#allocation2 + $0x1e8] ss:$0 sm:$0xff] }
 0x6de   : > { %v688_v40 = vmul.f32 %v687_v39, %v671_v20 }
 0x6e0   : > { %v690_v42 = vmul.f32 %v3280_v38, %v688_v40 }
 0x6e2   : > { %v692_v43 = vadd.f32 %v3281_v41, %v690_v42 }
 0x6e4   : > { %3137 = vmatmul.msk.f32.vlgmr.msrb.gmra.mxu3 %vm327_vm7, %v692_v43 }
 0x767   : > { %v719_v54 = vpop.f32.mrf.mxu3 }
 0x768   : > { %v720_v55 = vadd.f32 %v3282_v53, %v719_v54 }
 0x76a   : > { %v722_v56 = vmul.f32 %v720_v55, %v720_v55 }
 0x76c   : > { %v723_v57 = vmul.f32 %v722_v56, %v720_v55 }
 0x76e   : > { %v724_v58 = vmul.f32 0.044715, %v723_v57 }
 0x770   : > { %v725_v59 = vadd.f32 %v724_v58, %v720_v55 }
 0x772   : > { %v726_v60 = vmul.f32 0.7978846, %v725_v59 }
 0x774   : > { %3343 = vtanh.f32 %v726_v60 }
 0x77a   : > { %v3344_v61 = vpop.eup %3343 }
 0x77b   : > { %v728_v62 = vadd.f32 1.0, %v3344_v61 }
 0x77d   : > { %v729_v63 = vmul.f32 0.5, %v728_v62 }
 0x77f   : > { %v730_v0 = vmul.f32 %v729_v63, %v720_v55 }
 0x781   : > { %3138 = vmatmul.msk.f32.vlgmr.msrb.gmra.mxu0 %vm231_vm0, %v730_v0 }
 0x7fe   : > { %v761_v2 = vpop.f32.mrf.mxu0 }
 0x7ff   : > { %v762_v3 = vadd.f32 %v3283_v1, %v761_v2 }
 0x801   : > { %v3628_v4 = vadd.f32 %v762_v3, %v3617_v16 }
 0x803   : > { %v767_v5 = vsel %vm287_vm2, %v3628_v4, 0.0 }
 0x804   : > { %768 = vadd.xlane.f32.xlu2 %v767_v5 }
 0x877   : > { %v769_v6 = vpop.xlane.xlu2 %768 }
 0x878   : > { %v770_v7 = vmul.f32 %v769_v6, %v3553_v44 }
 0x87a   : > { %v771_v8 = vsub.f32 %v3628_v4, %v770_v7 }
 0x87c   : > { %v772_v9 = vmul.f32 %v771_v8, %v771_v8 }
 0x87e   : > { %v773_v10 = vsel %vm287_vm2, %v772_v9, 0.0 }
 0x87f   : > { %774 = vadd.xlane.f32.xlu0 %v773_v10 }
 0x8f2   : > { %v775_v15 = vpop.xlane.xlu0 %774 }
 0x8f3   : > { %v776_v16 = vmul.f32 %v775_v15, %v3553_v44 }
 0x8f5   : > { %v777_v17 = vadd.f32 1e-05, %v776_v16 }
 0x8f7   : > { %3345 = vrsqrt.f32 %v777_v17  ;;  %vm784_vm4 = vweird.f32 %v777_v17 }
 0x8fd   : > { %v3346_v18 = vpop.eup %3345 }
 0x8fe   : > { %v779_v19 = vmul.f32 %v3346_v18, %v777_v17  ;;  %vm785_vm3 = vweird.f32 %v3346_v18 }
 0x8ff   : > { %vm786_vm5 = vmor %vm784_vm4, %vm785_vm3 }
 0x900   : > { %v780_v20 = vmul.f32 %v3346_v18, %v779_v19 }
 0x902   : > { %v781_v21 = vmul.f32 0.5, %v780_v20 }
 0x904   : > { %v782_v22 = vsub.f32 1.5, %v781_v21 }
 0x906   : > { %v783_v23 = vmul.f32 %v3346_v18, %v782_v22 }
 0x908   : > { %v787_v25 = vsel %vm786_vm5, %v3346_v18, %v783_v23 }
 0x909   : > { %v788_v36 = vmul.f32 %v787_v25, %v771_v8 }
 0x90b   : > { %v790_v29 = vmul.f32 %v3284_v24, %v788_v36  ;;  %v3505_v24 = vmov 0   ;;  %v1258_v36 = vld [vmem:[%s198_s17] sm:$0xff] }
 0x90c   : > { %3273 = vset.pattern.permute.xlu0 %v3505_v24 }
 0x90d   : > { %v792_v30 = vadd.f32 %v3285_v27, %v790_v29 }
 0x90f   : > { %3139 = vmatmul.msk.f32.vlgmr.msra.gmra.mxu1 %vm327_vm7, %v792_v30  ;;  %v1274_v30 = vld [vmem:[#allocation2 + $0x2e0] sm:$0xff] }
 0x98c   : > { %v819_v32 = vpop.f32.mrf.mxu1 }
 0x98d   : > { %v820_v33 = vadd.f32 %v3286_v31, %v819_v32  ;;  %v1273_v31 = vld [vmem:[#allocation2 + $0x2d8] sm:$0xff]  ;;  %v1272_v32 = vld [vmem:[#allocation2 + $0x2d0] sm:$0xff] }
 0x98f   : > { %910 = vrot.lane.b32.xlu0 %v820_v33, %s3496_s30  ;;  %912 = vrot.lane.b32.xlu2 %v820_v33, %s3497_s4 }
 0x990   : > { %828 = vrot.lane.b32.xlu1 %v820_v33, %s3491_s25 }
 0x997   : > { %854 = vrot.lane.b32.xlu0 %v820_v33, %s3492_s26  ;;  %884 = vrot.lane.b32.xlu2 %v820_v33, %s3495_s29 }
 0x998   : > { %856 = vrot.lane.b32.xlu1 %v820_v33, %s3493_s27 }
 0x9a0   : > { %882 = vrot.lane.b32.xlu1 %v820_v33, %s3494_s28 }
 0x9e9   : > { %v913_v34 = vpop.permute.xlu2 %912 }
 0x9f1   : > { %v885_v35 = vpop.permute.xlu2 %884 }
 0x9f2   : > { %3144 = vmatpush.xpose.msk.msrb.mxu1 %vm359_vm8, %v885_v35  ;;  %v1269_v35 = vld [vmem:[#allocation2 + $0x2b8] sm:$0xff] }
 0xa01   : > { %v911_v38 = vpop.permute.xlu0 %910 }
 0xa02   : > { %v829_v37 = vpop.permute.xlu1 %828 }
 0xa03   : > { %3140 = vmatpush.xpose.msk.msra.mxu2 %vm359_vm8, %v829_v37  ;;  %v1268_v37 = vld [vmem:[#allocation2 + $0x2b0] sm:$0xff] }
 0xa06   : > { %3141 = vmatmul.msk.f32.vlgmr.msra.gmra.mxu2 %vm359_vm8, %v820_v33 }
 0xa07   : > { %3146 = vmatpush.xpose.msk.msrb.mxu2 %vm359_vm8, %v913_v34  ;;  %v1270_v34 = vld [vmem:[#allocation2 + $0x2c0] sm:$0xff] }
 0xa09   : > { %v855_v40 = vpop.permute.xlu0 %854 }
 0xa0a   : > { %v857_v39 = vpop.permute.xlu1 %856 }
 0xa0b   : > { %3142 = vmatpush.xpose.msk.msra.mxu3 %vm359_vm8, %v857_v39  ;;  %v825_v39 = vld [vmem:[#allocation2 + $0x208] sm:$0xff] }
 0xa0e   : > { %3143 = vmatmul.msk.f32.vlgmr.msra.gmra.mxu3 %vm359_vm8, %v855_v40  ;;  %3147 = vmatmul.msk.f32.vlgmr.msrb.gmra.mxu2 %vm359_vm8, %v911_v38  ;;  %v1260_v38 = vand.u32 127, %v275_v26  ;;  %v1267_v40 = vld [vmem:[#allocation2 + $0x2a8] sm:$0xff] }
 0xa10   : > { %vm1301_vm6 = vcmp.gt.s32.totalorder %v1260_v38, %v3546_v28 }
 0xa12   : > { %v883_v41 = vpop.permute.xlu1 %882 }
 0xa13   : > { %3145 = vmatmul.msk.f32.vlgmr.msrb.gmra.mxu1 %vm359_vm8, %v883_v41  ;;  %v824_v41 = vld [vmem:[#allocation2 + $0x200] sm:$0xff] }
 0xa89   : > { %v851_v42 = vpop.f32.mrf.mxu2 }
 0xa8a   : > { %v938_v50 = vsel %vm468_vm9, %v851_v42, -inf }
 0xa90   : > { %v907_v43 = vpop.f32.mrf.mxu1 }
 0xa91   : > { %v879_v45 = vpop.f32.mrf.mxu3  ;;  %v935_v46 = vpop.f32.mrf.mxu2  ;;  %v944_v47 = vsel %vm468_vm9, %v907_v43, -inf }
 0xa92   : > { %945 = vmax.xlane.f32.xlu1 %v944_v47  ;;  %v947_v48 = vsel %vm468_vm9, %v935_v46, -inf  ;;  %v941_v49 = vsel %vm468_vm9, %v879_v45, -inf  ;;  %v1306_v47 = vld [vmem:[#allocation2 + $0x308] sm:$0xff] }
 0xa93   : > { %948 = vmax.xlane.f32.xlu0 %v947_v48  ;;  %942 = vmax.xlane.f32.xlu2 %v941_v49 }
 0xa9b   : > { %939 = vmax.xlane.f32.xlu0 %v938_v50 }
 0xb05   : > { %v946_v51 = vpop.xlane.xlu1 %945 }
 0xb06   : > { %v952_v52 = vsub.f32 %v907_v43, %v946_v51  ;;  %v949_v53 = vpop.xlane.xlu0 %948  ;;  %v943_v54 = vpop.xlane.xlu2 %942 }
 0xb07   : > { %v953_v55 = vsub.f32 %v935_v46, %v949_v53  ;;  %v951_v56 = vsub.f32 %v879_v45, %v943_v54  ;;  %v823_v45 = vld [vmem:[#allocation2 + $0x1f8] sm:$0xff]  ;;  %v822_v46 = vld [vmem:[#allocation2 + $0x1f0] sm:$0xff] }
 0xb08   : > { %v958_v57 = vmul.f32 1.442695, %v952_v52 }
 0xb09   : > { %v960_v58 = vmul.f32 1.442695, %v953_v55  ;;  %v956_v59 = vmul.f32 1.442695, %v951_v56  ;;  %v1305_v55 = vld [vmem:[#allocation2 + $0x300] sm:$0xff]  ;;  %v1304_v56 = vld [vmem:[#allocation2 + $0x2f8] sm:$0xff] }
 0xb0a   : > { %3347 = vpow2.f32 %v958_v57  ;;  %v1303_v57 = vld [vmem:[#allocation2 + $0x2f0] sm:$0xff] }
 0xb0b   : > { %3349 = vpow2.f32 %v960_v58 }
 0xb0c   : > { %3351 = vpow2.f32 %v956_v59  ;;  %v1299_v59 = vld [vmem:[#allocation2 + $0x2e8] sm:$0xff] }
 0xb0e   : > { %v940_v2 = vpop.xlane.xlu0 %939 }
 0xb0f   : > { %v950_v3 = vsub.f32 %v851_v42, %v940_v2  ;;  %v3506_v42 = vmov 0.0  }
 0xb10   : > { %v3348_v60 = vpop.eup %3347  ;;  %v3683_v43 = vsel %vm1301_vm6, -1e+30, %v3506_v42 }
 0xb11   : > { %v3350_v61 = vpop.eup %3349  ;;  %v968_v62 = vsel %vm468_vm9, %v3348_v60, 0.0  ;;  %v954_v5 = vmul.f32 1.442695, %v950_v3 }
 0xb12   : > { %v3352_v63 = vpop.eup %3351  ;;  %969 = vadd.xlane.f32.xlu0 %v968_v62  ;;  %v971_v0 = vsel %vm468_vm9, %v3350_v61, 0.0  ;;  %v3287_v62 = vld [vmem:[#allocation2 + $0x210] ss:$0 sm:$0xff] }
 0xb13   : > { %972 = vadd.xlane.f32.xlu2 %v971_v0  ;;  %v965_v1 = vsel %vm468_vm9, %v3352_v63, 0.0  ;;  %3353 = vpow2.f32 %v954_v5 }
 0xb14   : > { %966 = vadd.xlane.f32.xlu1 %v965_v1 }
 0xb19   : > { %v3354_v6 = vpop.eup %3353 }
 0xb1a   : > { %v962_v7 = vsel %vm468_vm9, %v3354_v6, 0.0 }
 0xb26   : > { %1036 = vrot.lane.b32.xlu0 %v820_v33, %s3501_s8 }
 0xb2b   : > { %1063 = vrot.lane.b32.xlu2 %v820_v33, %s3499_s6 }
 0xb2d   : > { %1009 = vrot.lane.b32.xlu1 %v820_v33, %s3500_s7 }
 0xb2e   : > { %982 = vrot.lane.b32.xlu0 %v820_v33, %s3498_s5  ;;  %v1271_v33 = vld [vmem:[#allocation2 + $0x2c8] sm:$0xff] }
 0xb54   : > { %963 = vadd.xlane.f32.xlu2 %v962_v7 }
 0xb85   : > { %v970_v9 = vpop.xlane.xlu0 %969 }
 0xb86   : > { %v973_v8 = vpop.xlane.xlu2 %972 }
 0xb87   : > { %3355 = vrcp.f32 %v973_v8  ;;  %v967_v13 = vpop.xlane.xlu1 %966  ;;  %v3288_v8 = vld [vmem:[#allocation2 + $0x310] ss:$0 sm:$0xff] }
 0xb88   : > { %3357 = vrcp.f32 %v970_v9 }
 0xb89   : > { %3359 = vrcp.f32 %v967_v13  ;;  %v1160_v13 = vld [vmem:[#allocation2 + $0x238] sm:$0xff] }
 0xb8d   : > { %v3356_v10 = vpop.eup %3355 }
 0xb8e   : > { %v981_v11 = vmul.f32 %v3356_v10, %v3350_v61  ;;  %v1064_v12 = vpop.permute.xlu2 %1063  ;;  %v3358_v14 = vpop.eup %3357 }
 0xb8f   : > { %3154 = vmatpush.msk.msra.mxu2 %vm519_vm10, %v1064_v12  ;;  %v980_v15 = vmul.f32 %v3358_v14, %v3348_v60  ;;  %v3360_v17 = vpop.eup %3359  ;;  %v1161_v12 = vld [vmem:[#allocation2 + $0x240] sm:$0xff]  ;;  %v1159_v14 = vld [vmem:[#allocation2 + $0x230] sm:$0xff] }
 0xb90   : > { %3155 = vmatmul.msk.f32.vlgmr.msra.gmra.mxu2 %vm515_vm11, %v981_v11  ;;  %v979_v18 = vmul.f32 %v3360_v17, %v3352_v63 }
 0xb91   : > { %1286 = vmatpush.msrb.mxu2 %v1274_v30 }
 0xb93   : > { %1287 = vmatpush.msrb.mxu2 %v1273_v31  ;;  %v3290_v31 = vld [vmem:[#allocation2 + $0x220] ss:$0 sm:$0xff] }
 0xb95   : > { %1288 = vmatpush.msrb.mxu2 %v1272_v32 }
 0xb97   : > { %1289 = vmatpush.msrb.mxu2 %v1271_v33 }
 0xb98   : > { %v1037_v16 = vpop.permute.xlu0 %1036 }
 0xb99   : > { %3152 = vmatpush.msk.msra.mxu1 %vm519_vm10, %v1037_v16  ;;  %1290 = vmatpush.msrb.mxu2 %v1270_v34 }
 0xb9a   : > { %3153 = vmatmul.msk.f32.vlgmr.msra.gmra.mxu1 %vm515_vm11, %v980_v15  ;;  %v1158_v15 = vld [vmem:[#allocation2 + $0x228] sm:$0xff] }
 0xb9b   : > { %1291 = vmatpush.msrb.mxu2 %v1269_v35 }
 0xb9d   : > { %1292 = vmatpush.msrb.mxu2 %v1268_v37  ;;  %v1203_v37 = vld [vmem:[#allocation2 + $0x288] sm:$0xff] }
 0xb9e   : > { %1217 = vmatpush.msrb.mxu1 %v1203_v37 }
 0xb9f   : > { %v1010_v19 = vpop.permute.xlu1 %1009  ;;  %1293 = vmatpush.msrb.mxu2 %v1267_v40 }
 0xba0   : > { %3150 = vmatpush.msk.msra.mxu0 %vm519_vm10, %v1010_v19  ;;  %v983_v20 = vpop.permute.xlu0 %982 }
 0xba1   : > { %3151 = vmatmul.msk.f32.vlgmr.msra.gmra.mxu0 %vm515_vm11, %v979_v18  ;;  %3148 = vmatpush.msk.msrb.mxu3 %vm519_vm10, %v983_v20 }
 0xba2   : > { %1179 = vmatpush.msrb.mxu0 %v1161_v12 }
 0xba3   : > { %1121 = vmatpush.msra.mxu3 %v825_v39 }
 0xba4   : > { %1180 = vmatpush.msrb.mxu0 %v1160_v13 }
 0xba5   : > { %1122 = vmatpush.msra.mxu3 %v824_v41  ;;  %v1201_v41 = vld [vmem:[#allocation2 + $0x278] sm:$0xff] }
 0xba6   : > { %1181 = vmatpush.msrb.mxu0 %v1159_v14 }
 0xba7   : > { %1123 = vmatpush.msra.mxu3 %v823_v45  ;;  %v1200_v45 = vld [vmem:[#allocation2 + $0x270] sm:$0xff] }
 0xba8   : > { %1182 = vmatpush.msrb.mxu0 %v1158_v15 }
 0xba9   : > { %1124 = vmatpush.msra.mxu3 %v822_v46  ;;  %v1199_v46 = vld [vmem:[#allocation2 + $0x268] sm:$0xff] }
 0xbc7   : > { %v964_v21 = vpop.xlane.xlu2 %963 }
 0xbc8   : > { %3361 = vrcp.f32 %v964_v21 }
 0xbce   : > { %v3362_v22 = vpop.eup %3361 }
 0xbcf   : > { %v978_v23 = vmul.f32 %v3362_v22, %v3354_v6 }
 0xbd1   : > { %3149 = vmatmul.msk.f32.vlgmr.msrb.gmra.mxu3 %vm515_vm11, %v978_v23 }
 0xbd2   : > { %1324 = vmatpush.msrb.mxu3 %v1306_v47  ;;  %v1198_v47 = vld [vmem:[#allocation2 + $0x260] sm:$0xff] }
 0xbd4   : > { %1325 = vmatpush.msrb.mxu3 %v1305_v55 }
 0xbd6   : > { %1326 = vmatpush.msrb.mxu3 %v1304_v56 }
 0xbd8   : > { %1327 = vmatpush.msrb.mxu3 %v1303_v57 }
 0xc13   : > { %v1087_v29 = vpop.f32.mrf.mxu2 }
 0xc17   : > { %v1060_v25 = vpop.f32.mrf.mxu1 }
 0xc18   : > { %1095 = vrot.lane.b32.xlu0 %v1060_v25, %s3504_s11 }
 0xc1e   : > { %v1033_v27 = vpop.f32.mrf.mxu0 }
 0xc1f   : > { %1091 = vrot.lane.b32.xlu1 %v1033_v27, %s3503_s10  ;;  %v3289_v27 = vld [vmem:[#allocation2 + $0x218] ss:$0 sm:$0xff] }
 0xc20   : > { %1262 = vperm.xlu0 %3273, %v1258_v36  }
 0xc27   : > { %1099 = vrot.lane.b32.xlu1 %v1087_v29, %s3502_s9 }
 0xc54   : > { %v1006_v28 = vpop.f32.mrf.mxu3 }
 0xc8a   : > { %v1096_v48 = vpop.permute.xlu0 %1095 }
 0xc91   : > { %v1092_v26 = vpop.permute.xlu1 %1091 }
 0xc92   : > { %v1263_v49 = vpop.permute.xlu0 %1262  ;;  %v1102_v51 = vsel %vm359_vm8, %v1006_v28, %v1092_v26  ;;  %v1196_v26 = vld [vmem:[#allocation2 + $0x250] sm:$0xff] }
 0xc93   : > { %vm1264_vm9 = vcmp.eq.s32.totalorder %v1263_v49, %v1260_v38  ;;  %v1103_v52 = vsel %vm636_vm12, %v1102_v51, %v1096_v48  ;;  %v1202_v38 = vld [vmem:[#allocation2 + $0x280] sm:$0xff]  ;;  %v1197_v48 = vld [vmem:[#allocation2 + $0x258] sm:$0xff] }
 0xc94   : > { %v3159_v50 = vsel %vm1264_vm9, 1.0, %v3506_v42  ;;  %1218 = vmatpush.msrb.mxu1 %v1202_v38 }
 0xc95   : > { %3160 = vmatmul.msk.f32.vlgmr.msrb.gmra.mxu2 %vm231_vm0, %v3159_v50  ;;  %v3291_v50 = vld [vmem:[#allocation2 + $0x248] ss:$0 sm:$0xff] }
 0xc96   : > { %1219 = vmatpush.msrb.mxu1 %v1201_v41 }
 0xc98   : > { %1220 = vmatpush.msrb.mxu1 %v1200_v45 }
 0xc99   : > { %v1100_v53 = vpop.permute.xlu1 %1099 }
 0xc9a   : > { %v1104_v54 = vsel %vm638_vm13, %v1103_v52, %v1100_v53  ;;  %1221 = vmatpush.msrb.mxu1 %v1199_v46 }
 0xc9b   : > { %3156 = vmatmul.msk.f32.vlgmr.msra.gmra.mxu3 %vm327_vm7, %v1104_v54 }
 0xc9c   : > { %1222 = vmatpush.msrb.mxu1 %v1198_v47 }
 0xc9e   : > { %1223 = vmatpush.msrb.mxu1 %v1197_v48 }
 0xca0   : > { %1224 = vmatpush.msrb.mxu1 %v1196_v26 }
 0xd18   : > { %v1295_v58 = vpop.f32.mrf.mxu2 }
 0xd19   : > { %v1298_v60 = vmul.f32 5.656854, %v1295_v58 }
 0xd1b   : > { %v3690_v61 = vadd.f32 %v1299_v59, %v1298_v60 }
 0xd1d   : > { %3161 = vmatmul.msk.f32.vlgmr.msrb.gmra.mxu3 %vm327_vm7, %v3690_v61 }
 0xd1e   : > { %v1126_v63 = vpop.f32.mrf.mxu3 }
 0xd1f   : > { %v1127_v0 = vadd.f32 %v3287_v62, %v1126_v63 }
 0xd21   : > { %v3695_v1 = vadd.f32 %v1127_v0, %v3628_v4 }
 0xd23   : > { %v1132_v2 = vsel %vm287_vm2, %v3695_v1, 0.0 }
 0xd24   : > { %1133 = vadd.xlane.f32.xlu1 %v1132_v2 }
 0xd97   : > { %v1134_v3 = vpop.xlane.xlu1 %1133 }
 0xd98   : > { %v1135_v5 = vmul.f32 %v1134_v3, %v3553_v44 }
 0xd9a   : > { %v1136_v6 = vsub.f32 %v3695_v1, %v1135_v5 }
 0xd9c   : > { %v1137_v7 = vmul.f32 %v1136_v6, %v1136_v6 }
 0xd9e   : > { %v1138_v9 = vsel %vm287_vm2, %v1137_v7, 0.0 }
 0xd9f   : > { %1139 = vadd.xlane.f32.xlu0 %v1138_v9 }
 0xda0   : > { %v1329_v10 = vpop.f32.mrf.mxu3 }
 0xda1   : > { %v3702_v11 = vadd.f32 %v3288_v8, %v1329_v10 }
 0xda3   : > { %1364 = vrot.lane.b32.xlu1 %v3702_v11, %s3492_s26  ;;  %1366 = vrot.lane.b32.xlu2 %v3702_v11, %s3493_s27 }
 0xdab   : > { %1338 = vrot.lane.b32.xlu2 %v3702_v11, %s3491_s25  ;;  %1420 = vrot.lane.b32.xlu1 %v3702_v11, %s3496_s30 }
 0xdb3   : > { %1394 = vrot.lane.b32.xlu2 %v3702_v11, %s3495_s29  ;;  %1422 = vrot.lane.b32.xlu0 %v3702_v11, %s3497_s4 }
 0xdbb   : > { %1392 = vrot.lane.b32.xlu2 %v3702_v11, %s3494_s28 }
 0xdfd   : > { %v1367_v4 = vpop.permute.xlu2 %1366 }
 0xdfe   : > { %3164 = vmatpush.xpose.msk.msra.mxu3 %vm359_vm8, %v1367_v4 }
 0xe05   : > { %v1339_v16 = vpop.permute.xlu2 %1338 }
 0xe06   : > { %3162 = vmatpush.xpose.msk.msra.mxu0 %vm359_vm8, %v1339_v16 }
 0xe0d   : > { %v1395_v34 = vpop.permute.xlu2 %1394 }
 0xe12   : > { %v1140_v17 = vpop.xlane.xlu0 %1139 }
 0xe13   : > { %v1141_v18 = vmul.f32 %v1140_v17, %v3553_v44 }
 0xe15   : > { %v1142_v19 = vadd.f32 1e-05, %v1141_v18  ;;  %v1365_v20 = vpop.permute.xlu1 %1364  ;;  %v1393_v35 = vpop.permute.xlu2 %1392 }
 0xe16   : > { %3165 = vmatmul.msk.f32.vlgmr.msra.gmra.mxu3 %vm359_vm8, %v1365_v20 }
 0xe17   : > { %3363 = vrsqrt.f32 %v1142_v19  ;;  %vm1149_vm15 = vweird.f32 %v1142_v19 }
 0xe1d   : > { %v3364_v21 = vpop.eup %3363 }
 0xe1e   : > { %v1144_v22 = vmul.f32 %v3364_v21, %v1142_v19  ;;  %vm1150_vm14 = vweird.f32 %v3364_v21 }
 0xe1f   : > { %vm1151_vm1 = vmor %vm1149_vm15, %vm1150_vm14 }
 0xe20   : > { %v1145_v23 = vmul.f32 %v3364_v21, %v1144_v22 }
 0xe22   : > { %v1146_v24 = vmul.f32 0.5, %v1145_v23 }
 0xe24   : > { %v1147_v25 = vsub.f32 1.5, %v1146_v24 }
 0xe25   : > { %v1423_v49 = vpop.permute.xlu0 %1422 }
 0xe26   : > { %v1148_v36 = vmul.f32 %v3364_v21, %v1147_v25  ;;  %3168 = vmatpush.xpose.msk.msra.mxu1 %vm359_vm8, %v1423_v49 }
 0xe28   : > { %v1152_v29 = vsel %vm1151_vm1, %v3364_v21, %v1148_v36 }
 0xe29   : > { %v1153_v30 = vmul.f32 %v1152_v29, %v1136_v6  ;;  %v1421_v6 = vpop.permute.xlu1 %1420 }
 0xe2b   : > { %v1155_v32 = vmul.f32 %v3289_v27, %v1153_v30 }
 0xe2d   : > { %v1157_v33 = vadd.f32 %v3290_v31, %v1155_v32 }
 0xe2f   : > { %3157 = vmatmul.msk.f32.vlgmr.msrb.gmra.mxu0 %vm327_vm7, %v1157_v33 }
 0xe30   : > { %3166 = vmatpush.xpose.msk.msrb.mxu0 %vm359_vm8, %v1395_v34 }
 0xe37   : > { %3163 = vmatmul.msk.f32.vlgmr.msra.gmra.mxu0 %vm359_vm8, %v3702_v11 }
 0xe3f   : > { %3167 = vmatmul.msk.f32.vlgmr.msrb.gmra.mxu0 %vm359_vm8, %v1393_v35 }
 0xe99   : > { %v1389_v39 = vpop.f32.mrf.mxu3 }
 0xe9a   : > { %v1449_v40 = vadd.f32 %v1389_v39, %v3683_v43 }
 0xe9c   : > { %v1455_v42 = vsel %vm359_vm8, %v1449_v40, -inf }
 0xe9d   : > { %1456 = vmax.xlane.f32.xlu2 %v1455_v42 }
 0xeac   : > { %v1184_v28 = vpop.f32.mrf.mxu0 }
 0xead   : > { %v1185_v51 = vadd.f32 %v3291_v50, %v1184_v28 }
 0xeaf   : > { %v1187_v52 = vmul.f32 %v1185_v51, %v1185_v51 }
 0xeb1   : > { %v1188_v53 = vmul.f32 %v1187_v52, %v1185_v51  ;;  %v1334_v52 = vld [vmem:[#allocation2 + $0x328] sm:$0xff] }
 0xeb3   : > { %v1189_v54 = vmul.f32 0.044715, %v1188_v53  ;;  %v1333_v53 = vld [vmem:[#allocation2 + $0x320] sm:$0xff] }
 0xeb4   : > { %v1361_v55 = vpop.f32.mrf.mxu0 }
 0xeb5   : > { %v1190_v56 = vadd.f32 %v1189_v54, %v1185_v51  ;;  %v1448_v57 = vadd.f32 %v1361_v55, %v3683_v43  ;;  %v3292_v54 = vld [vmem:[#allocation2 + $0x290] ss:$0 sm:$0xff] }
 0xeb7   : > { %v1191_v58 = vmul.f32 0.7978846, %v1190_v56  ;;  %v1452_v59 = vsel %vm359_vm8, %v1448_v57, -inf }
 0xeb8   : > { %1453 = vmax.xlane.f32.xlu2 %v1452_v59 }
 0xeb9   : > { %3365 = vtanh.f32 %v1191_v58  ;;  %v1332_v58 = vld [vmem:[#allocation2 + $0x318] sm:$0xff] }
 0xebc   : > { %v1417_v60 = vpop.f32.mrf.mxu0 }
 0xebd   : > { %v1450_v62 = vadd.f32 %v1417_v60, %v3683_v43 }
 0xebf   : > { %v3366_v63 = vpop.eup %3365  ;;  %v1458_v0 = vsel %vm359_vm8, %v1450_v62, -inf }
 0xec0   : > { %v1193_v2 = vadd.f32 1.0, %v3366_v63  ;;  %1459 = vmax.xlane.f32.xlu0 %v1458_v0 }
 0xec2   : > { %v1194_v3 = vmul.f32 0.5, %v1193_v2 }
 0xec4   : > { %v1195_v5 = vmul.f32 %v1194_v3, %v1185_v51  ;;  %v1335_v51 = vld [vmem:[#allocation2 + $0x330] sm:$0xff] }
 0xec6   : > { %3158 = vmatmul.msk.f32.vlgmr.msrb.gmra.mxu1 %vm231_vm0, %v1195_v5  ;;  %v3293_v5 = vld [vmem:[#allocation2 + $0x338] ss:$0 sm:$0xff] }
 0xece   : > { %3169 = vmatmul.msk.f32.vlgmr.msra.gmra.mxu1 %vm359_vm8, %v1421_v6 }
 0xf10   : > { %v1457_v7 = vpop.xlane.xlu2 %1456 }
 0xf11   : > { %v1465_v8 = vsub.f32 %v1449_v40, %v1457_v7 }
 0xf13   : > { %v1470_v9 = vmul.f32 1.442695, %v1465_v8 }
 0xf15   : > { %3367 = vpow2.f32 %v1470_v9 }
 0xf1b   : > { %v3368_v10 = vpop.eup %3367 }
 0xf1c   : > { %v1479_v4 = vsel %vm359_vm8, %v3368_v10, 0.0 }
 0xf1d   : > { %1480 = vadd.xlane.f32.xlu2 %v1479_v4 }
 0xf2b   : > { %v1454_v21 = vpop.xlane.xlu2 %1453 }
 0xf2c   : > { %v1464_v22 = vsub.f32 %v1448_v57, %v1454_v21  ;;  %v1668_v21 = vld [vmem:[#allocation2 + $0x350] sm:$0xff] }
 0xf2e   : > { %v1468_v23 = vmul.f32 1.442695, %v1464_v22  ;;  %v1700_v22 = vld [vmem:[#allocation2 + $0x390] sm:$0xff] }
 0xf33   : > { %v1460_v12 = vpop.xlane.xlu0 %1459 }
 0xf34   : > { %v1466_v13 = vsub.f32 %v1450_v62, %v1460_v12 }
 0xf35   : > { %1522 = vrot.lane.b32.xlu2 %v3702_v11, %s3500_s7 }
 0xf36   : > { %v1472_v14 = vmul.f32 1.442695, %v1466_v13 }
 0xf38   : > { %3369 = vpow2.f32 %v1472_v14 }
 0xf39   : > { %3371 = vpow2.f32 %v1468_v23  ;;  %v1699_v23 = vld [vmem:[#allocation2 + $0x388] sm:$0xff] }
 0xf3d   : > { %1496 = vrot.lane.b32.xlu2 %v3702_v11, %s3498_s5 }
 0xf3e   : > { %v3370_v15 = vpop.eup %3369 }
 0xf3f   : > { %v1482_v16 = vsel %vm359_vm8, %v3370_v15, 0.0  ;;  %v3372_v24 = vpop.eup %3371 }
 0xf40   : > { %1483 = vadd.xlane.f32.xlu0 %v1482_v16  ;;  %v1476_v25 = vsel %vm359_vm8, %v3372_v24, 0.0 }
 0xf43   : > { %v1226_v17 = vpop.f32.mrf.mxu1 }
 0xf44   : > { %v1227_v55 = vadd.f32 %v3292_v54, %v1226_v17  ;;  %v3297_v54 = vld [vmem:[#allocation2 + $0x2a0] ss:$0 sm:$0xff] }
 0xf46   : > { %v1229_v56 = vadd.f32 %v1227_v55, %v3695_v1 }
 0xf48   : > { %v1232_v57 = vsel %vm287_vm2, %v1229_v56, 0.0 }
 0xf4b   : > { %v1445_v18 = vpop.f32.mrf.mxu1 }
 0xf4c   : > { %v1451_v19 = vadd.f32 %v1445_v18, %v3683_v43 }
 0xf4e   : > { %v1461_v20 = vsel %vm359_vm8, %v1451_v19, -inf }
 0xf4f   : > { %1462 = vmax.xlane.f32.xlu1 %v1461_v20  ;;  %v1669_v20 = vld [vmem:[#allocation2 + $0x358] sm:$0xff] }
 0xf54   : > { %1548 = vrot.lane.b32.xlu0 %v3702_v11, %s3501_s8 }
 0xf7e   : > { %1477 = vadd.xlane.f32.xlu0 %v1476_v25 }
 0xf90   : > { %v1481_v36 = vpop.xlane.xlu2 %1480 }
 0xf91   : > { %3373 = vrcp.f32 %v1481_v36  ;;  %v1698_v36 = vld [vmem:[#allocation2 + $0x380] sm:$0xff] }
 0xf97   : > { %v3374_v27 = vpop.eup %3373 }
 0xf98   : > { %v1493_v29 = vmul.f32 %v3374_v27, %v3368_v10  ;;  %v1523_v30 = vpop.permute.xlu2 %1522  ;;  %v1697_v27 = vld [vmem:[#allocation2 + $0x378] sm:$0xff] }
 0xf99   : > { %1543 = vmatpush.msrb.mxu3 %v1523_v30 }
 0xf9a   : > { %3171 = vmatmul.msk.f32.vlgmr.msrb.gmra.mxu3 %vm359_vm8, %v1493_v29 }
 0xfa0   : > { %v1497_v31 = vpop.permute.xlu2 %1496 }
 0xfa1   : > { %1517 = vmatpush.msra.mxu2 %v1497_v31 }
 0xfa3   : > { %1631 = vmatpush.msrb.mxu2 %v1335_v51  ;;  %v3295_v51 = vld [vmem:[#allocation2 + $0x298] ss:$0 sm:$0xff] }
 0xfa5   : > { %1632 = vmatpush.msrb.mxu2 %v1334_v52 }
 0xfa7   : > { %1633 = vmatpush.msrb.mxu2 %v1333_v53 }
 0xfa9   : > { %1634 = vmatpush.msrb.mxu2 %v1332_v58  ;;  %v3299_v58 = vld [vmem:[#allocation2 + $0x398] ss:$0 sm:$0xff] }
 0xfb3   : > { %v1484_v32 = vpop.xlane.xlu0 %1483 }
 0xfb4   : > { %3375 = vrcp.f32 %v1484_v32 }
 0xfba   : > { %v3376_v34 = vpop.eup %3375 }
 0xfbb   : > { %v1494_v38 = vmul.f32 %v3376_v34, %v3370_v15 }
 0xfc2   : > { %v1463_v33 = vpop.xlane.xlu1 %1462 }
 0xfc3   : > { %v1467_v35 = vsub.f32 %v1451_v19, %v1463_v33  ;;  %v1670_v19 = vld [vmem:[#allocation2 + $0x360] sm:$0xff] }
 0xfc5   : > { %v1474_v37 = vmul.f32 1.442695, %v1467_v35 }
 0xfc6   : > { %v1549_v39 = vpop.permute.xlu0 %1548 }
 0xfc7   : > { %3377 = vpow2.f32 %v1474_v37  ;;  %1569 = vmatpush.msra.mxu0 %v1549_v39 }
 0xfc8   : > { %3172 = vmatmul.msk.f32.vlgmr.msra.gmra.mxu0 %vm359_vm8, %v1494_v38 }
 0xfc9   : > { %1718 = vmatpush.msrb.mxu0 %v1700_v22 }
 0xfcb   : > { %1719 = vmatpush.msrb.mxu0 %v1699_v23 }
 0xfcd   : > { %v3378_v40 = vpop.eup %3377  ;;  %1720 = vmatpush.msrb.mxu0 %v1698_v36 }
 0xfce   : > { %v1485_v41 = vsel %vm359_vm8, %v3378_v40, 0.0 }
 0xfcf   : > { %1486 = vadd.xlane.f32.xlu1 %v1485_v41  ;;  %1721 = vmatpush.msrb.mxu0 %v1697_v27 }
 0xfe8   : > { %1574 = vrot.lane.b32.xlu1 %v3702_v11, %s3499_s6 }
 0xff1   : > { %v1478_v42 = vpop.xlane.xlu0 %1477 }
 0xff2   : > { %3379 = vrcp.f32 %v1478_v42  ;;  %v3294_v42 = vld [vmem:[#allocation2 + $0x340] ss:$0 sm:$0xff] }
 0xff8   : > { %v3380_v45 = vpop.eup %3379 }
 0xff9   : > { %v1492_v46 = vmul.f32 %v3380_v45, %v3372_v24 }
 0xffb   : > { %3170 = vmatmul.msk.f32.vlgmr.msra.gmra.mxu2 %vm359_vm8, %v1492_v46 }
0x101d   : > { %v1545_v47 = vpop.f32.mrf.mxu3 }
0x101e   : > { %1601 = vrot.lane.b32.xlu1 %v1545_v47, %s3503_s10 }
0x1042   : > { %v1487_v26 = vpop.xlane.xlu1 %1486 }
0x1043   : > { %3381 = vrcp.f32 %v1487_v26 }
0x1045   : > { %v1571_v48 = vpop.f32.mrf.mxu0 }
0x1046   : > { %1605 = vrot.lane.b32.xlu2 %v1571_v48, %s3504_s11  ;;  %v3296_v48 = vld [vmem:[#allocation2 + $0x348] ss:$0 sm:$0xff] }
0x1049   : > { %v3382_v49 = vpop.eup %3381 }
0x104a   : > { %v1495_v50 = vmul.f32 %v3382_v49, %v3378_v40 }
0x105a   : > { %v1575_v28 = vpop.permute.xlu1 %1574 }
0x105b   : > { %1595 = vmatpush.msrb.mxu1 %v1575_v28 }
0x105c   : > { %3173 = vmatmul.msk.f32.vlgmr.msrb.gmra.mxu1 %vm359_vm8, %v1495_v50 }
0x107e   : > { %v1519_v62 = vpop.f32.mrf.mxu2 }
0x1090   : > { %v1602_v59 = vpop.permute.xlu1 %1601 }
0x1091   : > { %v1612_v63 = vsel %vm359_vm8, %v1519_v62, %v1602_v59 }
0x10a0   : > { %v1606_v60 = vpop.permute.xlu2 %1605 }
0x10a1   : > { %v1613_v0 = vsel %vm636_vm12, %v1612_v63, %v1606_v60 }
0x10d9   : > { %v1597_v11 = vpop.f32.mrf.mxu1 }
0x10da   : > { %1609 = vrot.lane.b32.xlu1 %v1597_v11, %s3502_s9 }
0x1104   : > { %1233 = vadd.xlane.f32.xlu1 %v1232_v57  ;;  %v3298_v57 = vld [vmem:[#allocation2 + $0x370] ss:$0 sm:$0xff] }
0x114c   : > { %v1610_v2 = vpop.permute.xlu1 %1609 }
0x114d   : > { %v1614_v3 = vsel %vm638_vm13, %v1613_v0, %v1610_v2 }
0x114e   : > { %3174 = vmatmul.msk.f32.vlgmr.msrb.gmra.mxu2 %vm327_vm7, %v1614_v3 }
0x1177   : > { %v1234_v9 = vpop.xlane.xlu1 %1233 }
0x1178   : > { %v1235_v12 = vmul.f32 %v1234_v9, %v3553_v44 }
0x117a   : > { %v1236_v15 = vsub.f32 %v1229_v56, %v1235_v12 }
0x117c   : > { %v1237_v17 = vmul.f32 %v1236_v15, %v1236_v15 }
0x117e   : > { %v1238_v18 = vsel %vm287_vm2, %v1237_v17, 0.0 }
0x11d1   : > { %v1636_v6 = vpop.f32.mrf.mxu2 }
0x11d2   : > { %v1637_v1 = vadd.f32 %v3293_v5, %v1636_v6 }
0x11d4   : > { %v1639_v7 = vadd.f32 %v1637_v1, %v3690_v61  ;;  %v1671_v61 = vld [vmem:[#allocation2 + $0x368] sm:$0xff] }
0x11d5   : > { %1689 = vmatpush.msra.mxu3 %v1671_v61 }
0x11d6   : > { %v1642_v8 = vsel %vm327_vm7, %v1639_v7, 0.0 }
0x11d7   : > { %1643 = vadd.xlane.f32.xlu2 %v1642_v8  ;;  %1690 = vmatpush.msra.mxu3 %v1670_v19 }
0x11d9   : > { %1691 = vmatpush.msra.mxu3 %v1669_v20 }
0x11db   : > { %1692 = vmatpush.msra.mxu3 %v1668_v21 }
0x124a   : > { %v1644_v10 = vpop.xlane.xlu2 %1643 }
0x124b   : > { %v1645_v4 = vmul.f32 %v1644_v10, %v3553_v44 }
0x124d   : > { %v1646_v13 = vsub.f32 %v1639_v7, %v1645_v4 }
0x124f   : > { %v1647_v14 = vmul.f32 %v1646_v13, %v1646_v13 }
0x1251   : > { %v1648_v16 = vsel %vm327_vm7, %v1647_v14, 0.0 }
0x1252   : > { %1649 = vadd.xlane.f32.xlu0 %v1648_v16 }
0x125a   : > { %1239 = vadd.xlane.f32.xlu0 %v1238_v18 }
0x12c5   : > { %v1650_v24 = vpop.xlane.xlu0 %1649 }
0x12c6   : > { %v1651_v25 = vmul.f32 %v1650_v24, %v3553_v44 }
0x12c8   : > { %v1652_v29 = vadd.f32 1e-05, %v1651_v25 }
0x12ca   : > { %3383 = vrsqrt.f32 %v1652_v29  ;;  %vm1659_vm3 = vweird.f32 %v1652_v29 }
0x12cd   : > { %v1240_v30 = vpop.xlane.xlu0 %1239 }
0x12ce   : > { %v1241_v31 = vmul.f32 %v1240_v30, %v3553_v44 }
0x12d0   : > { %v3384_v32 = vpop.eup %3383  ;;  %v1242_v33 = vadd.f32 1e-05, %v1241_v31 }
0x12d1   : > { %v1654_v34 = vmul.f32 %v3384_v32, %v1652_v29  ;;  %vm1660_vm2 = vweird.f32 %v3384_v32 }
0x12d2   : > { %3385 = vrsqrt.f32 %v1242_v33  ;;  %vm1661_vm4 = vmor %vm1659_vm3, %vm1660_vm2  ;;  %vm1249_vm6 = vweird.f32 %v1242_v33 }
0x12d3   : > { %v1655_v35 = vmul.f32 %v3384_v32, %v1654_v34 }
0x12d5   : > { %v1656_v37 = vmul.f32 0.5, %v1655_v35 }
0x12d7   : > { %v1657_v38 = vsub.f32 1.5, %v1656_v37 }
0x12d8   : > { %v3386_v39 = vpop.eup %3385 }
0x12d9   : > { %v1658_v40 = vmul.f32 %v3384_v32, %v1657_v38  ;;  %v1244_v41 = vmul.f32 %v3386_v39, %v1242_v33  ;;  %vm1250_vm5 = vweird.f32 %v3386_v39 }
0x12da   : > { %vm1251_vm9 = vmor %vm1249_vm6, %vm1250_vm5 }
0x12db   : > { %v1662_v45 = vsel %vm1661_vm4, %v3384_v32, %v1658_v40  ;;  %v1245_v46 = vmul.f32 %v3386_v39, %v1244_v41 }
0x12dc   : > { %v1663_v47 = vmul.f32 %v1662_v45, %v1646_v13 }
0x12dd   : > { %v1246_v26 = vmul.f32 0.5, %v1245_v46 }
0x12de   : > { %v1665_v49 = vmul.f32 %v3294_v42, %v1663_v47 }
0x12df   : > { %v1247_v50 = vsub.f32 1.5, %v1246_v26 }
0x12e0   : > { %v3771_v28 = vadd.f32 %v3296_v48, %v1665_v49 }
0x12e1   : > { %v1248_v11 = vmul.f32 %v3386_v39, %v1247_v50 }
0x12e2   : > { %3175 = vmatmul.msk.f32.vlgmr.msra.gmra.mxu3 %vm327_vm7, %v3771_v28 }
0x12e3   : > { %v1252_v52 = vsel %vm1251_vm9, %v3386_v39, %v1248_v11 }
0x12e4   : > { %v1253_v53 = vmul.f32 %v1252_v52, %v1236_v15 }
0x12e6   : > { %v1255_v55 = vmul.f32 %v3295_v51, %v1253_v53 }
0x12e8   : > { %v3775_v56 = vadd.f32 %v3297_v54, %v1255_v55  ;;  %v1729_v55 = vld [vmem:[#allocation2 + $0x3b8] sm:$0xff] }
0x12ea   : > { %3176 = vmatmul.msk.f32.vlgmr.msrb.gmra.mxu0 %vm327_vm7, %v3775_v56 }
0x1365   : > { %v1694_v59 = vpop.f32.mrf.mxu3 }
0x1366   : > { %v1695_v60 = vadd.f32 %v3298_v57, %v1694_v59  ;;  %v1728_v57 = vld [vmem:[#allocation2 + $0x3b0] sm:$0xff]  ;;  %v1726_v59 = vld [vmem:[#allocation2 + $0x3a0] sm:$0xff] }
0x1367   : > { %v1723_v62 = vpop.f32.mrf.mxu0 }
0x1368   : > { %v1724_v63 = vadd.f32 %v3299_v58, %v1723_v62  ;;  %1757 = vrot.lane.b32.xlu1 %v1695_v60, %s3492_s26  ;;  %v1727_v58 = vld [vmem:[#allocation2 + $0x3a8] sm:$0xff] }
0x136a   : > { %1787 = vrot.lane.b32.xlu2 %v1724_v63, %s3494_s28  ;;  %1759 = vrot.lane.b32.xlu0 %v1724_v63, %s3492_s26 }
0x136b   : > { %3177 = vmatpush.xpose.msk.msra.mxu1 %vm359_vm8, %v1724_v63 }
0x136e   : > { %3178 = vmatmul.msk.f32.vlgmr.msra.gmra.mxu1 %vm359_vm8, %v1695_v60 }
0x1372   : > { %1815 = vrot.lane.b32.xlu2 %v1724_v63, %s3496_s30  ;;  %1785 = vrot.lane.b32.xlu0 %v1695_v60, %s3494_s28 }
0x137a   : > { %1813 = vrot.lane.b32.xlu0 %v1695_v60, %s3496_s30 }
0x13c4   : > { %v1788_v0 = vpop.permute.xlu2 %1787 }
0x13c5   : > { %3181 = vmatpush.xpose.msk.msrb.mxu3 %vm359_vm8, %v1788_v0 }
0x13cc   : > { %v1816_v2 = vpop.permute.xlu2 %1815 }
0x13cd   : > { %3183 = vmatpush.xpose.msk.msra.mxu0 %vm359_vm8, %v1816_v2 }
0x13da   : > { %v1758_v5 = vpop.permute.xlu1 %1757 }
0x13dc   : > { %v1760_v3 = vpop.permute.xlu0 %1759 }
0x13dd   : > { %3179 = vmatpush.xpose.msk.msra.mxu2 %vm359_vm8, %v1760_v3 }
0x13e0   : > { %3180 = vmatmul.msk.f32.vlgmr.msra.gmra.mxu2 %vm359_vm8, %v1758_v5 }
0x13e4   : > { %v1786_v6 = vpop.permute.xlu0 %1785 }
0x13e5   : > { %3182 = vmatmul.msk.f32.vlgmr.msrb.gmra.mxu3 %vm359_vm8, %v1786_v6  ;;  %v3300_v6 = vld [vmem:[#allocation2 + $0x3c0] ss:$0 sm:$0xff] }
0x13eb   : > { %v1754_v10 = vpop.f32.mrf.mxu1 }
0x13ec   : > { %v1814_v1 = vpop.permute.xlu0 %1813  ;;  %v1841_v14 = vsel %vm515_vm11, %v1754_v10, -inf }
0x13ed   : > { %3184 = vmatmul.msk.f32.vlgmr.msra.gmra.mxu0 %vm359_vm8, %v1814_v1 }
0x1463   : > { %v1782_v7 = vpop.f32.mrf.mxu2 }
0x1464   : > { %v1844_v8 = vsel %vm515_vm11, %v1782_v7, -inf }
0x1465   : > { %1845 = vmax.xlane.f32.xlu1 %v1844_v8 }
0x1468   : > { %v1810_v9 = vpop.f32.mrf.mxu3 }
0x1469   : > { %v1847_v4 = vsel %vm515_vm11, %v1810_v9, -inf }
0x146a   : > { %1848 = vmax.xlane.f32.xlu2 %v1847_v4  ;;  %v1838_v12 = vpop.f32.mrf.mxu0 }
0x146b   : > { %v1850_v13 = vsel %vm515_vm11, %v1838_v12, -inf }
0x146c   : > { %1851 = vmax.xlane.f32.xlu0 %v1850_v13 }
0x146d   : > { %1842 = vmax.xlane.f32.xlu1 %v1841_v14 }
0x14d8   : > { %v1846_v15 = vpop.xlane.xlu1 %1845 }
0x14d9   : > { %v1854_v16 = vsub.f32 %v1782_v7, %v1846_v15  ;;  %v2064_v15 = vld [vmem:[#allocation2 + $0x3f0] sm:$0xff] }
0x14db   : > { %v1859_v17 = vmul.f32 1.442695, %v1854_v16  ;;  %v2063_v16 = vld [vmem:[#allocation2 + $0x3e8] sm:$0xff] }
0x14dd   : > { %3387 = vpow2.f32 %v1859_v17  ;;  %v1849_v18 = vpop.xlane.xlu2 %1848  ;;  %v2062_v17 = vld [vmem:[#allocation2 + $0x3e0] sm:$0xff] }
0x14de   : > { %v1855_v61 = vsub.f32 %v1810_v9, %v1849_v18  ;;  %v2061_v18 = vld [vmem:[#allocation2 + $0x3d8] sm:$0xff] }
0x14df   : > { %v1852_v19 = vpop.xlane.xlu0 %1851 }
0x14e0   : > { %v1861_v20 = vmul.f32 1.442695, %v1855_v61  ;;  %v1856_v21 = vsub.f32 %v1838_v12, %v1852_v19  ;;  %v1843_v30 = vpop.xlane.xlu1 %1842  ;;  %v2097_v61 = vld [vmem:[#allocation2 + $0x430] sm:$0xff]  ;;  %v2096_v19 = vld [vmem:[#allocation2 + $0x428] sm:$0xff] }
0x14e1   : > { %v1853_v31 = vsub.f32 %v1754_v10, %v1843_v30 }
0x14e2   : > { %3389 = vpow2.f32 %v1861_v20  ;;  %v1863_v22 = vmul.f32 1.442695, %v1856_v21 }
0x14e3   : > { %v3388_v23 = vpop.eup %3387  ;;  %v1857_v32 = vmul.f32 1.442695, %v1853_v31 }
0x14e4   : > { %3391 = vpow2.f32 %v1863_v22  ;;  %v1868_v24 = vsel %vm515_vm11, %v3388_v23, 0.0  ;;  %v2095_v22 = vld [vmem:[#allocation2 + $0x420] sm:$0xff] }
0x14e5   : > { %1869 = vadd.xlane.f32.xlu2 %v1868_v24  ;;  %3393 = vpow2.f32 %v1857_v32  ;;  %v2094_v24 = vld [vmem:[#allocation2 + $0x418] sm:$0xff]  ;;  %v3301_v32 = vld [vmem:[#allocation2 + $0x3c8] ss:$0 sm:$0xff] }
0x14e8   : > { %v3390_v25 = vpop.eup %3389 }
0x14e9   : > { %v1871_v36 = vsel %vm515_vm11, %v3390_v25, 0.0 }
0x14ea   : > { %v3392_v27 = vpop.eup %3391  ;;  %1872 = vadd.xlane.f32.xlu0 %v1871_v36 }
0x14eb   : > { %v1874_v29 = vsel %vm515_vm11, %v3392_v27, 0.0  ;;  %v3394_v33 = vpop.eup %3393 }
0x14ec   : > { %1875 = vadd.xlane.f32.xlu1 %v1874_v29  ;;  %v1865_v34 = vsel %vm515_vm11, %v3394_v33, 0.0 }
0x14fd   : > { %1912 = vrot.lane.b32.xlu2 %v1724_v63, %s3493_s27 }
0x14fe   : > { %1939 = vrot.lane.b32.xlu0 %v1724_v63, %s3495_s29 }
0x1505   : > { %1966 = vrot.lane.b32.xlu1 %v1724_v63, %s3497_s4  ;;  %1885 = vrot.lane.b32.xlu2 %v1724_v63, %s3491_s25 }
0x1528   : > { %1866 = vadd.xlane.f32.xlu0 %v1865_v34 }
0x1558   : > { %v1870_v35 = vpop.xlane.xlu2 %1869 }
0x1559   : > { %3395 = vrcp.f32 %v1870_v35  ;;  %v3302_v35 = vld [vmem:[#allocation2 + $0x3d0] ss:$0 sm:$0xff] }
0x155d   : > { %v1873_v40 = vpop.xlane.xlu0 %1872 }
0x155e   : > { %3397 = vrcp.f32 %v1873_v40  ;;  %v2092_v40 = vld [vmem:[#allocation2 + $0x408] sm:$0xff] }
0x155f   : > { %v3396_v37 = vpop.eup %3395  ;;  %v1876_v42 = vpop.xlane.xlu1 %1875 }
0x1560   : > { %v1882_v38 = vmul.f32 %v3396_v37, %v3388_v23  ;;  %v1913_v39 = vpop.permute.xlu2 %1912  ;;  %3399 = vrcp.f32 %v1876_v42  ;;  %v3303_v42 = vld [vmem:[#allocation2 + $0x3f8] ss:$0 sm:$0xff] }
0x1561   : > { %3187 = vmatpush.msk.msrb.mxu2 %vm519_vm10, %v1913_v39  ;;  %v2093_v39 = vld [vmem:[#allocation2 + $0x410] sm:$0xff] }
0x1562   : > { %3188 = vmatmul.msk.f32.vlgmr.msrb.gmra.mxu2 %vm515_vm11, %v1882_v38 }
0x1563   : > { %2082 = vmatpush.msra.mxu2 %v2064_v15 }
0x1564   : > { %v3398_v45 = vpop.eup %3397 }
0x1565   : > { %v1883_v46 = vmul.f32 %v3398_v45, %v3390_v25  ;;  %2083 = vmatpush.msra.mxu2 %v2063_v16 }
0x1566   : > { %v3400_v48 = vpop.eup %3399 }
0x1567   : > { %v1884_v26 = vmul.f32 %v3400_v48, %v3392_v27  ;;  %2084 = vmatpush.msra.mxu2 %v2062_v17  ;;  %v3304_v48 = vld [vmem:[#allocation2 + $0x440] ss:$0 sm:$0xff] }
0x1568   : > { %v1886_v41 = vpop.permute.xlu2 %1885 }
0x1569   : > { %3185 = vmatpush.msk.msrb.mxu1 %vm519_vm10, %v1886_v41  ;;  %2085 = vmatpush.msra.mxu2 %v2061_v18  ;;  %v2091_v41 = vld [vmem:[#allocation2 + $0x400] sm:$0xff] }
0x156b   : > { %2024 = vmatpush.msra.mxu1 %v1729_v55 }
0x156d   : > { %2025 = vmatpush.msra.mxu1 %v1728_v57  ;;  %v2156_v57 = vld [vmem:[#allocation2 + $0x470] sm:$0xff] }
0x156f   : > { %2026 = vmatpush.msra.mxu1 %v1727_v58  ;;  %v2155_v58 = vld [vmem:[#allocation2 + $0x468] sm:$0xff] }
0x1570   : > { %v1940_v47 = vpop.permute.xlu0 %1939 }
0x1571   : > { %3189 = vmatpush.msk.msra.mxu3 %vm519_vm10, %v1940_v47  ;;  %2027 = vmatpush.msra.mxu1 %v1726_v59  ;;  %v2154_v59 = vld [vmem:[#allocation2 + $0x460] sm:$0xff] }
0x1572   : > { %3190 = vmatmul.msk.f32.vlgmr.msra.gmra.mxu3 %vm515_vm11, %v1883_v46 }
0x1577   : > { %v1967_v49 = vpop.permute.xlu1 %1966 }
0x1578   : > { %3191 = vmatpush.msk.msrb.mxu0 %vm519_vm10, %v1967_v49 }
0x1579   : > { %3192 = vmatmul.msk.f32.vlgmr.msrb.gmra.mxu0 %vm515_vm11, %v1884_v26 }
0x157a   : > { %2174 = vmatpush.msra.mxu0 %v2156_v57 }
0x157c   : > { %2175 = vmatpush.msra.mxu0 %v2155_v58 }
0x157e   : > { %2176 = vmatpush.msra.mxu0 %v2154_v59 }
0x159b   : > { %v1867_v50 = vpop.xlane.xlu0 %1866 }
0x159c   : > { %3401 = vrcp.f32 %v1867_v50 }
0x15a2   : > { %v3402_v11 = vpop.eup %3401 }
0x15a3   : > { %v1881_v51 = vmul.f32 %v3402_v11, %v3394_v33 }
0x15a5   : > { %3186 = vmatmul.msk.f32.vlgmr.msrb.gmra.mxu1 %vm515_vm11, %v1881_v51 }
0x15e5   : > { %v1936_v52 = vpop.f32.mrf.mxu2 }
0x15e6   : > { %1994 = vrot.lane.b32.xlu1 %v1936_v52, %s3503_s10 }
0x15f5   : > { %v1963_v53 = vpop.f32.mrf.mxu3 }
0x15f6   : > { %1998 = vrot.lane.b32.xlu2 %v1963_v53, %s3504_s11  ;;  %v1990_v54 = vpop.f32.mrf.mxu0 }
0x15f7   : > { %2002 = vrot.lane.b32.xlu1 %v1990_v54, %s3502_s9 }
0x1622   : > { %v1909_v62 = vpop.f32.mrf.mxu1 }
0x1650   : > { %v1999_v0 = vpop.permute.xlu2 %1998 }
0x1658   : > { %v1995_v60 = vpop.permute.xlu1 %1994 }
0x1659   : > { %v2005_v63 = vsel %vm359_vm8, %v1909_v62, %v1995_v60  ;;  %v2153_v60 = vld [vmem:[#allocation2 + $0x458] sm:$0xff] }
0x165a   : > { %v2006_v2 = vsel %vm636_vm12, %v2005_v63, %v1999_v0  ;;  %2177 = vmatpush.msra.mxu0 %v2153_v60 }
0x1669   : > { %v2003_v3 = vpop.permute.xlu1 %2002 }
0x166a   : > { %v2007_v5 = vsel %vm638_vm13, %v2006_v2, %v2003_v3 }
0x166b   : > { %3193 = vmatmul.msk.f32.vlgmr.msra.gmra.mxu1 %vm327_vm7, %v2007_v5 }
0x16e8   : > { %v2029_v1 = vpop.f32.mrf.mxu1 }
0x16e9   : > { %v2030_v7 = vadd.f32 %v3300_v6, %v2029_v1 }
0x16eb   : > { %v2032_v8 = vadd.f32 %v2030_v7, %v3771_v28  ;;  %v2098_v28 = vld [vmem:[#allocation2 + $0x438] sm:$0xff] }
0x16ec   : > { %2112 = vmatpush.msrb.mxu3 %v2098_v28 }
0x16ed   : > { %v2035_v9 = vsel %vm327_vm7, %v2032_v8, 0.0 }
0x16ee   : > { %2036 = vadd.xlane.f32.xlu2 %v2035_v9  ;;  %2113 = vmatpush.msrb.mxu3 %v2097_v61 }
0x16f0   : > { %2114 = vmatpush.msrb.mxu3 %v2096_v19 }
0x16f2   : > { %2115 = vmatpush.msrb.mxu3 %v2095_v22 }
0x16f4   : > { %2116 = vmatpush.msrb.mxu3 %v2094_v24 }
0x16f6   : > { %2117 = vmatpush.msrb.mxu3 %v2093_v39 }
0x16f8   : > { %2118 = vmatpush.msrb.mxu3 %v2092_v40 }
0x16fa   : > { %2119 = vmatpush.msrb.mxu3 %v2091_v41 }
0x1761   : > { %v2037_v10 = vpop.xlane.xlu2 %2036 }
0x1762   : > { %v2038_v4 = vmul.f32 %v2037_v10, %v3553_v44 }
0x1764   : > { %v2039_v12 = vsub.f32 %v2032_v8, %v2038_v4  ;;  %v3305_v8 = vld [vmem:[#allocation2 + $0x448] ss:$0 sm:$0xff]  ;;  %v3306_v4 = vld [vmem:[#allocation2 + $0x450] ss:$0 sm:$0xff] }
0x1766   : > { %v2040_v13 = vmul.f32 %v2039_v12, %v2039_v12 }
0x1768   : > { %v2041_v14 = vsel %vm327_vm7, %v2040_v13, 0.0 }
0x1769   : > { %2042 = vadd.xlane.f32.xlu1 %v2041_v14  ;;  %v3307_v14 = vld [vmem:[#allocation2 + $0x478] ss:$0 sm:$0xff] }
0x17dc   : > { %v2043_v20 = vpop.xlane.xlu1 %2042 }
0x17dd   : > { %v2044_v21 = vmul.f32 %v2043_v20, %v3553_v44 }
0x17df   : > { %v2045_v23 = vadd.f32 1e-05, %v2044_v21 }
0x17e1   : > { %3403 = vrsqrt.f32 %v2045_v23  ;;  %vm2052_vm15 = vweird.f32 %v2045_v23 }
0x17e7   : > { %v3404_v25 = vpop.eup %3403 }
0x17e8   : > { %v2047_v36 = vmul.f32 %v3404_v25, %v2045_v23  ;;  %vm2053_vm14 = vweird.f32 %v3404_v25 }
0x17e9   : > { %vm2054_vm1 = vmor %vm2052_vm15, %vm2053_vm14 }
0x17ea   : > { %v2048_v27 = vmul.f32 %v3404_v25, %v2047_v36 }
0x17ec   : > { %v2049_v29 = vmul.f32 0.5, %v2048_v27 }
0x17ee   : > { %v2050_v30 = vsub.f32 1.5, %v2049_v29 }
0x17f0   : > { %v2051_v31 = vmul.f32 %v3404_v25, %v2050_v30 }
0x17f2   : > { %v2055_v33 = vsel %vm2054_vm1, %v3404_v25, %v2051_v31 }
0x17f3   : > { %v2056_v34 = vmul.f32 %v2055_v33, %v2039_v12 }
0x17f5   : > { %v2058_v37 = vmul.f32 %v3301_v32, %v2056_v34 }
0x17f7   : > { %v2060_v38 = vadd.f32 %v3302_v35, %v2058_v37 }
0x17f9   : > { %3194 = vmatmul.msk.f32.vlgmr.msra.gmra.mxu2 %vm327_vm7, %v2060_v38 }
0x187c   : > { %v2087_v45 = vpop.f32.mrf.mxu2 }
0x187d   : > { %v2088_v46 = vadd.f32 %v3303_v42, %v2087_v45 }
0x187f   : > { %v2090_v47 = vmax.f32 %v2088_v46, 0.0 }
0x1881   : > { %3195 = vmatmul.msk.f32.vlgmr.msrb.gmra.mxu3 %vm231_vm0, %v2090_v47 }
0x1904   : > { %v2121_v26 = vpop.f32.mrf.mxu3 }
0x1905   : > { %v2122_v49 = vadd.f32 %v3304_v48, %v2121_v26 }
0x1907   : > { %v2124_v50 = vadd.f32 %v2122_v49, %v2060_v38 }
0x1909   : > { %v2127_v11 = vsel %vm327_vm7, %v2124_v50, 0.0 }
0x190a   : > { %2128 = vadd.xlane.f32.xlu0 %v2127_v11 }
0x197d   : > { %v2129_v51 = vpop.xlane.xlu0 %2128 }
0x197e   : > { %v2130_v52 = vmul.f32 %v2129_v51, %v3553_v44 }
0x1980   : > { %v2131_v53 = vsub.f32 %v2124_v50, %v2130_v52 }
0x1982   : > { %v2132_v54 = vmul.f32 %v2131_v53, %v2131_v53 }
0x1984   : > { %v2133_v55 = vsel %vm327_vm7, %v2132_v54, 0.0 }
0x1985   : > { %2134 = vadd.xlane.f32.xlu0 %v2133_v55 }
0x19f8   : > { %v2135_v62 = vpop.xlane.xlu0 %2134 }
0x19f9   : > { %v2136_v63 = vmul.f32 %v2135_v62, %v3553_v44 }
0x19fb   : > { %v2137_v0 = vadd.f32 1e-05, %v2136_v63  ;;  %v2550_v63 = vld [vmem:[#allocation2 + $0x4f8] sm:$0xff] }
0x19fd   : > { %3405 = vrsqrt.f32 %v2137_v0  ;;  %vm2144_vm3 = vweird.f32 %v2137_v0 }
0x1a03   : > { %v3406_v2 = vpop.eup %3405 }
0x1a04   : > { %v2139_v3 = vmul.f32 %v3406_v2, %v2137_v0  ;;  %vm2145_vm2 = vweird.f32 %v3406_v2 }
0x1a05   : > { %vm2146_vm4 = vmor %vm2144_vm3, %vm2145_vm2 }
0x1a06   : > { %v2140_v5 = vmul.f32 %v3406_v2, %v2139_v3 }
0x1a08   : > { %v2141_v6 = vmul.f32 0.5, %v2140_v5 }
0x1a0a   : > { %v2142_v1 = vsub.f32 1.5, %v2141_v6  ;;  %v2548_v6 = vld [vmem:[#allocation2 + $0x4e8] sm:$0xff] }
0x1a0c   : > { %v2143_v7 = vmul.f32 %v3406_v2, %v2142_v1  ;;  %v2547_v1 = vld [vmem:[#allocation2 + $0x4e0] sm:$0xff] }
0x1a0e   : > { %v2147_v9 = vsel %vm2146_vm4, %v3406_v2, %v2143_v7  ;;  %v2549_v2 = vld [vmem:[#allocation2 + $0x4f0] sm:$0xff] }
0x1a0f   : > { %v2148_v10 = vmul.f32 %v2147_v9, %v2131_v53 }
0x1a11   : > { %v2150_v12 = vmul.f32 %v3305_v8, %v2148_v10 }
0x1a13   : > { %v3831_v13 = vadd.f32 %v3306_v4, %v2150_v12 }
0x1a15   : > { %3196 = vmatmul.msk.f32.vlgmr.msra.gmra.mxu0 %vm327_vm7, %v3831_v13 }
0x1a92   : > { %v2179_v15 = vpop.f32.mrf.mxu0 }
0x1a93   : > { %v2180_v16 = vadd.f32 %v3307_v14, %v2179_v15 }
0x1a95   : > { %2188 = vrot.lane.b32.xlu1 %v2180_v16, %s3491_s25  ;;  %2214 = vrot.lane.b32.xlu2 %v2180_v16, %s3492_s26 }
0x1a96   : > { %2216 = vrot.lane.b32.xlu0 %v2180_v16, %s3493_s27 }
0x1a9d   : > { %2270 = vrot.lane.b32.xlu1 %v2180_v16, %s3496_s30  ;;  %2272 = vrot.lane.b32.xlu2 %v2180_v16, %s3497_s4 }
0x1a9e   : > { %2244 = vrot.lane.b32.xlu0 %v2180_v16, %s3495_s29 }
0x1aa6   : > { %2242 = vrot.lane.b32.xlu0 %v2180_v16, %s3494_s28 }
0x1aef   : > { %v2215_v17 = vpop.permute.xlu2 %2214 }
0x1af7   : > { %v2273_v28 = vpop.permute.xlu2 %2272 }
0x1b07   : > { %v2189_v18 = vpop.permute.xlu1 %2188 }
0x1b08   : > { %v2217_v61 = vpop.permute.xlu0 %2216  ;;  %3197 = vmatpush.xpose.msk.msrb.mxu1 %vm359_vm8, %v2189_v18 }
0x1b09   : > { %3199 = vmatpush.xpose.msk.msrb.mxu2 %vm359_vm8, %v2217_v61  ;;  %v2185_v61 = vld [vmem:[#allocation2 + $0x498] sm:$0xff] }
0x1b0b   : > { %3198 = vmatmul.msk.f32.vlgmr.msrb.gmra.mxu1 %vm359_vm8, %v2180_v16 }
0x1b0c   : > { %3203 = vmatpush.xpose.msk.msra.mxu1 %vm359_vm8, %v2273_v28  ;;  %3200 = vmatmul.msk.f32.vlgmr.msrb.gmra.mxu2 %vm359_vm8, %v2215_v17 }
0x1b0f   : > { %v2271_v20 = vpop.permute.xlu1 %2270 }
0x1b10   : > { %v2245_v19 = vpop.permute.xlu0 %2244 }
0x1b11   : > { %3201 = vmatpush.xpose.msk.msrb.mxu0 %vm359_vm8, %v2245_v19  ;;  %v2184_v19 = vld [vmem:[#allocation2 + $0x490] sm:$0xff] }
0x1b13   : > { %3204 = vmatmul.msk.f32.vlgmr.msra.gmra.mxu1 %vm359_vm8, %v2271_v20  ;;  %v2183_v20 = vld [vmem:[#allocation2 + $0x488] sm:$0xff] }
0x1b18   : > { %v2243_v21 = vpop.permute.xlu0 %2242 }
0x1b19   : > { %3202 = vmatmul.msk.f32.vlgmr.msrb.gmra.mxu0 %vm359_vm8, %v2243_v21  ;;  %v2182_v21 = vld [vmem:[#allocation2 + $0x480] sm:$0xff] }
0x1b88   : > { %v2211_v22 = vpop.f32.mrf.mxu1 }
0x1b89   : > { %v2298_v30 = vadd.f32 %v2211_v22, %v3683_v43  ;;  %v2521_v22 = vld [vmem:[#allocation2 + $0x4d0] sm:$0xff] }
0x1b8b   : > { %v2302_v34 = vsel %vm359_vm8, %v2298_v30, -inf }
0x1b8f   : > { %v2239_v23 = vpop.f32.mrf.mxu2 }
0x1b90   : > { %v2299_v24 = vadd.f32 %v2239_v23, %v3683_v43  ;;  %v2295_v25 = vpop.f32.mrf.mxu1  ;;  %v2520_v23 = vld [vmem:[#allocation2 + $0x4c8] sm:$0xff] }
0x1b91   : > { %v2301_v36 = vadd.f32 %v2295_v25, %v3683_v43  ;;  %v2518_v25 = vld [vmem:[#allocation2 + $0x4b8] sm:$0xff] }
0x1b92   : > { %v2305_v27 = vsel %vm359_vm8, %v2299_v24, -inf }
0x1b93   : > { %2306 = vmax.xlane.f32.xlu2 %v2305_v27  ;;  %v2311_v29 = vsel %vm359_vm8, %v2301_v36, -inf }
0x1b94   : > { %2312 = vmax.xlane.f32.xlu1 %v2311_v29 }
0x1b96   : > { %v2267_v31 = vpop.f32.mrf.mxu0 }
0x1b97   : > { %v2300_v32 = vadd.f32 %v2267_v31, %v3683_v43 }
0x1b99   : > { %v2308_v33 = vsel %vm359_vm8, %v2300_v32, -inf }
0x1b9a   : > { %2309 = vmax.xlane.f32.xlu0 %v2308_v33 }
0x1b9b   : > { %2303 = vmax.xlane.f32.xlu2 %v2302_v34 }
0x1c06   : > { %v2307_v35 = vpop.xlane.xlu2 %2306 }
0x1c07   : > { %v2315_v37 = vsub.f32 %v2299_v24, %v2307_v35  ;;  %v2313_v38 = vpop.xlane.xlu1 %2312  ;;  %v2519_v24 = vld [vmem:[#allocation2 + $0x4c0] sm:$0xff] }
0x1c08   : > { %v2317_v39 = vsub.f32 %v2301_v36, %v2313_v38  ;;  %v3309_v38 = vld [vmem:[#allocation2 + $0x4a0] ss:$0 sm:$0xff] }
0x1c09   : > { %v2320_v40 = vmul.f32 1.442695, %v2315_v37 }
0x1c0a   : > { %v2324_v41 = vmul.f32 1.442695, %v2317_v39 }
0x1c0b   : > { %3407 = vpow2.f32 %v2320_v40 }
0x1c0c   : > { %3409 = vpow2.f32 %v2324_v41 }
0x1c0d   : > { %v2310_v42 = vpop.xlane.xlu0 %2309 }
0x1c0e   : > { %v2316_v45 = vsub.f32 %v2300_v32, %v2310_v42  ;;  %v2304_v11 = vpop.xlane.xlu2 %2303 }
0x1c0f   : > { %v2314_v51 = vsub.f32 %v2298_v30, %v2304_v11 }
0x1c10   : > { %v2322_v46 = vmul.f32 1.442695, %v2316_v45 }
0x1c11   : > { %v3408_v47 = vpop.eup %3407  ;;  %v2318_v52 = vmul.f32 1.442695, %v2314_v51 }
0x1c12   : > { %v3410_v48 = vpop.eup %3409  ;;  %3411 = vpow2.f32 %v2322_v46  ;;  %v2329_v43 = vsel %vm359_vm8, %v3408_v47, 0.0 }
0x1c13   : > { %2330 = vadd.xlane.f32.xlu0 %v2329_v43  ;;  %v2335_v26 = vsel %vm359_vm8, %v3410_v48, 0.0  ;;  %3413 = vpow2.f32 %v2318_v52 }
0x1c14   : > { %2336 = vadd.xlane.f32.xlu1 %v2335_v26 }
0x1c18   : > { %v3412_v49 = vpop.eup %3411 }
0x1c19   : > { %v2332_v50 = vsel %vm359_vm8, %v3412_v49, 0.0  ;;  %v3414_v53 = vpop.eup %3413 }
0x1c1a   : > { %2333 = vadd.xlane.f32.xlu2 %v2332_v50  ;;  %v2326_v54 = vsel %vm359_vm8, %v3414_v53, 0.0 }
0x1c27   : > { %2372 = vrot.lane.b32.xlu0 %v2180_v16, %s3500_s7 }
0x1c2d   : > { %2424 = vrot.lane.b32.xlu1 %v2180_v16, %s3499_s6 }
0x1c32   : > { %2398 = vrot.lane.b32.xlu2 %v2180_v16, %s3501_s8 }
0x1c3a   : > { %2346 = vrot.lane.b32.xlu2 %v2180_v16, %s3498_s5  ;;  %v3308_v16 = vld [vmem:[#allocation2 + $0x500] ss:$0 sm:$0xff] }
0x1c51   : > { %2327 = vadd.xlane.f32.xlu0 %v2326_v54 }
0x1c86   : > { %v2331_v55 = vpop.xlane.xlu0 %2330 }
0x1c87   : > { %v2337_v58 = vpop.xlane.xlu1 %2336 }
0x1c8d   : > { %v2334_v57 = vpop.xlane.xlu2 %2333 }
0x1c8e   : > { %3415 = vrcp.f32 %v2334_v57 }
0x1c8f   : > { %3417 = vrcp.f32 %v2331_v55  ;;  %v3310_v55 = vld [vmem:[#allocation2 + $0x4a8] ss:$0 sm:$0xff] }
0x1c90   : > { %3419 = vrcp.f32 %v2337_v58 }
0x1c94   : > { %v3416_v59 = vpop.eup %3415 }
0x1c95   : > { %v2344_v60 = vmul.f32 %v3416_v59, %v3412_v49  ;;  %v2399_v62 = vpop.permute.xlu2 %2398  ;;  %v3418_v0 = vpop.eup %3417  ;;  %v3311_v59 = vld [vmem:[#allocation2 + $0x4b0] ss:$0 sm:$0xff] }
0x1c96   : > { %2419 = vmatpush.msra.mxu0 %v2399_v62  ;;  %v2343_v3 = vmul.f32 %v3418_v0, %v3408_v47  ;;  %v3420_v7 = vpop.eup %3419 }
0x1c97   : > { %3207 = vmatmul.msk.f32.vlgmr.msra.gmra.mxu0 %vm359_vm8, %v2344_v60  ;;  %v2345_v9 = vmul.f32 %v3420_v7, %v3410_v48 }
0x1c98   : > { %2565 = vmatpush.msrb.mxu0 %v2550_v63  ;;  %v3312_v63 = vld [vmem:[#allocation2 + $0x4d8] ss:$0 sm:$0xff] }
0x1c99   : > { %v2373_v5 = vpop.permute.xlu0 %2372 }
0x1c9a   : > { %2393 = vmatpush.msra.mxu3 %v2373_v5  ;;  %2566 = vmatpush.msrb.mxu0 %v2549_v2 }
0x1c9b   : > { %3206 = vmatmul.msk.f32.vlgmr.msra.gmra.mxu3 %vm359_vm8, %v2343_v3 }
0x1c9c   : > { %2567 = vmatpush.msrb.mxu0 %v2548_v6  ;;  %2539 = vmatpush.msrb.mxu3 %v2521_v22 }
0x1c9d   : > { %v2347_v8 = vpop.permute.xlu2 %2346 }
0x1c9e   : > { %2367 = vmatpush.msra.mxu2 %v2347_v8  ;;  %2568 = vmatpush.msrb.mxu0 %v2547_v1 }
0x1c9f   : > { %3211 = vmatmul.msk.f32.vlgmr.msrb.gmra.mxu0 %vm327_vm7, %v3775_v56  ;;  %v2425_v10 = vpop.permute.xlu1 %2424  ;;  %2540 = vmatpush.msrb.mxu3 %v2520_v23 }
0x1ca0   : > { %2445 = vmatpush.msrb.mxu1 %v2425_v10  ;;  %2481 = vmatpush.msrb.mxu2 %v2185_v61 }
0x1ca1   : > { %3208 = vmatmul.msk.f32.vlgmr.msrb.gmra.mxu1 %vm359_vm8, %v2345_v9  ;;  %2541 = vmatpush.msrb.mxu3 %v2519_v24 }
0x1ca2   : > { %2482 = vmatpush.msrb.mxu2 %v2184_v19 }
0x1ca3   : > { %2542 = vmatpush.msrb.mxu3 %v2518_v25 }
0x1ca4   : > { %2483 = vmatpush.msrb.mxu2 %v2183_v20 }
0x1ca6   : > { %2484 = vmatpush.msrb.mxu2 %v2182_v21 }
0x1cc4   : > { %v2328_v4 = vpop.xlane.xlu0 %2327 }
0x1cc5   : > { %3421 = vrcp.f32 %v2328_v4 }
0x1ccb   : > { %v3422_v12 = vpop.eup %3421 }
0x1ccc   : > { %v2342_v14 = vmul.f32 %v3422_v12, %v3414_v53 }
0x1cce   : > { %3205 = vmatmul.msk.f32.vlgmr.msra.gmra.mxu2 %vm359_vm8, %v2342_v14 }
0x1d14   : > { %v2421_v15 = vpop.f32.mrf.mxu0 }
0x1d15   : > { %2455 = vrot.lane.b32.xlu2 %v2421_v15, %s3504_s11 }
0x1d1c   : > { %v2570_v17 = vpop.f32.mrf.mxu0 }
0x1d1d   : > { %v3873_v18 = vadd.f32 %v3308_v16, %v2570_v17 }
0x1d1e   : > { %v2395_v28 = vpop.f32.mrf.mxu3  ;;  %v2447_v56 = vpop.f32.mrf.mxu1 }
0x1d1f   : > { %2606 = vrot.lane.b32.xlu0 %v3873_v18, %s3492_s26  ;;  %3212 = vmatpush.xpose.msk.msra.mxu1 %vm359_vm8, %v3873_v18 }
0x1d20   : > { %2451 = vrot.lane.b32.xlu1 %v2395_v28, %s3503_s10 }
0x1d27   : > { %2634 = vrot.lane.b32.xlu0 %v3873_v18, %s3494_s28 }
0x1d28   : > { %2459 = vrot.lane.b32.xlu1 %v2447_v56, %s3502_s9 }
0x1d2f   : > { %2662 = vrot.lane.b32.xlu0 %v3873_v18, %s3496_s30 }
0x1d51   : > { %v2369_v29 = vpop.f32.mrf.mxu2 }
0x1d6f   : > { %v2456_v31 = vpop.permute.xlu2 %2455 }
0x1d91   : > { %v2607_v36 = vpop.permute.xlu0 %2606 }
0x1d92   : > { %v2452_v27 = vpop.permute.xlu1 %2451  ;;  %3214 = vmatpush.xpose.msk.msra.mxu2 %vm359_vm8, %v2607_v36 }
0x1d93   : > { %v2462_v30 = vsel %vm359_vm8, %v2369_v29, %v2452_v27 }
0x1d94   : > { %v2463_v34 = vsel %vm636_vm12, %v2462_v30, %v2456_v31 }
0x1d99   : > { %v2635_v32 = vpop.permute.xlu0 %2634 }
0x1d9a   : > { %v2460_v33 = vpop.permute.xlu1 %2459  ;;  %3216 = vmatpush.xpose.msk.msra.mxu3 %vm359_vm8, %v2635_v32 }
0x1d9b   : > { %v2464_v35 = vsel %vm638_vm13, %v2463_v34, %v2460_v33 }
0x1d9c   : > { %3209 = vmatmul.msk.f32.vlgmr.msrb.gmra.mxu2 %vm327_vm7, %v2464_v35 }
0x1da1   : > { %v2663_v37 = vpop.permute.xlu0 %2662 }
0x1da2   : > { %3218 = vmatpush.xpose.msk.msra.mxu0 %vm359_vm8, %v2663_v37 }
0x1e1f   : > { %v2486_v39 = vpop.f32.mrf.mxu2 }
0x1e20   : > { %v2487_v40 = vadd.f32 %v3309_v38, %v2486_v39 }
0x1e22   : > { %v2489_v41 = vadd.f32 %v2487_v40, %v3831_v13 }
0x1e24   : > { %v2492_v42 = vsel %vm327_vm7, %v2489_v41, 0.0 }
0x1e25   : > { %2493 = vadd.xlane.f32.xlu2 %v2492_v42 }
0x1e98   : > { %v2494_v45 = vpop.xlane.xlu2 %2493 }
0x1e99   : > { %v2495_v46 = vmul.f32 %v2494_v45, %v3553_v44 }
0x1e9b   : > { %v2496_v47 = vsub.f32 %v2489_v41, %v2495_v46 }
0x1e9d   : > { %v2497_v48 = vmul.f32 %v2496_v47, %v2496_v47 }
0x1e9f   : > { %v2498_v43 = vsel %vm327_vm7, %v2497_v48, 0.0 }
0x1ea0   : > { %2499 = vadd.xlane.f32.xlu1 %v2498_v43 }
0x1f13   : > { %v2500_v26 = vpop.xlane.xlu1 %2499 }
0x1f14   : > { %v2501_v49 = vmul.f32 %v2500_v26, %v3553_v44 }
0x1f16   : > { %v2502_v50 = vadd.f32 1e-05, %v2501_v49 }
0x1f18   : > { %3423 = vrsqrt.f32 %v2502_v50  ;;  %vm2509_vm6 = vweird.f32 %v2502_v50 }
0x1f1e   : > { %v3424_v11 = vpop.eup %3423 }
0x1f1f   : > { %v2504_v51 = vmul.f32 %v3424_v11, %v2502_v50  ;;  %vm2510_vm5 = vweird.f32 %v3424_v11 }
0x1f20   : > { %vm2511_vm9 = vmor %vm2509_vm6, %vm2510_vm5 }
0x1f21   : > { %v2505_v52 = vmul.f32 %v3424_v11, %v2504_v51 }
0x1f23   : > { %v2506_v13 = vmul.f32 0.5, %v2505_v52  ;;  %v2576_v52 = vld [vmem:[#allocation2 + $0x520] sm:$0xff] }
0x1f25   : > { %v2507_v53 = vsub.f32 1.5, %v2506_v13  ;;  %v2575_v13 = vld [vmem:[#allocation2 + $0x518] sm:$0xff] }
0x1f27   : > { %v2508_v54 = vmul.f32 %v3424_v11, %v2507_v53  ;;  %v2574_v53 = vld [vmem:[#allocation2 + $0x510] sm:$0xff] }
0x1f29   : > { %v2512_v57 = vsel %vm2511_vm9, %v3424_v11, %v2508_v54  ;;  %v2573_v54 = vld [vmem:[#allocation2 + $0x508] sm:$0xff] }
0x1f2a   : > { %v2513_v58 = vmul.f32 %v2512_v57, %v2496_v47 }
0x1f2c   : > { %v2515_v60 = vmul.f32 %v3310_v55, %v2513_v58 }
0x1f2e   : > { %v3897_v62 = vadd.f32 %v3311_v59, %v2515_v60 }
0x1f30   : > { %3210 = vmatmul.msk.f32.vlgmr.msrb.gmra.mxu3 %vm327_vm7, %v3897_v62 }
0x1fb3   : > { %v2544_v0 = vpop.f32.mrf.mxu3 }
0x1fb4   : > { %v2545_v2 = vadd.f32 %v3312_v63, %v2544_v0 }
0x1fb6   : > { %2660 = vrot.lane.b32.xlu0 %v2545_v2, %s3496_s30  ;;  %2632 = vrot.lane.b32.xlu1 %v2545_v2, %s3494_s28 }
0x1fb7   : > { %2604 = vrot.lane.b32.xlu2 %v2545_v2, %s3492_s26  ;;  %3213 = vmatmul.msk.f32.vlgmr.msra.gmra.mxu1 %vm359_vm8, %v2545_v2  ;;  %v3313_v2 = vld [vmem:[#allocation2 + $0x528] ss:$0 sm:$0xff] }
0x2011   : > { %v2605_v3 = vpop.permute.xlu2 %2604 }
0x2012   : > { %3215 = vmatmul.msk.f32.vlgmr.msra.gmra.mxu2 %vm359_vm8, %v2605_v3 }
0x2028   : > { %v2633_v5 = vpop.permute.xlu1 %2632  ;;  %v2661_v6 = vpop.permute.xlu0 %2660 }
0x2029   : > { %3217 = vmatmul.msk.f32.vlgmr.msra.gmra.mxu3 %vm359_vm8, %v2633_v5  ;;  %3219 = vmatmul.msk.f32.vlgmr.msra.gmra.mxu0 %vm359_vm8, %v2661_v6 }
0x2034   : > { %v2601_v8 = vpop.f32.mrf.mxu1 }
0x2035   : > { %v2688_v9 = vsel %vm515_vm11, %v2601_v8, -inf }
0x2095   : > { %v2629_v1 = vpop.f32.mrf.mxu2 }
0x2096   : > { %v2691_v7 = vsel %vm515_vm11, %v2629_v1, -inf }
0x2097   : > { %2692 = vmax.xlane.f32.xlu0 %v2691_v7 }
0x209f   : > { %2689 = vmax.xlane.f32.xlu0 %v2688_v9 }
0x20a6   : > { %v2685_v10 = vpop.f32.mrf.mxu0 }
0x20a7   : > { %v2697_v4 = vsel %vm515_vm11, %v2685_v10, -inf }
0x20a8   : > { %2698 = vmax.xlane.f32.xlu1 %v2697_v4 }
0x20ac   : > { %v2657_v12 = vpop.f32.mrf.mxu3 }
0x20ad   : > { %v2694_v14 = vsel %vm515_vm11, %v2657_v12, -inf }
0x20ae   : > { %2695 = vmax.xlane.f32.xlu2 %v2694_v14  ;;  %v2910_v14 = vld [vmem:[#allocation2 + $0x550] sm:$0xff] }
0x210a   : > { %v2693_v15 = vpop.xlane.xlu0 %2692 }
0x210b   : > { %v2701_v16 = vsub.f32 %v2629_v1, %v2693_v15  ;;  %v2909_v15 = vld [vmem:[#allocation2 + $0x548] sm:$0xff] }
0x210d   : > { %v2706_v17 = vmul.f32 1.442695, %v2701_v16  ;;  %v2908_v16 = vld [vmem:[#allocation2 + $0x540] sm:$0xff] }
0x210f   : > { %3425 = vpow2.f32 %v2706_v17  ;;  %v2944_v17 = vld [vmem:[#allocation2 + $0x598] sm:$0xff] }
0x2112   : > { %v2690_v29 = vpop.xlane.xlu0 %2689 }
0x2113   : > { %v2700_v30 = vsub.f32 %v2601_v8, %v2690_v29  ;;  %v3314_v29 = vld [vmem:[#allocation2 + $0x530] ss:$0 sm:$0xff] }
0x2115   : > { %v3426_v28 = vpop.eup %3425  ;;  %v2704_v31 = vmul.f32 1.442695, %v2700_v30 }
0x2116   : > { %v2715_v56 = vsel %vm515_vm11, %v3426_v28, 0.0 }
0x2117   : > { %2716 = vadd.xlane.f32.xlu2 %v2715_v56 }
0x211b   : > { %v2699_v61 = vpop.xlane.xlu1 %2698 }
0x211c   : > { %v2703_v19 = vsub.f32 %v2685_v10, %v2699_v61 }
0x211e   : > { %v2710_v20 = vmul.f32 1.442695, %v2703_v19  ;;  %v2942_v19 = vld [vmem:[#allocation2 + $0x588] sm:$0xff] }
0x2120   : > { %3427 = vpow2.f32 %v2710_v20 }
0x2121   : > { %v2696_v21 = vpop.xlane.xlu2 %2695 }
0x2122   : > { %v2702_v22 = vsub.f32 %v2657_v12, %v2696_v21  ;;  %v2911_v12 = vld [vmem:[#allocation2 + $0x558] sm:$0xff]  ;;  %v2941_v21 = vld [vmem:[#allocation2 + $0x580] sm:$0xff] }
0x2124   : > { %v2708_v23 = vmul.f32 1.442695, %v2702_v22 }
0x2126   : > { %v3428_v24 = vpop.eup %3427  ;;  %3429 = vpow2.f32 %v2708_v23 }
0x2127   : > { %v2721_v25 = vsel %vm515_vm11, %v3428_v24, 0.0  ;;  %3431 = vpow2.f32 %v2704_v31 }
0x2128   : > { %2722 = vadd.xlane.f32.xlu0 %v2721_v25 }
0x212c   : > { %v3430_v36 = vpop.eup %3429 }
0x212d   : > { %v2718_v27 = vsel %vm515_vm11, %v3430_v36, 0.0  ;;  %v3432_v32 = vpop.eup %3431 }
0x212e   : > { %2719 = vadd.xlane.f32.xlu1 %v2718_v27  ;;  %v2712_v33 = vsel %vm515_vm11, %v3432_v32, 0.0 }
0x212f   : > { %2759 = vrot.lane.b32.xlu2 %v3873_v18, %s3493_s27 }
0x213c   : > { %2813 = vrot.lane.b32.xlu0 %v3873_v18, %s3497_s4 }
0x2144   : > { %2732 = vrot.lane.b32.xlu0 %v3873_v18, %s3491_s25 }
0x2147   : > { %2786 = vrot.lane.b32.xlu1 %v3873_v18, %s3495_s29 }
0x2158   : > { %2713 = vadd.xlane.f32.xlu2 %v2712_v33 }
0x218a   : > { %v2717_v34 = vpop.xlane.xlu2 %2716 }
0x218b   : > { %3433 = vrcp.f32 %v2717_v34 }
0x2191   : > { %v3434_v35 = vpop.eup %3433 }
0x2192   : > { %v2729_v37 = vmul.f32 %v3434_v35, %v3426_v28  ;;  %v2760_v38 = vpop.permute.xlu2 %2759  ;;  %v2943_v28 = vld [vmem:[#allocation2 + $0x590] sm:$0xff]  ;;  %v2940_v35 = vld [vmem:[#allocation2 + $0x578] sm:$0xff] }
0x2193   : > { %3222 = vmatpush.msk.msrb.mxu2 %vm519_vm10, %v2760_v38  ;;  %v2938_v38 = vld [vmem:[#allocation2 + $0x568] sm:$0xff] }
0x2194   : > { %3223 = vmatmul.msk.f32.vlgmr.msrb.gmra.mxu2 %vm515_vm11, %v2729_v37  ;;  %v2939_v37 = vld [vmem:[#allocation2 + $0x570] sm:$0xff] }
0x2195   : > { %2929 = vmatpush.msra.mxu2 %v2911_v12 }
0x2197   : > { %2930 = vmatpush.msra.mxu2 %v2910_v14 }
0x2199   : > { %2931 = vmatpush.msra.mxu2 %v2909_v15 }
0x219b   : > { %v2723_v39 = vpop.xlane.xlu0 %2722  ;;  %2932 = vmatpush.msra.mxu2 %v2908_v16 }
0x219c   : > { %3435 = vrcp.f32 %v2723_v39  ;;  %v3316_v39 = vld [vmem:[#allocation2 + $0x560] ss:$0 sm:$0xff] }
0x21a1   : > { %v2720_v41 = vpop.xlane.xlu1 %2719 }
0x21a2   : > { %v3436_v40 = vpop.eup %3435  ;;  %3437 = vrcp.f32 %v2720_v41 }
0x21a3   : > { %v2731_v18 = vmul.f32 %v3436_v40, %v3428_v24 }
0x21a8   : > { %v3438_v45 = vpop.eup %3437 }
0x21a9   : > { %v2730_v47 = vmul.f32 %v3438_v45, %v3430_v36 }
0x21ae   : > { %v2814_v42 = vpop.permute.xlu0 %2813 }
0x21af   : > { %3226 = vmatpush.msk.msrb.mxu0 %vm519_vm10, %v2814_v42  ;;  %v3317_v42 = vld [vmem:[#allocation2 + $0x5a8] ss:$0 sm:$0xff] }
0x21b0   : > { %3227 = vmatmul.msk.f32.vlgmr.msrb.gmra.mxu0 %vm515_vm11, %v2731_v18 }
0x21b6   : > { %v2733_v46 = vpop.permute.xlu0 %2732 }
0x21b7   : > { %3220 = vmatpush.msk.msrb.mxu1 %vm519_vm10, %v2733_v46 }
0x21b9   : > { %v2787_v48 = vpop.permute.xlu1 %2786  ;;  %2871 = vmatpush.msra.mxu1 %v2576_v52  ;;  %v3002_v52 = vld [vmem:[#allocation2 + $0x5d0] sm:$0xff] }
0x21ba   : > { %3224 = vmatpush.msk.msrb.mxu3 %vm519_vm10, %v2787_v48 }
0x21bb   : > { %3225 = vmatmul.msk.f32.vlgmr.msrb.gmra.mxu3 %vm515_vm11, %v2730_v47  ;;  %2872 = vmatpush.msra.mxu1 %v2575_v13  ;;  %v3001_v13 = vld [vmem:[#allocation2 + $0x5c8] sm:$0xff] }
0x21bd   : > { %2873 = vmatpush.msra.mxu1 %v2574_v53  ;;  %v3000_v53 = vld [vmem:[#allocation2 + $0x5c0] sm:$0xff] }
0x21bf   : > { %2874 = vmatpush.msra.mxu1 %v2573_v54 }
0x21cb   : > { %v2714_v43 = vpop.xlane.xlu2 %2713 }
0x21cc   : > { %3439 = vrcp.f32 %v2714_v43 }
0x21d2   : > { %v3440_v26 = vpop.eup %3439 }
0x21d3   : > { %v2728_v49 = vmul.f32 %v3440_v26, %v3432_v32  ;;  %v3315_v32 = vld [vmem:[#allocation2 + $0x538] ss:$0 sm:$0xff] }
0x21d5   : > { %3221 = vmatmul.msk.f32.vlgmr.msrb.gmra.mxu1 %vm515_vm11, %v2728_v49 }
0x2217   : > { %v2783_v50 = vpop.f32.mrf.mxu2 }
0x2218   : > { %2841 = vrot.lane.b32.xlu1 %v2783_v50, %s3503_s10 }
0x222d   : > { %v2837_v11 = vpop.f32.mrf.mxu0 }
0x222e   : > { %2849 = vrot.lane.b32.xlu1 %v2837_v11, %s3502_s9 }
0x223e   : > { %v2810_v51 = vpop.f32.mrf.mxu3 }
0x223f   : > { %2845 = vrot.lane.b32.xlu0 %v2810_v51, %s3504_s11  ;;  %v3003_v51 = vld [vmem:[#allocation2 + $0x5d8] sm:$0xff] }
0x2240   : > { %3021 = vmatpush.msra.mxu0 %v3003_v51 }
0x2242   : > { %3022 = vmatpush.msra.mxu0 %v3002_v52 }
0x2244   : > { %3023 = vmatpush.msra.mxu0 %v3001_v13 }
0x2246   : > { %3024 = vmatpush.msra.mxu0 %v3000_v53 }
0x2252   : > { %v2756_v57 = vpop.f32.mrf.mxu1 }
0x228a   : > { %v2842_v55 = vpop.permute.xlu1 %2841 }
0x228b   : > { %v2852_v58 = vsel %vm359_vm8, %v2756_v57, %v2842_v55 }
0x22a0   : > { %v2850_v60 = vpop.permute.xlu1 %2849 }
0x22b1   : > { %v2846_v59 = vpop.permute.xlu0 %2845 }
0x22b2   : > { %v2853_v63 = vsel %vm636_vm12, %v2852_v58, %v2846_v59 }
0x22b3   : > { %v2854_v0 = vsel %vm638_vm13, %v2853_v63, %v2850_v60 }
0x22b4   : > { %3228 = vmatmul.msk.f32.vlgmr.msra.gmra.mxu1 %vm327_vm7, %v2854_v0 }
0x2331   : > { %v2876_v3 = vpop.f32.mrf.mxu1 }
0x2332   : > { %v2877_v5 = vadd.f32 %v3313_v2, %v2876_v3  ;;  %v3318_v3 = vld [vmem:[#allocation2 + $0x5b0] ss:$0 sm:$0xff] }
0x2334   : > { %v2879_v6 = vadd.f32 %v2877_v5, %v3897_v62  ;;  %v2945_v62 = vld [vmem:[#allocation2 + $0x5a0] sm:$0xff] }
0x2335   : > { %2959 = vmatpush.msra.mxu3 %v2945_v62 }
0x2336   : > { %v2882_v1 = vsel %vm327_vm7, %v2879_v6, 0.0 }
0x2337   : > { %2883 = vadd.xlane.f32.xlu0 %v2882_v1  ;;  %2960 = vmatpush.msra.mxu3 %v2944_v17  ;;  %v3319_v1 = vld [vmem:[#allocation2 + $0x5b8] ss:$0 sm:$0xff] }
0x2339   : > { %2961 = vmatpush.msra.mxu3 %v2943_v28 }
0x233b   : > { %2962 = vmatpush.msra.mxu3 %v2942_v19 }
0x233d   : > { %2963 = vmatpush.msra.mxu3 %v2941_v21 }
0x233f   : > { %2964 = vmatpush.msra.mxu3 %v2940_v35 }
0x2341   : > { %2965 = vmatpush.msra.mxu3 %v2939_v37 }
0x2343   : > { %2966 = vmatpush.msra.mxu3 %v2938_v38 }
0x23aa   : > { %v2884_v7 = vpop.xlane.xlu0 %2883 }
0x23ab   : > { %v2885_v8 = vmul.f32 %v2884_v7, %v3553_v44 }
0x23ad   : > { %v2886_v9 = vsub.f32 %v2879_v6, %v2885_v8 }
0x23af   : > { %v2887_v10 = vmul.f32 %v2886_v9, %v2886_v9 }
0x23b1   : > { %v2888_v4 = vsel %vm327_vm7, %v2887_v10, 0.0 }
0x23b2   : > { %2889 = vadd.xlane.f32.xlu1 %v2888_v4 }
0x2425   : > { %v2890_v56 = vpop.xlane.xlu1 %2889 }
0x2426   : > { %v2891_v61 = vmul.f32 %v2890_v56, %v3553_v44 }
0x2428   : > { %v2892_v20 = vadd.f32 1e-05, %v2891_v61 }
0x242a   : > { %3441 = vrsqrt.f32 %v2892_v20  ;;  %vm2899_vm10 = vweird.f32 %v2892_v20 }
0x2430   : > { %v3442_v22 = vpop.eup %3441 }
0x2431   : > { %v2894_v23 = vmul.f32 %v3442_v22, %v2892_v20  ;;  %vm2900_vm8 = vweird.f32 %v3442_v22 }
0x2432   : > { %vm2901_vm11 = vmor %vm2899_vm10, %vm2900_vm8 }
0x2433   : > { %v2895_v24 = vmul.f32 %v3442_v22, %v2894_v23 }
0x2435   : > { %v2896_v25 = vmul.f32 0.5, %v2895_v24 }
0x2437   : > { %v2897_v36 = vsub.f32 1.5, %v2896_v25 }
0x2439   : > { %v2898_v27 = vmul.f32 %v3442_v22, %v2897_v36 }
0x243b   : > { %v2902_v30 = vsel %vm2901_vm11, %v3442_v22, %v2898_v27 }
0x243c   : > { %v2903_v31 = vmul.f32 %v2902_v30, %v2886_v9 }
0x243e   : > { %v2905_v33 = vmul.f32 %v3314_v29, %v2903_v31 }
0x2440   : > { %v2907_v34 = vadd.f32 %v3315_v32, %v2905_v33 }
0x2442   : > { %3229 = vmatmul.msk.f32.vlgmr.msra.gmra.mxu2 %vm327_vm7, %v2907_v34 }
0x24c5   : > { %v2934_v40 = vpop.f32.mrf.mxu2 }
0x24c6   : > { %v2935_v41 = vadd.f32 %v3316_v39, %v2934_v40 }
0x24c8   : > { %v2937_v18 = vmax.f32 %v2935_v41, 0.0 }
0x24ca   : > { %3230 = vmatmul.msk.f32.vlgmr.msra.gmra.mxu3 %vm231_vm0, %v2937_v18 }
0x254d   : > { %v2968_v45 = vpop.f32.mrf.mxu3 }
0x254e   : > { %v2969_v46 = vadd.f32 %v3317_v42, %v2968_v45 }
0x2550   : > { %v2971_v47 = vadd.f32 %v2969_v46, %v2907_v34 }
0x2552   : > { %v2974_v48 = vsel %vm327_vm7, %v2971_v47, 0.0 }
0x2553   : > { %2975 = vadd.xlane.f32.xlu2 %v2974_v48 }
0x25c6   : > { %v2976_v43 = vpop.xlane.xlu2 %2975 }
0x25c7   : > { %v2977_v26 = vmul.f32 %v2976_v43, %v3553_v44 }
0x25c9   : > { %v2978_v49 = vsub.f32 %v2971_v47, %v2977_v26 }
0x25cb   : > { %v2979_v50 = vmul.f32 %v2978_v49, %v2978_v49 }
0x25cd   : > { %v2980_v11 = vsel %vm327_vm7, %v2979_v50, 0.0 }
0x25ce   : > { %2981 = vadd.xlane.f32.xlu2 %v2980_v11 }
0x2641   : > { %v2982_v54 = vpop.xlane.xlu2 %2981 }
0x2642   : > { %v2983_v55 = vmul.f32 %v2982_v54, %v3553_v44  ;;  %v3320_v44 = vld [vmem:[#allocation2 + $0x5e0] ss:$0 sm:$0xff] }
0x2644   : > { %v2984_v57 = vadd.f32 1e-05, %v2983_v55 }
0x2646   : > { %3443 = vrsqrt.f32 %v2984_v57  ;;  %vm2991_vm12 = vweird.f32 %v2984_v57 }
0x264c   : > { %v3444_v58 = vpop.eup %3443 }
0x264d   : > { %v2986_v59 = vmul.f32 %v3444_v58, %v2984_v57  ;;  %vm2992_vm0 = vweird.f32 %v3444_v58 }
0x264e   : > { %vm2993_vm13 = vmor %vm2991_vm12, %vm2992_vm0 }
0x264f   : > { %v2987_v60 = vmul.f32 %v3444_v58, %v2986_v59 }
0x2651   : > { %v2988_v63 = vmul.f32 0.5, %v2987_v60 }
0x2653   : > { %v2989_v0 = vsub.f32 1.5, %v2988_v63 }
0x2655   : > { %v2990_v2 = vmul.f32 %v3444_v58, %v2989_v0 }
0x2657   : > { %v2994_v5 = vsel %vm2993_vm13, %v3444_v58, %v2990_v2 }
0x2658   : > { %v2995_v6 = vmul.f32 %v2994_v5, %v2978_v49 }
0x265a   : > { %v2997_v7 = vmul.f32 %v3318_v3, %v2995_v6 }
0x265c   : > { %v2999_v8 = vadd.f32 %v3319_v1, %v2997_v7 }
0x265e   : > { %3231 = vmatmul.msk.f32.vlgmr.msra.gmra.mxu0 %vm327_vm7, %v2999_v8 }
0x26db   : > { %v3026_v9 = vpop.f32.mrf.mxu0 }
0x26dc   : > { %v3027_v10 = vadd.f32 %v3320_v44, %v3026_v9 }
0x26de   : > { %3029 = vst [vmem:[%s202_s20] sm:$0xff] %v3027_v10 }
0x26df PF: > { %s14_s12 = sadd.s32 1, %s3485_s12  }
0x26e0   : > { %p11_p7 = scmp.ge.s32.totalorder %s14_s12, 4  }
0x26e2   :  { %13 = sbr.rel (!%p11_p7) target bundleno = 1 (0x1), region = 70 }
0x26e7   :  { %3049 = vsyncpa [#allocation3], 1 }
0x26e8   :  { %3051 = vsyncpa [#allocation3 + $0x1], 1 }

</bundles_post_ra>
